<compile_context>
chip_gen: v5e
topology: v5e:2x2
jax: 0.10.0
libtpu: 0.0.40
codegen_flags: <defaults>
</compile_context>

<pallas_src>
import functools

import jax
import jax.numpy as jnp
from jax.experimental import pallas as pl
from jax.experimental.pallas import tpu as pltpu

IN_FEATURES = 28 * 28          # 784 (used directly as fc1's K — no pad)
H1, H2, H3 = 256, 128, 64
H3_PAD = 128                   # pad fc3 output width / fc4 K dim to a full lane tile
NUM_CLASSES = 10
OUT_PAD = 128                  # lane-dense output slab
_NEG = -1e30                   # "minus infinity" for masked logit lanes (fits bf16 range)


# ----------------------------------------------------------------------------
# Pallas kernel: fused 4-layer MLP + ReLU + log_softmax for one batch tile.
# ----------------------------------------------------------------------------
def _mlp_kernel(x_ref,
                w1_ref, b1_ref,
                w2_ref, b2_ref,
                w3_ref, b3_ref,
                w4_ref, b4_ref,
                o_ref):
    # Input arrives f32 from HBM; downcast to bf16 in VMEM (VPU op, cheap) so the
    # MXU runs in bf16 with f32 accumulation.
    x = x_ref[...].astype(jnp.bfloat16)                                  # (TB, 784)

    # fc1 + ReLU
    h = jnp.dot(x, w1_ref[...], preferred_element_type=jnp.float32) + b1_ref[...]
    h = jnp.maximum(h, 0.0).astype(jnp.bfloat16)                         # (TB, 256)

    # fc2 + ReLU
    h = jnp.dot(h, w2_ref[...], preferred_element_type=jnp.float32) + b2_ref[...]
    h = jnp.maximum(h, 0.0).astype(jnp.bfloat16)                         # (TB, 128)

    # fc3 + ReLU (columns 64..127 are zero-padded weights/bias -> stay exactly 0)
    h = jnp.dot(h, w3_ref[...], preferred_element_type=jnp.float32) + b3_ref[...]
    h = jnp.maximum(h, 0.0).astype(jnp.bfloat16)                         # (TB, 128)

    # fc4 into a lane-dense 128-wide logit slab
    logits = jnp.dot(h, w4_ref[...], preferred_element_type=jnp.float32) + b4_ref[...]  # (TB, 128)

    # Mask the 118 pad columns before the softmax reductions.
    lane = jax.lax.broadcasted_iota(jnp.int32, logits.shape, dimension=1)
    logits = jnp.where(lane < NUM_CLASSES, logits, _NEG)

    # log_softmax over dim=1 (numerically stable, f32 math; bf16 only at the store)
    m = jnp.max(logits, axis=-1, keepdims=True)
    shifted = logits - m
    lse = jnp.log(jnp.sum(jnp.exp(shifted), axis=-1, keepdims=True))
    o_ref[...] = (shifted - lse).astype(o_ref.dtype)


# ----------------------------------------------------------------------------
# Wrapper: flatten input (== x.view(-1, 784)), pick balanced batch tiles, call.
# ----------------------------------------------------------------------------
def _round_up(n, m):
    return (n + m - 1) // m * m


@functools.partial(jax.jit, static_argnames=("tile_b",))
def net_forward(x, packed_params, tile_b=1024):
    """x: (B, 1, 28, 28) NCHW (or anything flattening to (B, 784)), f32."""
    x2 = x.reshape(-1, IN_FEATURES)          # fed as-is; bf16 cast happens in-kernel
    B = x2.shape[0]

    # Balanced tiles: avoid a nearly-empty last tile, and use >= 2 grid steps when
    # the batch allows so v7x's two TensorCores both get work ("parallel" axis).
    want_parallel = max(1, min(2, B // 8))
    n_tiles = max(pl.cdiv(B, tile_b), want_parallel)
    tb = _round_up(pl.cdiv(B, n_tiles), 8)
    grid = pl.cdiv(B, tb)                    # last block may overhang; rows are independent

    w1, b1, w2, b2, w3, b3, w4, b4 = packed_params

    def full(arr):
        # Constant block index across the batch grid -> Pallas fetches it only once.
        return pl.BlockSpec(arr.shape, lambda i: (0, 0))

    flops = 2 * B * (IN_FEATURES * H1 + H1 * H2 + H2 * H3_PAD + H3_PAD * OUT_PAD)
    bytes_accessed = (B * IN_FEATURES * 4                       # f32 input read
                      + B * OUT_PAD * 2                         # bf16 logit slab write
                      + sum(int(a.size) * a.dtype.itemsize for a in packed_params))

    out = pl.pallas_call(
        _mlp_kernel,
        out_shape=jax.ShapeDtypeStruct((B, OUT_PAD), jnp.bfloat16),
        grid_spec=pltpu.PrefetchScalarGridSpec(
            num_scalar_prefetch=0,
            grid=(grid,),
            in_specs=[
                pl.BlockSpec((tb, IN_FEATURES), lambda i: (i, 0)),   # x tile (f32)
                full(w1), full(b1),
                full(w2), full(b2),
                full(w3), full(b3),
                full(w4), full(b4),
            ],
            out_specs=pl.BlockSpec((tb, OUT_PAD), lambda i: (i, 0)),
        ),
        compiler_params=pltpu.CompilerParams(
            dimension_semantics=("parallel",),   # batch tiles shard across TCs (megacore)
        ),
        cost_estimate=pl.CostEstimate(
            flops=flops, transcendentals=B * OUT_PAD, bytes_accessed=bytes_accessed),
    )(x2, w1, b1, w2, b2, w3, b3, w4, b4)

    # Drop the 118 padded logit lanes; restore f32 to match the PyTorch module's output.
    return out[:, :NUM_CLASSES].astype(jnp.float32)


# ----------------------------------------------------------------------------
# Parameter init (PyTorch nn.Linear-style) + one-time packing into padded bf16.
# Weights stored as (in_features, out_features); biases as (1, out_features) f32.
# ----------------------------------------------------------------------------
def init_params(key):
    dims = [(IN_FEATURES, H1), (H1, H2), (H2, H3), (H3, NUM_CLASSES)]
    params = []
    for (fan_in, fan_out) in dims:
        key, kw, kb = jax.random.split(key, 3)
        bound = 1.0 / (fan_in ** 0.5)
        w = jax.random.uniform(kw, (fan_in, fan_out), jnp.float32, -bound, bound)
        b = jax.random.uniform(kb, (1, fan_out), jnp.float32, -bound, bound)
        params += [w, b]
    return tuple(params)


def prepare_params(params):
    """Zero-pad fc3/fc4 to lane-aligned widths and cast weights to bf16 (done once)."""
    w1, b1, w2, b2, w3, b3, w4, b4 = params
    w1p = w1.astype(jnp.bfloat16)                                        # (784, 256)
    w2p = w2.astype(jnp.bfloat16)                                        # (256, 128)
    w3p = jnp.zeros((H2, H3_PAD), jnp.float32).at[:, :H3].set(w3).astype(jnp.bfloat16)
    b3p = jnp.zeros((1, H3_PAD), jnp.float32).at[:, :H3].set(b3)
    w4p = jnp.zeros((H3_PAD, OUT_PAD), jnp.float32).at[:H3, :NUM_CLASSES].set(w4).astype(jnp.bfloat16)
    b4p = jnp.zeros((1, OUT_PAD), jnp.float32).at[:, :NUM_CLASSES].set(b4)
    return (w1p, b1.astype(jnp.float32),
            w2p, b2.astype(jnp.float32),
            w3p, b3p,
            w4p, b4p)


def _reference_forward(x, packed_params):
    """Pure-JAX reference with matching bf16/f32 numerics, for a sanity check."""
    w1, b1, w2, b2, w3, b3, w4, b4 = packed_params
    h = x.reshape(-1, IN_FEATURES).astype(jnp.bfloat16)
    h = jnp.maximum(jnp.dot(h, w1, preferred_element_type=jnp.float32) + b1, 0.0).astype(jnp.bfloat16)
    h = jnp.maximum(jnp.dot(h, w2, preferred_element_type=jnp.float32) + b2, 0.0).astype(jnp.bfloat16)
    h = jnp.maximum(jnp.dot(h, w3, preferred_element_type=jnp.float32) + b3, 0.0).astype(jnp.bfloat16)
    logits = (jnp.dot(h, w4, preferred_element_type=jnp.float32) + b4)[:, :NUM_CLASSES]
    return jax.nn.log_softmax(logits, axis=1)


if __name__ == "__main__":
    key = jax.random.PRNGKey(0)
    kp, kx = jax.random.split(key)

    params = init_params(kp)
    packed = prepare_params(params)

    # MNIST-like NCHW input. B=300 deliberately does NOT divide the tile sizes:
    # exercises balanced multi-step grids and the overhanging last block.
    B = 300
    x = jax.random.normal(kx, (B, 1, 28, 28), jnp.float32)
    ref = _reference_forward(x, packed)

    # Default tiling: B=300 -> 2 balanced tiles of 152 rows (grid=2, last overhangs 4 rows).
    out = jax.block_until_ready(net_forward(x, packed))
    assert out.shape == (B, NUM_CLASSES)
    assert bool(jnp.all(jnp.isfinite(out)))
    assert jnp.allclose(out, ref, atol=5e-2, rtol=5e-2), float(jnp.max(jnp.abs(out - ref)))

    # Smaller explicit tile: 3 tiles of 104 rows (grid=3, overhang 12 rows).
    out2 = jax.block_until_ready(net_forward(x, packed, tile_b=128))
    assert out2.shape == (B, NUM_CLASSES)
    assert jnp.allclose(out2, ref, atol=5e-2, rtol=5e-2), float(jnp.max(jnp.abs(out2 - ref)))

    print("KERNEL_OK")
</pallas_src>

<mosaic_0001>
module attributes {stable_mosaic.version = 11 : i64} {
  func.func @_mlp_kernel(%arg0: i32, %arg1: memref<152x784xf32, #tpu.memory_space<vmem>>, %arg2: memref<784x256xbf16, #tpu.memory_space<vmem>>, %arg3: memref<1x256xf32, #tpu.memory_space<vmem>>, %arg4: memref<256x128xbf16, #tpu.memory_space<vmem>>, %arg5: memref<1x128xf32, #tpu.memory_space<vmem>>, %arg6: memref<128x128xbf16, #tpu.memory_space<vmem>>, %arg7: memref<1x128xf32, #tpu.memory_space<vmem>>, %arg8: memref<128x128xbf16, #tpu.memory_space<vmem>>, %arg9: memref<1x128xf32, #tpu.memory_space<vmem>>, %arg10: memref<152x128xbf16, #tpu.memory_space<vmem>>) attributes {dimension_semantics = [#tpu.dimension_semantics<parallel>], iteration_bounds = array<i64: 2>, scalar_prefetch = 0 : i64, scratch_operands = 0 : i64, tpu.core_type = #tpu.core_type<tc>, window_params = [{transform_indices = @transform_0, window_bounds = array<i64: 152, 784>}, {pipeline_mode = #tpu.pipeline_mode<synchronous>, transform_indices = @transform_1, window_bounds = array<i64: 784, 256>}, {pipeline_mode = #tpu.pipeline_mode<synchronous>, transform_indices = @transform_2, window_bounds = array<i64: 1, 256>}, {pipeline_mode = #tpu.pipeline_mode<synchronous>, transform_indices = @transform_3, window_bounds = array<i64: 256, 128>}, {pipeline_mode = #tpu.pipeline_mode<synchronous>, transform_indices = @transform_4, window_bounds = array<i64: 1, 128>}, {pipeline_mode = #tpu.pipeline_mode<synchronous>, transform_indices = @transform_5, window_bounds = array<i64: 128, 128>}, {pipeline_mode = #tpu.pipeline_mode<synchronous>, transform_indices = @transform_6, window_bounds = array<i64: 1, 128>}, {pipeline_mode = #tpu.pipeline_mode<synchronous>, transform_indices = @transform_7, window_bounds = array<i64: 128, 128>}, {pipeline_mode = #tpu.pipeline_mode<synchronous>, transform_indices = @transform_8, window_bounds = array<i64: 1, 128>}, {transform_indices = @transform_9, window_bounds = array<i64: 152, 128>}]} {
    %c0 = arith.constant 0 : index
    %c0_0 = arith.constant 0 : index
    %0 = vector.load %arg1[%c0, %c0_0] : memref<152x784xf32, #tpu.memory_space<vmem>>, vector<152x784xf32>
    %1 = arith.truncf %0 : vector<152x784xf32> to vector<152x784xbf16>
    %c0_1 = arith.constant 0 : index
    %c0_2 = arith.constant 0 : index
    %2 = vector.load %arg2[%c0_1, %c0_2] : memref<784x256xbf16, #tpu.memory_space<vmem>>, vector<784x256xbf16>
    %cst = arith.constant dense<0.000000e+00> : vector<152x256xf32>
    %3 = tpu.matmul %1, %2, %cst {dimension_numbers = #tpu.dot_dimension_numbers<[1], [0], [0], [1], [0, 0, 1, 1], [], []>} : vector<152x784xbf16>, vector<784x256xbf16>, vector<152x256xf32> -> vector<152x256xf32>
    %c0_3 = arith.constant 0 : index
    %c0_4 = arith.constant 0 : index
    %4 = vector.load %arg3[%c0_3, %c0_4] : memref<1x256xf32, #tpu.memory_space<vmem>>, vector<1x256xf32>
    %5 = vector.broadcast %4 : vector<1x256xf32> to vector<152x256xf32>
    %6 = arith.addf %3, %5 : vector<152x256xf32>
    %cst_5 = arith.constant 0.000000e+00 : f32
    %7 = vector.broadcast %cst_5 : f32 to vector<152x256xf32>
    %8 = arith.maximumf %6, %7 : vector<152x256xf32>
    %9 = arith.truncf %8 : vector<152x256xf32> to vector<152x256xbf16>
    %c0_6 = arith.constant 0 : index
    %c0_7 = arith.constant 0 : index
    %10 = vector.load %arg4[%c0_6, %c0_7] : memref<256x128xbf16, #tpu.memory_space<vmem>>, vector<256x128xbf16>
    %cst_8 = arith.constant dense<0.000000e+00> : vector<152x128xf32>
    %11 = tpu.matmul %9, %10, %cst_8 {dimension_numbers = #tpu.dot_dimension_numbers<[1], [0], [0], [1], [0, 0, 1, 1], [], []>} : vector<152x256xbf16>, vector<256x128xbf16>, vector<152x128xf32> -> vector<152x128xf32>
    %c0_9 = arith.constant 0 : index
    %c0_10 = arith.constant 0 : index
    %12 = vector.load %arg5[%c0_9, %c0_10] : memref<1x128xf32, #tpu.memory_space<vmem>>, vector<1x128xf32>
    %13 = vector.broadcast %12 : vector<1x128xf32> to vector<152x128xf32>
    %14 = arith.addf %11, %13 : vector<152x128xf32>
    %cst_11 = arith.constant 0.000000e+00 : f32
    %15 = vector.broadcast %cst_11 : f32 to vector<152x128xf32>
    %16 = arith.maximumf %14, %15 : vector<152x128xf32>
    %17 = arith.truncf %16 : vector<152x128xf32> to vector<152x128xbf16>
    %c0_12 = arith.constant 0 : index
    %c0_13 = arith.constant 0 : index
    %18 = vector.load %arg6[%c0_12, %c0_13] : memref<128x128xbf16, #tpu.memory_space<vmem>>, vector<128x128xbf16>
    %cst_14 = arith.constant dense<0.000000e+00> : vector<152x128xf32>
    %19 = tpu.matmul %17, %18, %cst_14 {dimension_numbers = #tpu.dot_dimension_numbers<[1], [0], [0], [1], [0, 0, 1, 1], [], []>} : vector<152x128xbf16>, vector<128x128xbf16>, vector<152x128xf32> -> vector<152x128xf32>
    %c0_15 = arith.constant 0 : index
    %c0_16 = arith.constant 0 : index
    %20 = vector.load %arg7[%c0_15, %c0_16] : memref<1x128xf32, #tpu.memory_space<vmem>>, vector<1x128xf32>
    %21 = vector.broadcast %20 : vector<1x128xf32> to vector<152x128xf32>
    %22 = arith.addf %19, %21 : vector<152x128xf32>
    %cst_17 = arith.constant 0.000000e+00 : f32
    %23 = vector.broadcast %cst_17 : f32 to vector<152x128xf32>
    %24 = arith.maximumf %22, %23 : vector<152x128xf32>
    %25 = arith.truncf %24 : vector<152x128xf32> to vector<152x128xbf16>
    %c0_18 = arith.constant 0 : index
    %c0_19 = arith.constant 0 : index
    %26 = vector.load %arg8[%c0_18, %c0_19] : memref<128x128xbf16, #tpu.memory_space<vmem>>, vector<128x128xbf16>
    %cst_20 = arith.constant dense<0.000000e+00> : vector<152x128xf32>
    %27 = tpu.matmul %25, %26, %cst_20 {dimension_numbers = #tpu.dot_dimension_numbers<[1], [0], [0], [1], [0, 0, 1, 1], [], []>} : vector<152x128xbf16>, vector<128x128xbf16>, vector<152x128xf32> -> vector<152x128xf32>
    %c0_21 = arith.constant 0 : index
    %c0_22 = arith.constant 0 : index
    %28 = vector.load %arg9[%c0_21, %c0_22] : memref<1x128xf32, #tpu.memory_space<vmem>>, vector<1x128xf32>
    %29 = vector.broadcast %28 : vector<1x128xf32> to vector<152x128xf32>
    %30 = arith.addf %27, %29 : vector<152x128xf32>
    %31 = tpu.iota {dimensions = array<i32: 1>} : vector<152x128xi32>
    %c10_i32 = arith.constant 10 : i32
    %32 = vector.broadcast %c10_i32 : i32 to vector<152x128xi32>
    %33 = arith.cmpi slt, %31, %32 : vector<152x128xi32>
    %cst_23 = arith.constant -1.000000e+30 : f32
    %34 = vector.broadcast %cst_23 : f32 to vector<152x128xf32>
    %35 = arith.select %33, %30, %34 : vector<152x128xi1>, vector<152x128xf32>
    %cst_24 = arith.constant dense<0xFF800000> : vector<152xf32>
    %36 = vector.multi_reduction <maximumf>, %35, %cst_24 [1] : vector<152x128xf32> to vector<152xf32>
    %37 = vector.shape_cast %36 : vector<152xf32> to vector<152x1xf32>
    %38 = vector.broadcast %37 : vector<152x1xf32> to vector<152x128xf32>
    %39 = arith.subf %35, %38 : vector<152x128xf32>
    %40 = math.exp %39 : vector<152x128xf32>
    %cst_25 = arith.constant dense<0.000000e+00> : vector<152xf32>
    %41 = vector.multi_reduction <add>, %40, %cst_25 [1] : vector<152x128xf32> to vector<152xf32>
    %42 = vector.shape_cast %41 : vector<152xf32> to vector<152x1xf32>
    %43 = math.log %42 : vector<152x1xf32>
    %44 = vector.broadcast %43 : vector<152x1xf32> to vector<152x128xf32>
    %45 = arith.subf %39, %44 : vector<152x128xf32>
    %46 = arith.truncf %45 : vector<152x128xf32> to vector<152x128xbf16>
    %c0_26 = arith.constant 0 : index
    %c0_27 = arith.constant 0 : index
    %47 = vector.load %arg10[%c0_26, %c0_27] : memref<152x128xbf16, #tpu.memory_space<vmem>>, vector<152x128xbf16>
    tpu.vector_store %arg10[%c0_26, %c0_27], %46 {strides = array<i32>} : memref<152x128xbf16, #tpu.memory_space<vmem>>, vector<152x128xbf16>,
    return
  }
  func.func @transform_0(%arg0: i32) -> (i32, i32) {
    %c0_i32 = arith.constant 0 : i32
    %c0_i32_0 = arith.constant 0 : i32
    return %arg0, %c0_i32 : i32, i32
  }
  func.func @transform_1(%arg0: i32) -> (i32, i32) {
    %c0_i32 = arith.constant 0 : i32
    %c0_i32_0 = arith.constant 0 : i32
    %c0_i32_1 = arith.constant 0 : i32
    return %c0_i32, %c0_i32_0 : i32, i32
  }
  func.func @transform_2(%arg0: i32) -> (i32, i32) {
    %c0_i32 = arith.constant 0 : i32
    %c0_i32_0 = arith.constant 0 : i32
    %c0_i32_1 = arith.constant 0 : i32
    return %c0_i32, %c0_i32_0 : i32, i32
  }
  func.func @transform_3(%arg0: i32) -> (i32, i32) {
    %c0_i32 = arith.constant 0 : i32
    %c0_i32_0 = arith.constant 0 : i32
    %c0_i32_1 = arith.constant 0 : i32
    return %c0_i32, %c0_i32_0 : i32, i32
  }
  func.func @transform_4(%arg0: i32) -> (i32, i32) {
    %c0_i32 = arith.constant 0 : i32
    %c0_i32_0 = arith.constant 0 : i32
    %c0_i32_1 = arith.constant 0 : i32
    return %c0_i32, %c0_i32_0 : i32, i32
  }
  func.func @transform_5(%arg0: i32) -> (i32, i32) {
    %c0_i32 = arith.constant 0 : i32
    %c0_i32_0 = arith.constant 0 : i32
    %c0_i32_1 = arith.constant 0 : i32
    return %c0_i32, %c0_i32_0 : i32, i32
  }
  func.func @transform_6(%arg0: i32) -> (i32, i32) {
    %c0_i32 = arith.constant 0 : i32
    %c0_i32_0 = arith.constant 0 : i32
    %c0_i32_1 = arith.constant 0 : i32
    return %c0_i32, %c0_i32_0 : i32, i32
  }
  func.func @transform_7(%arg0: i32) -> (i32, i32) {
    %c0_i32 = arith.constant 0 : i32
    %c0_i32_0 = arith.constant 0 : i32
    %c0_i32_1 = arith.constant 0 : i32
    return %c0_i32, %c0_i32_0 : i32, i32
  }
  func.func @transform_8(%arg0: i32) -> (i32, i32) {
    %c0_i32 = arith.constant 0 : i32
    %c0_i32_0 = arith.constant 0 : i32
    %c0_i32_1 = arith.constant 0 : i32
    return %c0_i32, %c0_i32_0 : i32, i32
  }
  func.func @transform_9(%arg0: i32) -> (i32, i32) {
    %c0_i32 = arith.constant 0 : i32
    %c0_i32_0 = arith.constant 0 : i32
    return %arg0, %c0_i32 : i32, i32
  }
}

</mosaic_0001>

<bundles_post_ra>
// kernel: net_forward.1
= control target key start
LH: loop header
LB: loop body
LE: loop exit
PB: predicated region body
PF: predicated region fallthrough
CT: control target
= control target key end

     0   :  { %s3797_s30 = smov 0   ;;  %s5471_s0 = inlined_call_operand.vmem [shape: f32[300,784], index: 0, kind: input, shape index: {}]   ;;  %s5472_s1 = inlined_call_operand.vmem [shape: bf16[784,256], index: 1, kind: input, shape index: {}]   ;;  %s5473_s2 = inlined_call_operand.vmem [shape: f32[1,256], index: 2, kind: input, shape index: {}]   ;;  %s5474_s3 = inlined_call_operand.vmem [shape: bf16[256,128], index: 3, kind: input, shape index: {}]   ;;  %s5475_s4 = inlined_call_operand.vmem [shape: f32[1,128], index: 4, kind: input, shape index: {}]   ;;  %s5476_s5 = inlined_call_operand.vmem [shape: bf16[128,128], index: 5, kind: input, shape index: {}]   ;;  %s5477_s6 = inlined_call_operand.vmem [shape: f32[1,128], index: 6, kind: input, shape index: {}]   ;;  %s5478_s7 = inlined_call_operand.vmem [shape: bf16[128,128], index: 7, kind: input, shape index: {}]   ;;  %s5479_s8 = inlined_call_operand.vmem [shape: f32[1,128], index: 8, kind: input, shape index: {}]   ;;  %s5480_s9 = inlined_call_operand.vmem [shape: bf16[300,128], index: 9, kind: output, shape index: {}]  }
   0x1 LB: > { %s2902_s10 = sadd.s32 4294967295, %s3745_s30   ;;  %p2906_p0 = scmp.ge.s32.totalorder %s3745_s30, 1  ;;  %s3745_s30 = sphi %s3797_s30, %s19_s30  }
   0x2   : > { %p289_p1 = scmp.lt.s32.totalorder %s3745_s30, 3 }
   0x4   : > { %p290_p2 = pnand %p2906_p0, %p289_p1 }
   0x6   : > { %293 = sbr.rel (%p290_p2) target bundleno = 1423 (0x58f), region = 56 }
   0xb   : > { %v2967_v0 = vld [vmem:[%s5472_s1 + $0x70] sm:$0xf]  ;;  %v3466_v1 = vld [vmem:[%s5472_s1 + $0x74] sm:$0xf0]  ;;  %v2959_v5 = vld [vmem:[%s5472_s1 + $0x60] sm:$0xf] }
   0xc   : > { %v3031_v2 = vld [vmem:[%s5472_s1 + $0xf0] sm:$0xf]  ;;  %v2968_v3 = vor.u32 %v3466_v1, %v2967_v0  ;;  %v3482_v4 = vld [vmem:[%s5472_s1 + $0xf4] sm:$0xf0]  ;;  %v3464_v6 = vld [vmem:[%s5472_s1 + $0x64] sm:$0xf0] }
   0xd   : > { %v3032_v7 = vor.u32 %v3482_v4, %v3031_v2  ;;  %v3023_v8 = vld [vmem:[%s5472_s1 + $0xe0] sm:$0xf]  ;;  %v3480_v9 = vld [vmem:[%s5472_s1 + $0xe4] sm:$0xf0]  ;;  %v2960_v10 = vor.u32 %v3464_v6, %v2959_v5  ;;  %v2951_v12 = vld [vmem:[%s5472_s1 + $0x50] sm:$0xf] }
   0xe   : > { %3634 = vmatpush.bf16.msra.mxu2 %v2968_v3  ;;  %1168 = vmatpush.bf16.msra.mxu0 %v2968_v3  ;;  %v3024_v11 = vor.u32 %v3480_v9, %v3023_v8  ;;  %v3462_v13 = vld [vmem:[%s5472_s1 + $0x54] sm:$0xf0]  ;;  %v3015_v14 = vld [vmem:[%s5472_s1 + $0xd0] sm:$0xf]  ;;  %v2943_v18 = vld [vmem:[%s5472_s1 + $0x40] sm:$0xf] }
   0xf   : > { %3642 = vmatpush.bf16.msra.mxu3 %v3032_v7  ;;  %1226 = vmatpush.bf16.msra.mxu1 %v3032_v7  ;;  %v3478_v15 = vld [vmem:[%s5472_s1 + $0xd4] sm:$0xf0]  ;;  %v2952_v16 = vor.u32 %v3462_v13, %v2951_v12  ;;  %v3460_v19 = vld [vmem:[%s5472_s1 + $0x44] sm:$0xf0]  ;;  %v3007_v20 = vld [vmem:[%s5472_s1 + $0xc0] sm:$0xf] }
  0x10   : > { %v3016_v17 = vor.u32 %v3478_v15, %v3015_v14  ;;  %v3476_v21 = vld [vmem:[%s5472_s1 + $0xc4] sm:$0xf0]  ;;  %s326_s24 = smul.u32 19, %s2902_s10  ;;  %v2944_v22 = vor.u32 %v3460_v19, %v2943_v18  ;;  %v2935_v24 = vld [vmem:[%s5472_s1 + $0x30] sm:$0xf]  ;;  %vm1137_vm0 = vcmask 130048  }
  0x11   : > { %v3008_v23 = vor.u32 %v3476_v21, %v3007_v20  ;;  %v3458_v25 = vld [vmem:[%s5472_s1 + $0x34] sm:$0xf0]  ;;  %v2999_v26 = vld [vmem:[%s5472_s1 + $0xb0] sm:$0xf]  ;;  %v2927_v30 = vld [vmem:[%s5472_s1 + $0x20] sm:$0xf] }
  0x12   : > { %3635 = vmatpush.bf16.msra.mxu2 %v2960_v10  ;;  %1169 = vmatpush.bf16.msra.mxu0 %v2960_v10  ;;  %p327_p3 = scmp.lt.s32.totalorder %s326_s24, 37  ;;  %v3474_v27 = vld [vmem:[%s5472_s1 + $0xb4] sm:$0xf0]  ;;  %v2936_v28 = vor.u32 %v3458_v25, %v2935_v24  ;;  %v3456_v31 = vld [vmem:[%s5472_s1 + $0x24] sm:$0xf0] }
  0x13   : > { %3643 = vmatpush.bf16.msra.mxu3 %v3024_v11  ;;  %1227 = vmatpush.bf16.msra.mxu1 %v3024_v11  ;;  %v3000_v29 = vor.u32 %v3474_v27, %v2999_v26  ;;  %v2991_v32 = vld [vmem:[%s5472_s1 + $0xa0] sm:$0xf]  ;;  %v3472_v33 = vld [vmem:[%s5472_s1 + $0xa4] sm:$0xf0]  ;;  %v2928_v34 = vor.u32 %v3456_v31, %v2927_v30  ;;  %v2919_v36 = vld [vmem:[%s5472_s1 + $0x10] sm:$0xf] }
  0x14   : > { %s5583_s24 = smov (!%p327_p3, %s326_s24), 37  ;;  %v2992_v35 = vor.u32 %v3472_v33, %v2991_v32  ;;  %v3454_v37 = vld [vmem:[%s5472_s1 + $0x14] sm:$0xf0]  ;;  %v2983_v38 = vld [vmem:[%s5472_s1 + $0x90] sm:$0xf] }
  0x15   : > { %s3650_s21 = smul.u32 56, %s5583_s24  ;;  %v3470_v39 = vld [vmem:[%s5472_s1 + $0x94] sm:$0xf0]  ;;  %v2920_v40 = vor.u32 %v3454_v37, %v2919_v36  ;;  %v2911_v41 = vld [vmem:[%s5472_s1] sm:$0xf]  ;;  %s2908_s25 = sshll.u32 %s5583_s24, 2 }
  0x16   : > { %3636 = vmatpush.bf16.msra.mxu2 %v2952_v16  ;;  %1170 = vmatpush.bf16.msra.mxu0 %v2952_v16  ;;  %v2984_v42 = vor.u32 %v3470_v39, %v2983_v38  ;;  %v3452_v43 = vld [vmem:[%s5472_s1 + $0x4] sm:$0xf0]  ;;  %v2975_v44 = vld [vmem:[%s5472_s1 + $0x80] sm:$0xf]  ;;  %v3095_v46 = vld [vmem:[%s5472_s1 + $0x170] sm:$0xf]  ;;  %s5439_s28 = scalar_lea.vmem %s5480_s9, %s2908_s25 }
  0x17   : > { %3644 = vmatpush.bf16.msra.mxu3 %v3016_v17  ;;  %1228 = vmatpush.bf16.msra.mxu1 %v3016_v17  ;;  %s3900_s15 = scalar_lea.vmem %s5471_s0, %s3650_s21  ;;  %v3468_v45 = vld [vmem:[%s5472_s1 + $0x84] sm:$0xf0]  ;;  %v3498_v47 = vld [vmem:[%s5472_s1 + $0x174] sm:$0xf0]  ;;  %v3159_v48 = vld [vmem:[%s5472_s1 + $0x1f0] sm:$0xf]  ;;  %v2912_v52 = vor.u32 %v3452_v43, %v2911_v41 }
  0x18   : > { %v410_v49 = vld [vmem:[%s3900_s15 + $0x230] sm:$0xff]  ;;  %v417_v50 = vld [vmem:[%s3900_s15 + $0x268] sm:$0xff]  ;;  %v3514_v51 = vld [vmem:[%s5472_s1 + $0x1f4] sm:$0xf0]  ;;  %v2976_v58 = vor.u32 %v3468_v45, %v2975_v44  ;;  %v3096_v60 = vor.u32 %v3498_v47, %v3095_v46 }
  0x19   : > { %v411_v53 = vld [vmem:[%s3900_s15 + $0x238] sm:$0xff]  ;;  %v340_v54 = vld [vmem:[%s3900_s15] sm:$0xff]  ;;  %v3496_v57 = vld [vmem:[%s5472_s1 + $0x164] sm:$0xf0]  ;;  %v3160_v63 = vor.u32 %v3514_v51, %v3159_v48  ;;  %v3946_v3 = vpack.c.bf16 %v417_v50, %v410_v49 }
  0x1a   : > { %3637 = vmatpush.bf16.msra.mxu2 %v2944_v22  ;;  %1171 = vmatpush.bf16.msra.mxu0 %v2944_v22  ;;  %v347_v55 = vld [vmem:[%s3900_s15 + $0x38] sm:$0xff]  ;;  %v3087_v56 = vld [vmem:[%s5472_s1 + $0x160] sm:$0xf]  ;;  %v418_v59 = vld [vmem:[%s3900_s15 + $0x270] sm:$0xff] }
  0x1b   : > { %3645 = vmatpush.bf16.msra.mxu3 %v3008_v23  ;;  %1229 = vmatpush.bf16.msra.mxu1 %v3008_v23  ;;  %v3223_v61 = vld [vmem:[%s5472_s1 + $0x270] sm:$0xf]  ;;  %v3530_v62 = vld [vmem:[%s5472_s1 + $0x274] sm:$0xf0]  ;;  %v341_v0 = vld [vmem:[%s3900_s15 + $0x8] sm:$0xff]  ;;  %v3948_v4 = vpack.c.bf16 %v347_v55, %v340_v54  ;;  %v3959_v8 = vpack.c.bf16 %v418_v59, %v411_v53  ;;  %v3088_v11 = vor.u32 %v3496_v57, %v3087_v56 }
  0x1c   : > { %v348_v1 = vld [vmem:[%s3900_s15 + $0x40] sm:$0xff]  ;;  %v3512_v5 = vld [vmem:[%s5472_s1 + $0x1e4] sm:$0xf0]  ;;  %v3287_v6 = vld [vmem:[%s5472_s1 + $0x2f0] sm:$0xf]  ;;  %v3224_v9 = vor.u32 %v3530_v62, %v3223_v61 }
  0x1d   : > { %v3151_v2 = vld [vmem:[%s5472_s1 + $0x1e0] sm:$0xf]  ;;  %v3546_v7 = vld [vmem:[%s5472_s1 + $0x2f4] sm:$0xf0]  ;;  %v3961_v10 = vpack.c.bf16 %v348_v1, %v341_v0  ;;  %v3528_v13 = vld [vmem:[%s5472_s1 + $0x264] sm:$0xf0] }
  0x1e   : > { %3638 = vmatpush.bf16.msra.mxu2 %v2936_v28  ;;  %1172 = vmatpush.bf16.msra.mxu0 %v2936_v28  ;;  %v3215_v12 = vld [vmem:[%s5472_s1 + $0x260] sm:$0xf]  ;;  %v3152_v14 = vor.u32 %v3512_v5, %v3151_v2  ;;  %v3079_v15 = vld [vmem:[%s5472_s1 + $0x150] sm:$0xf]  ;;  %v3494_v16 = vld [vmem:[%s5472_s1 + $0x154] sm:$0xf0]  ;;  %v3288_v17 = vor.u32 %v3546_v7, %v3287_v6 }
  0x1f   : > { %3646 = vmatpush.bf16.msra.mxu3 %v3000_v29  ;;  %1230 = vmatpush.bf16.msra.mxu1 %v3000_v29  ;;  %v3143_v18 = vld [vmem:[%s5472_s1 + $0x1d0] sm:$0xf]  ;;  %v3510_v19 = vld [vmem:[%s5472_s1 + $0x1d4] sm:$0xf0]  ;;  %v3216_v20 = vor.u32 %v3528_v13, %v3215_v12  ;;  %v3279_v21 = vld [vmem:[%s5472_s1 + $0x2e0] sm:$0xf]  ;;  %v3080_v22 = vor.u32 %v3494_v16, %v3079_v15 }
  0x20   : > { %v3544_v23 = vld [vmem:[%s5472_s1 + $0x2e4] sm:$0xf0]  ;;  %v3144_v24 = vor.u32 %v3510_v19, %v3143_v18  ;;  %v3071_v25 = vld [vmem:[%s5472_s1 + $0x140] sm:$0xf]  ;;  %v3207_v28 = vld [vmem:[%s5472_s1 + $0x250] sm:$0xf] }
  0x21   : > { %v3492_v26 = vld [vmem:[%s5472_s1 + $0x144] sm:$0xf0]  ;;  %v3280_v27 = vor.u32 %v3544_v23, %v3279_v21  ;;  %v3135_v29 = vld [vmem:[%s5472_s1 + $0x1c0] sm:$0xf]  ;;  %v3526_v31 = vld [vmem:[%s5472_s1 + $0x254] sm:$0xf0] }
  0x22   : > { %3639 = vmatpush.bf16.msra.mxu2 %v2928_v34  ;;  %1173 = vmatpush.bf16.msra.mxu0 %v2928_v34  ;;  %v3508_v30 = vld [vmem:[%s5472_s1 + $0x1c4] sm:$0xf0]  ;;  %v3208_v32 = vor.u32 %v3526_v31, %v3207_v28  ;;  %v3271_v33 = vld [vmem:[%s5472_s1 + $0x2d0] sm:$0xf]  ;;  %v3072_v34 = vor.u32 %v3492_v26, %v3071_v25  ;;  %v3490_v38 = vld [vmem:[%s5472_s1 + $0x134] sm:$0xf0] }
  0x23   : > { %3647 = vmatpush.bf16.msra.mxu3 %v2992_v35  ;;  %1231 = vmatpush.bf16.msra.mxu1 %v2992_v35  ;;  %v3542_v35 = vld [vmem:[%s5472_s1 + $0x2d4] sm:$0xf0]  ;;  %v3136_v36 = vor.u32 %v3508_v30, %v3135_v29  ;;  %v3063_v37 = vld [vmem:[%s5472_s1 + $0x130] sm:$0xf]  ;;  %v361_v45 = vld [vmem:[%s3900_s15 + $0xa8] sm:$0xff] }
  0x24   : > { %v3272_v39 = vor.u32 %v3542_v35, %v3271_v33  ;;  %v3127_v41 = vld [vmem:[%s5472_s1 + $0x1b0] sm:$0xf]  ;;  %v431_v43 = vld [vmem:[%s3900_s15 + $0x2d8] sm:$0xff]  ;;  %v425_v46 = vld [vmem:[%s3900_s15 + $0x2a8] sm:$0xff]  ;;  %v3064_v48 = vor.u32 %v3490_v38, %v3063_v37 }
  0x25   : > { %v354_v44 = vld [vmem:[%s3900_s15 + $0x70] sm:$0xff]  ;;  %v432_v47 = vld [vmem:[%s3900_s15 + $0x2e0] sm:$0xff]  ;;  %v355_v49 = vld [vmem:[%s3900_s15 + $0x78] sm:$0xff] }
  0x26   : > { %3640 = vmatpush.bf16.msra.mxu2 %v2920_v40  ;;  %1174 = vmatpush.bf16.msra.mxu0 %v2920_v40  ;;  %v424_v40 = vld [vmem:[%s3900_s15 + $0x2a0] sm:$0xff]  ;;  %v362_v50 = vld [vmem:[%s3900_s15 + $0xb0] sm:$0xff]  ;;  %v4037_v53 = vpack.c.bf16 %v361_v45, %v354_v44  ;;  %v4039_v54 = vpack.c.bf16 %v432_v47, %v425_v46  ;;  %v3488_v57 = vld [vmem:[%s5472_s1 + $0x124] sm:$0xf0] }
  0x27   : > { %3648 = vmatpush.bf16.msra.mxu3 %v2984_v42  ;;  %1232 = vmatpush.bf16.msra.mxu1 %v2984_v42  ;;  %v3506_v42 = vld [vmem:[%s5472_s1 + $0x1b4] sm:$0xf0]  ;;  %v4041_v55 = vpack.c.bf16 %v362_v50, %v355_v49  ;;  %v3055_v56 = vld [vmem:[%s5472_s1 + $0x120] sm:$0xf]  ;;  %v3504_v62 = vld [vmem:[%s5472_s1 + $0x1a4] sm:$0xf0] }
  0x28   : > { %v3128_v51 = vor.u32 %v3506_v42, %v3127_v41  ;;  %v3056_v59 = vor.u32 %v3488_v57, %v3055_v56  ;;  %v3119_v61 = vld [vmem:[%s5472_s1 + $0x1a0] sm:$0xf]  ;;  %v3540_v2 = vld [vmem:[%s5472_s1 + $0x2c4] sm:$0xf0]  ;;  %v3047_v6 = vld [vmem:[%s5472_s1 + $0x110] sm:$0xf] }
  0x29   : > { %v3120_v0 = vor.u32 %v3504_v62, %v3119_v61  ;;  %v3263_v1 = vld [vmem:[%s5472_s1 + $0x2c0] sm:$0xf]  ;;  %v3486_v7 = vld [vmem:[%s5472_s1 + $0x114] sm:$0xf0]  ;;  %v3111_v13 = vld [vmem:[%s5472_s1 + $0x190] sm:$0xf] }
  0x2a   : > { %3641 = vmatpush.bf16.msra.mxu2 %v2912_v52  ;;  %1175 = vmatpush.bf16.msra.mxu0 %v2912_v52  ;;  %v4035_v52 = vpack.c.bf16 %v431_v43, %v424_v40  ;;  %v3264_v5 = vor.u32 %v3540_v2, %v3263_v1  ;;  %v3522_v12 = vld [vmem:[%s5472_s1 + $0x234] sm:$0xf0]  ;;  %v438_v19 = vld [vmem:[%s3900_s15 + $0x310] sm:$0xff]  ;;  %v445_v21 = vld [vmem:[%s3900_s15 + $0x348] sm:$0xff] }
  0x2b   : > { %3649 = vmatpush.bf16.msra.mxu3 %v2976_v58  ;;  %1233 = vmatpush.bf16.msra.mxu1 %v2976_v58  ;;  %v3199_v58 = vld [vmem:[%s5472_s1 + $0x240] sm:$0xf]  ;;  %v3538_v18 = vld [vmem:[%s5472_s1 + $0x2b4] sm:$0xf0]  ;;  %v446_v25 = vld [vmem:[%s3900_s15 + $0x350] sm:$0xff]  ;;  %v4103_v28 = vpack.c.bf16 %v445_v21, %v438_v19 }
  0x2c   : > { %v375_v23 = vld [vmem:[%s3900_s15 + $0x118] sm:$0xff]  ;;  %v369_v26 = vld [vmem:[%s3900_s15 + $0xe8] sm:$0xff]  ;;  %v3103_v38 = vld [vmem:[%s5472_s1 + $0x180] sm:$0xf] }
  0x2d   : > { %1201 = vmatmul.bf16.vlgmr.msra.gmra.mxu2 %v3946_v3  ;;  %1176 = vmatmul.bf16.vlgmr.msra.gmra.mxu0 %v3948_v4  ;;  %v3484_v33 = vld [vmem:[%s5472_s1 + $0x104] sm:$0xf0]  ;;  %v3247_v40 = vld [vmem:[%s5472_s1 + $0x2a0] sm:$0xf]  ;;  %v459_v45 = vld [vmem:[%s3900_s15 + $0x3b8] sm:$0xff] }
  0x2e   : > { %1284 = vmatpush.bf16.msrb.mxu2 %v3096_v60  ;;  %1259 = vmatmul.bf16.vlgmr.msra.gmra.mxu3 %v3959_v8  ;;  %v3524_v60 = vld [vmem:[%s5472_s1 + $0x244] sm:$0xf0]  ;;  %v452_v44 = vld [vmem:[%s3900_s15 + $0x380] sm:$0xff]  ;;  %v382_v46 = vld [vmem:[%s3900_s15 + $0x150] sm:$0xff] }
  0x2f   : > { %1342 = vmatpush.bf16.msrb.mxu3 %v3160_v63  ;;  %1400 = vmatpush.bf16.msrb.mxu0 %v3224_v9  ;;  %v3200_v63 = vor.u32 %v3524_v60, %v3199_v58  ;;  %v3191_v9 = vld [vmem:[%s5472_s1 + $0x230] sm:$0xf]  ;;  %v3536_v42 = vld [vmem:[%s5472_s1 + $0x2a4] sm:$0xf0]  ;;  %v460_v49 = vld [vmem:[%s3900_s15 + $0x3c0] sm:$0xff]  ;;  %v4147_v56 = vpack.c.bf16 %v459_v45, %v452_v44 }
  0x30   : > { %1234 = vmatmul.bf16.vlgmr.msra.gmra.mxu1 %v3961_v10  ;;  %v3192_v15 = vor.u32 %v3522_v12, %v3191_v9  ;;  %v3248_v43 = vor.u32 %v3536_v42, %v3247_v40  ;;  %v389_v47 = vld [vmem:[%s3900_s15 + $0x188] sm:$0xff]  ;;  %v383_v50 = vld [vmem:[%s3900_s15 + $0x158] sm:$0xff]  ;;  %v3175_v60 = vld [vmem:[%s5472_s1 + $0x210] sm:$0xf] }
  0x31   : > { %1458 = vmatpush.bf16.msrb.mxu1 %v3288_v17  ;;  %v3255_v17 = vld [vmem:[%s5472_s1 + $0x2b0] sm:$0xf]  ;;  %5514 = vst [vmem:[#allocation2_spill] sm:$0xff] %v4147_v56  ;;  %v4149_v57 = vpack.c.bf16 %v389_v47, %v382_v46  ;;  %v3518_v61 = vld [vmem:[%s5472_s1 + $0x214] sm:$0xf0]  ;;  %v396_v19 = vld [vmem:[%s3900_s15 + $0x1c0] sm:$0xff] }
  0x32   : > { %1285 = vmatpush.bf16.msrb.mxu2 %v3088_v11  ;;  %v3048_v11 = vor.u32 %v3486_v7, %v3047_v6  ;;  %v3176_v62 = vor.u32 %v3518_v61, %v3175_v60  ;;  %v3239_v1 = vld [vmem:[%s5472_s1 + $0x290] sm:$0xf]  ;;  %v3465_v6 = vld [vmem:[%s5472_s1 + $0x74] sm:$0xf]  ;;  %v2969_v7 = vld [vmem:[%s5472_s1 + $0x78] sm:$0xf0] }
  0x33   : > { %1343 = vmatpush.bf16.msrb.mxu3 %v3152_v14  ;;  %1401 = vmatpush.bf16.msrb.mxu0 %v3216_v20  ;;  %v3502_v14 = vld [vmem:[%s5472_s1 + $0x194] sm:$0xf0]  ;;  %v3256_v20 = vor.u32 %v3538_v18, %v3255_v17  ;;  %v3167_v12 = vld [vmem:[%s5472_s1 + $0x200] sm:$0xf]  ;;  %v466_v18 = vld [vmem:[%s3900_s15 + $0x3f0] sm:$0xff] }
  0x34   : > { %v3112_v16 = vor.u32 %v3502_v14, %v3111_v13  ;;  %v3516_v13 = vld [vmem:[%s5472_s1 + $0x204] sm:$0xf0]  ;;  %v3231_v14 = vld [vmem:[%s5472_s1 + $0x280] sm:$0xf]  ;;  %v467_v21 = vld [vmem:[%s3900_s15 + $0x3f8] sm:$0xff] }
  0x35   : > { %1459 = vmatpush.bf16.msrb.mxu1 %v3280_v27  ;;  %v376_v27 = vld [vmem:[%s3900_s15 + $0x120] sm:$0xff]  ;;  %v349_v42 = vld [vmem:[%s3900_s15 + $0x48] sm:$0xff]  ;;  %v351_v44 = vld [vmem:[%s3900_s15 + $0x58] sm:$0xff] }
  0x36   : > { %1286 = vmatpush.bf16.msrb.mxu2 %v3080_v22  ;;  %v368_v22 = vld [vmem:[%s3900_s15 + $0xe0] sm:$0xff]  ;;  %v4109_v31 = vpack.c.bf16 %v376_v27, %v369_v26  ;;  %v4205_v26 = vpack.c.bf16 %v467_v21, %v467_v21  ;;  %v343_v45 = vld [vmem:[%s3900_s15 + $0x18] sm:$0xff]  ;;  %v350_v46 = vld [vmem:[%s3900_s15 + $0x50] sm:$0xff] }
  0x37   : > { %1344 = vmatpush.bf16.msrb.mxu3 %v3144_v24  ;;  %1402 = vmatpush.bf16.msrb.mxu0 %v3208_v32  ;;  %v439_v24 = vld [vmem:[%s3900_s15 + $0x318] sm:$0xff]  ;;  %v4105_v29 = vpack.c.bf16 %v375_v23, %v368_v22  ;;  %v3039_v32 = vld [vmem:[%s5472_s1 + $0x100] sm:$0xf]  ;;  %v397_v22 = vld [vmem:[%s3900_s15 + $0x1c8] sm:$0xff] }
  0x38   : > { %v4107_v30 = vpack.c.bf16 %v446_v25, %v439_v24  ;;  %v3040_v35 = vor.u32 %v3484_v33, %v3039_v32  ;;  %v404_v23 = vld [vmem:[%s3900_s15 + $0x200] sm:$0xff]  ;;  %v4201_v24 = vpack.c.bf16 %v466_v18, %v466_v18  ;;  %5517 = vst [vmem:[#allocation5_spill] sm:$0xff] %v4205_v26  ;;  %v3481_v32 = vld [vmem:[%s5472_s1 + $0xf4] sm:$0xf]  ;;  %v3033_v33 = vld [vmem:[%s5472_s1 + $0xf8] sm:$0xf0] }
  0x39   : > { %1460 = vmatpush.bf16.msrb.mxu1 %v3272_v39  ;;  %v3500_v39 = vld [vmem:[%s5472_s1 + $0x184] sm:$0xf0]  ;;  %v4207_v27 = vpack.c.bf16 %v404_v23, %v397_v22  ;;  %v3479_v61 = vld [vmem:[%s5472_s1 + $0xe4] sm:$0xf]  ;;  %v370_v22 = vld [vmem:[%s3900_s15 + $0xf0] sm:$0xff] }
  0x3a   : > { %1287 = vmatpush.bf16.msrb.mxu2 %v3072_v34  ;;  %v3183_v34 = vld [vmem:[%s5472_s1 + $0x220] sm:$0xf]  ;;  %v3104_v41 = vor.u32 %v3500_v39, %v3103_v38  ;;  %5516 = vst [vmem:[#allocation4_spill] sm:$0xff] %v4201_v24  ;;  %v3097_v38 = vld [vmem:[%s5472_s1 + $0x178] sm:$0xf0]  ;;  %v345_v47 = vld [vmem:[%s3900_s15 + $0x28] sm:$0xff] }
  0x3b   : > { %1345 = vmatpush.bf16.msrb.mxu3 %v3136_v36  ;;  %1403 = vmatpush.bf16.msrb.mxu0 %v3200_v63  ;;  %v3520_v36 = vld [vmem:[%s5472_s1 + $0x224] sm:$0xf0]  ;;  %v3295_v63 = vld [vmem:[%s5472_s1 + $0x300] sm:$0xf] }
  0x3c   : > { %v3184_v37 = vor.u32 %v3520_v36, %v3183_v34  ;;  %v3463_v34 = vld [vmem:[%s5472_s1 + $0x64] sm:$0xf]  ;;  %v2961_v36 = vld [vmem:[%s5472_s1 + $0x68] sm:$0xf0] }
  0x3d   : > { %1206 = vmatmul.bf16.gmra.mxu2 %v4035_v52  ;;  %1181 = vmatmul.bf16.gmra.mxu0 %v4037_v53  ;;  %v2964_v39 = vor.u32 %v3463_v34, %v2961_v36  ;;  %v377_v23 = vld [vmem:[%s3900_s15 + $0x128] sm:$0xff]  ;;  %v371_v34 = vld [vmem:[%s3900_s15 + $0xf8] sm:$0xff] }
  0x3e   : > { %1288 = vmatpush.bf16.msrb.mxu2 %v3064_v48  ;;  %1264 = vmatmul.bf16.gmra.mxu3 %v4039_v54  ;;  %v453_v48 = vld [vmem:[%s3900_s15 + $0x388] sm:$0xff] }
  0x3f   : > { %1346 = vmatpush.bf16.msrb.mxu3 %v3128_v51  ;;  %1461 = vmatpush.bf16.msrb.mxu1 %v3264_v5  ;;  %v390_v51 = vld [vmem:[%s3900_s15 + $0x190] sm:$0xff]  ;;  %v4151_v58 = vpack.c.bf16 %v460_v49, %v453_v48  ;;  %v3534_v5 = vld [vmem:[%s5472_s1 + $0x294] sm:$0xf0]  ;;  %v352_v48 = vld [vmem:[%s3900_s15 + $0x60] sm:$0xff] }
  0x40   : > { %1239 = vmatmul.bf16.gmra.mxu1 %v4041_v55  ;;  %1404 = vmatpush.bf16.msrb.mxu0 %v3192_v15  ;;  %v3240_v9 = vor.u32 %v3534_v5, %v3239_v1  ;;  %v3168_v15 = vor.u32 %v3516_v13, %v3167_v12  ;;  %v4245_v60 = vpack.c.bf16 %v352_v48, %v345_v47  ;;  %v2953_v1 = vld [vmem:[%s5472_s1 + $0x58] sm:$0xf0]  ;;  %v358_v12 = vld [vmem:[%s3900_s15 + $0x90] sm:$0xff]  ;;  %v365_v13 = vld [vmem:[%s3900_s15 + $0xc8] sm:$0xff] }
  0x41   : > { %5515 = vst [vmem:[#allocation3_spill] sm:$0xff] %v4151_v58  ;;  %v373_v36 = vld [vmem:[%s3900_s15 + $0x108] sm:$0xff]  ;;  %v3493_v47 = vld [vmem:[%s5472_s1 + $0x154] sm:$0xf]  ;;  %v3081_v48 = vld [vmem:[%s5472_s1 + $0x158] sm:$0xf0] }
  0x42   : > { %1289 = vmatpush.bf16.msrb.mxu2 %v3056_v59  ;;  %v4153_v59 = vpack.c.bf16 %v390_v51, %v383_v50  ;;  %v4243_v51 = vpack.c.bf16 %v350_v46, %v343_v45  ;;  %5520 = vst [vmem:[#allocation8_spill] sm:$0xff] %v4245_v60  ;;  %v2945_v46 = vld [vmem:[%s5472_s1 + $0x48] sm:$0xf0] }
  0x43   : > { %1347 = vmatpush.bf16.msrb.mxu3 %v3120_v0  ;;  %1462 = vmatpush.bf16.msrb.mxu1 %v3256_v20  ;;  %v3548_v0 = vld [vmem:[%s5472_s1 + $0x304] sm:$0xf0]  ;;  %v403_v20 = vld [vmem:[%s3900_s15 + $0x1f8] sm:$0xff] }
  0x44   : > { %1405 = vmatpush.bf16.msrb.mxu0 %v3184_v37  ;;  %v3296_v2 = vor.u32 %v3548_v0, %v3295_v63  ;;  %v4203_v25 = vpack.c.bf16 %v403_v20, %v396_v19  ;;  %v3497_v37 = vld [vmem:[%s5472_s1 + $0x174] sm:$0xf]  ;;  %5519 = vst [vmem:[#allocation7_spill] sm:$0xff] %v4243_v51  ;;  %v4279_v19 = vpack.c.bf16 %v365_v13, %v358_v12 }
  0x45   : > { %v3100_v40 = vor.u32 %v3497_v37, %v3097_v38  ;;  %v3461_v0 = vld [vmem:[%s5472_s1 + $0x54] sm:$0xf]  ;;  %v380_v37 = vld [vmem:[%s3900_s15 + $0x140] sm:$0xff]  ;;  %v4297_v38 = vpack.c.bf16 %v377_v23, %v370_v22 }
  0x46   : > { %1290 = vmatpush.bf16.msrb.mxu2 %v3048_v11  ;;  %v2972_v11 = vor.u32 %v3465_v6, %v2969_v7  ;;  %v2956_v5 = vor.u32 %v3461_v0, %v2953_v1  ;;  %v3089_v6 = vld [vmem:[%s5472_s1 + $0x168] sm:$0xf0]  ;;  %5521 = vst [vmem:[#allocation9_spill] sm:$0xff] %v4279_v19  ;;  %v391_v0 = vld [vmem:[%s3900_s15 + $0x198] sm:$0xff]  ;;  %v641_v1 = vld [vmem:[%s5473_s2] sm:$0x3] }
  0x47   : > { %1348 = vmatpush.bf16.msrb.mxu3 %v3112_v16  ;;  %1463 = vmatpush.bf16.msrb.mxu1 %v3248_v43  ;;  %v3532_v16 = vld [vmem:[%s5472_s1 + $0x284] sm:$0xf0]  ;;  %v344_v43 = vld [vmem:[%s3900_s15 + $0x20] sm:$0xff]  ;;  %v4340_v13 = vperm.slane %v641_v1, 0 }
  0x48   : > { %1406 = vmatpush.bf16.msrb.mxu0 %v3176_v62  ;;  %v3232_v17 = vor.u32 %v3532_v16, %v3231_v14  ;;  %v4241_v50 = vpack.c.bf16 %v351_v44, %v344_v43  ;;  %v3025_v62 = vld [vmem:[%s5472_s1 + $0xe8] sm:$0xf0]  ;;  %v359_v16 = vld [vmem:[%s3900_s15 + $0x98] sm:$0xff]  ;;  %v3459_v44 = vld [vmem:[%s5472_s1 + $0x44] sm:$0xf] }
  0x49   : > { %v3028_v63 = vor.u32 %v3479_v61, %v3025_v62  ;;  %v357_v14 = vld [vmem:[%s3900_s15 + $0x88] sm:$0xff]  ;;  %v3017_v43 = vld [vmem:[%s5472_s1 + $0xd8] sm:$0xf0]  ;;  %v2948_v61 = vor.u32 %v3459_v44, %v2945_v46  ;;  %v3084_v62 = vor.u32 %v3493_v47, %v3081_v48 }
  0x4a   : > { %1291 = vmatpush.bf16.msrb.mxu2 %v3040_v35  ;;  %v3036_v35 = vor.u32 %v3481_v32, %v3033_v33  ;;  %5518 = vst [vmem:[#allocation6_spill] sm:$0xff] %v4241_v50  ;;  %v372_v32 = vld [vmem:[%s3900_s15 + $0x100] sm:$0xff]  ;;  %v379_v33 = vld [vmem:[%s3900_s15 + $0x138] sm:$0xff] }
  0x4b   : > { %1349 = vmatpush.bf16.msrb.mxu3 %v3104_v41  ;;  %1464 = vmatpush.bf16.msrb.mxu1 %v3240_v9  ;;  %v342_v41 = vld [vmem:[%s3900_s15 + $0x10] sm:$0xff]  ;;  %v356_v9 = vld [vmem:[%s3900_s15 + $0x80] sm:$0xff] }
  0x4c   : > { %1407 = vmatpush.bf16.msrb.mxu0 %v3168_v15  ;;  %v4239_v49 = vpack.c.bf16 %v349_v42, %v342_v41  ;;  %v364_v15 = vld [vmem:[%s3900_s15 + $0xc0] sm:$0xff]  ;;  %v4303_v41 = vpack.c.bf16 %v380_v37, %v373_v36  ;;  %v3477_v42 = vld [vmem:[%s5472_s1 + $0xd4] sm:$0xf]  ;;  %v2937_v37 = vld [vmem:[%s5472_s1 + $0x38] sm:$0xf0] }
  0x4d   : > { %1211 = vmatmul.bf16.gmra.mxu2 %v4103_v28  ;;  %1186 = vmatmul.bf16.gmra.mxu0 %v4105_v29  ;;  %v4281_v20 = vpack.c.bf16 %v364_v15, %v357_v14  ;;  %v3020_v45 = vor.u32 %v3477_v42, %v3017_v43  ;;  %v3491_v42 = vld [vmem:[%s5472_s1 + $0x144] sm:$0xf]  ;;  %v3073_v43 = vld [vmem:[%s5472_s1 + $0x148] sm:$0xf0] }
  0x4e   : > { %1269 = vmatmul.bf16.gmra.mxu3 %v4107_v30  ;;  %1523 = vmatpush.bf16.msra.mxu2 %v3296_v2  ;;  %v3495_v2 = vld [vmem:[%s5472_s1 + $0x164] sm:$0xf]  ;;  %5526 = vst [vmem:[#allocation14_spill] sm:$0xff] %v4303_v41  ;;  %v3076_v46 = vor.u32 %v3491_v42, %v3073_v43 }
  0x4f   : > { %1574 = vmatpush.bf16.msra.mxu3 %v2972_v11  ;;  %1465 = vmatpush.bf16.msrb.mxu1 %v3232_v17  ;;  %v3092_v7 = vor.u32 %v3495_v2, %v3089_v6  ;;  %v363_v11 = vld [vmem:[%s3900_s15 + $0xb8] sm:$0xff]  ;;  %v366_v17 = vld [vmem:[%s3900_s15 + $0xd0] sm:$0xff]  ;;  %5522 = vst [vmem:[#allocation10_spill] sm:$0xff] %v4281_v20  ;;  %v385_v6 = vld [vmem:[%s3900_s15 + $0x168] sm:$0xff] }
  0x50   : > { %1244 = vmatmul.bf16.gmra.mxu1 %v4109_v31  ;;  %1632 = vmatpush.bf16.msra.mxu0 %v3036_v35  ;;  %v4277_v18 = vpack.c.bf16 %v363_v11, %v356_v9  ;;  %v4283_v21 = vpack.c.bf16 %v366_v17, %v359_v16  ;;  %v378_v35 = vld [vmem:[%s3900_s15 + $0x130] sm:$0xff]  ;;  %v387_v9 = vld [vmem:[%s3900_s15 + $0x178] sm:$0xff] }
  0x51   : > { %v386_v2 = vld [vmem:[%s3900_s15 + $0x170] sm:$0xff] }
  0x52   : > { %5523 = vst [vmem:[#allocation11_spill] sm:$0xff] %v4283_v21  ;;  %v394_v11 = vld [vmem:[%s3900_s15 + $0x1b0] sm:$0xff] }
  0x53   : > { %1575 = vmatpush.bf16.msra.mxu3 %v2964_v39  ;;  %1690 = vmatpush.bf16.msra.mxu1 %v3100_v40  ;;  %v4299_v39 = vpack.c.bf16 %v379_v33, %v372_v32  ;;  %v4301_v40 = vpack.c.bf16 %v378_v35, %v371_v34  ;;  %v4347_v22 = vpack.c.bf16 %v394_v11, %v387_v9  ;;  %v3475_v33 = vld [vmem:[%s5472_s1 + $0xc4] sm:$0xf]  ;;  %v3009_v34 = vld [vmem:[%s5472_s1 + $0xc8] sm:$0xf0]  ;;  %v3457_v35 = vld [vmem:[%s5472_s1 + $0x34] sm:$0xf] }
  0x54   : > { %1633 = vmatpush.bf16.msra.mxu0 %v3028_v63  ;;  %v384_v63 = vld [vmem:[%s3900_s15 + $0x160] sm:$0xff]  ;;  %v3012_v36 = vor.u32 %v3475_v33, %v3009_v34  ;;  %v399_v9 = vld [vmem:[%s3900_s15 + $0x1d8] sm:$0xff]  ;;  %v406_v11 = vld [vmem:[%s3900_s15 + $0x210] sm:$0xff] }
  0x55   : > { %5524 = vst [vmem:[#allocation12_spill] sm:$0xff] %v4299_v39  ;;  %v4338_v12 = vpack.c.bf16 %v391_v0, %v384_v63 }
  0x56   : > { %5525 = vst [vmem:[#allocation13_spill] sm:$0xff] %v4301_v40 }
  0x57   : > { %1576 = vmatpush.bf16.msra.mxu3 %v2956_v5  ;;  %1691 = vmatpush.bf16.msra.mxu1 %v3092_v7  ;;  %v393_v5 = vld [vmem:[%s3900_s15 + $0x1a8] sm:$0xff]  ;;  %v392_v7 = vld [vmem:[%s3900_s15 + $0x1a0] sm:$0xff]  ;;  %5529 = vst [vmem:[#allocation17_spill] sm:$0xff] %v4347_v22 }
  0x58   : > { %1634 = vmatpush.bf16.msra.mxu0 %v3020_v45  ;;  %v4342_v14 = vpack.c.bf16 %v393_v5, %v386_v2  ;;  %v4344_v15 = vpack.c.bf16 %v392_v7, %v385_v6  ;;  %v2940_v45 = vor.u32 %v3457_v35, %v2937_v37  ;;  %v398_v2 = vld [vmem:[%s3900_s15 + $0x1d0] sm:$0xff]  ;;  %v405_v5 = vld [vmem:[%s3900_s15 + $0x208] sm:$0xff]  ;;  %v400_v6 = vld [vmem:[%s3900_s15 + $0x1e0] sm:$0xff]  ;;  %v4392_v37 = vpack.c.bf16 %v406_v11, %v399_v9 }
  0x59   : > { %v407_v7 = vld [vmem:[%s3900_s15 + $0x218] sm:$0xff]  ;;  %v4388_v35 = vpack.c.bf16 %v405_v5, %v398_v2  ;;  %v3455_v9 = vld [vmem:[%s5472_s1 + $0x24] sm:$0xf] }
  0x5a   : > { %5527 = vst [vmem:[#allocation15_spill] sm:$0xff] %v4342_v14 }
  0x5b   : > { %1577 = vmatpush.bf16.msra.mxu3 %v2948_v61  ;;  %1692 = vmatpush.bf16.msra.mxu1 %v3084_v62  ;;  %5528 = vst [vmem:[#allocation16_spill] sm:$0xff] %v4344_v15 }
  0x5c   : > { %1635 = vmatpush.bf16.msra.mxu0 %v3012_v36  ;;  %v4390_v36 = vpack.c.bf16 %v407_v7, %v400_v6  ;;  %5531 = vst [vmem:[#allocation19_spill] sm:$0xff] %v4392_v37  ;;  %v3473_v6 = vld [vmem:[%s5472_s1 + $0xb4] sm:$0xf]  ;;  %v3001_v7 = vld [vmem:[%s5472_s1 + $0xb8] sm:$0xf0] }
  0x5d   : > { %1216 = vmatmul.bf16.gmra.mxu2 %v4147_v56  ;;  %1191 = vmatmul.bf16.gmra.mxu0 %v4149_v57 }
  0x5e   : > { %1274 = vmatmul.bf16.gmra.mxu3 %v4151_v58  ;;  %5530 = vst [vmem:[#allocation18_spill] sm:$0xff] %v4390_v36 }
  0x5f   : > { %1578 = vmatpush.bf16.msra.mxu3 %v2940_v45  ;;  %1693 = vmatpush.bf16.msra.mxu1 %v3076_v46 }
  0x60   : > { %1249 = vmatmul.bf16.gmra.mxu1 %v4153_v59 }
  0x6d   : > { %1221 = vmatmul.bf16.gmra.mxu2 %v4201_v24  ;;  %1196 = vmatmul.bf16.gmra.mxu0 %v4203_v25 }
  0x6e   : > { %1279 = vmatmul.bf16.gmra.mxu3 %v4205_v26 }
  0x70   : > { %1254 = vmatmul.bf16.gmra.mxu1 %v4207_v27 }
  0x7d   : > { %1292 = vmatmul.bf16.vlgmr.msrb.gmra.mxu2 %v4239_v49  ;;  %1408 = vmatmul.bf16.vlgmr.msrb.gmra.mxu0 %v4241_v50  ;;  %v3469_v50 = vld [vmem:[%s5472_s1 + $0x94] sm:$0xf] }
  0x7e   : > { %1350 = vmatmul.bf16.vlgmr.msrb.gmra.mxu3 %v4243_v51 }
  0x80   : > { %1466 = vmatmul.bf16.vlgmr.msrb.gmra.mxu1 %v4245_v60  ;;  %v457_v60 = vld [vmem:[%s3900_s15 + $0x3a8] sm:$0xff] }
  0x8d   : > { %1297 = vmatmul.bf16.gmra.mxu2 %v4277_v18  ;;  %1413 = vmatmul.bf16.gmra.mxu0 %v4279_v19 }
  0x8e   : > { %1355 = vmatmul.bf16.gmra.mxu3 %v4281_v20 }
  0x90   : > { %1471 = vmatmul.bf16.gmra.mxu1 %v4283_v21 }
  0x9d   : > { %1302 = vmatmul.bf16.gmra.mxu2 %v4297_v38  ;;  %1418 = vmatmul.bf16.gmra.mxu0 %v4299_v39 }
  0x9e   : > { %1360 = vmatmul.bf16.gmra.mxu3 %v4301_v40 }
  0xa0   : > { %1476 = vmatmul.bf16.gmra.mxu1 %v4303_v41 }
  0xaa   : > { %v1177_v16 = vpop.f32.mrf.mxu0 }
  0xab   : > { %v1178_v17 = vadd.f32 %v1177_v16, %v4340_v13 }
  0xad   : > { %v1235_v23 = vpop.f32.mrf.mxu1  ;;  %1307 = vmatmul.bf16.gmra.mxu2 %v4338_v12  ;;  %1423 = vmatmul.bf16.gmra.mxu0 %v4342_v14 }
  0xae   : > { %v4350_v32 = vadd.f32 %v1235_v23, %v1178_v17  ;;  %1365 = vmatmul.bf16.gmra.mxu3 %v4344_v15  ;;  %v401_v17 = vld [vmem:[%s3900_s15 + $0x1e8] sm:$0xff]  ;;  %v408_v23 = vld [vmem:[%s3900_s15 + $0x220] sm:$0xff] }
  0xaf   : > { %v4397_v45 = vpack.c.bf16 %v408_v23, %v401_v17  ;;  %v2929_v17 = vld [vmem:[%s5472_s1 + $0x28] sm:$0xf0]  ;;  %v3489_v23 = vld [vmem:[%s5472_s1 + $0x134] sm:$0xf] }
  0xb0   : > { %1481 = vmatmul.bf16.gmra.mxu1 %v4347_v22  ;;  %v1202_v44 = vpop.f32.mrf.mxu2 }
  0xb1   : > { %v1203_v47 = vadd.f32 %v1202_v44, %v4340_v13  ;;  %v1260_v48 = vpop.f32.mrf.mxu3  ;;  %5532 = vst [vmem:[#allocation20_spill] sm:$0xff] %v4397_v45 }
  0xb2   : > { %v1179_v61 = vpop.f32.mrf.mxu0 }
  0xb3   : > { %v4374_v62 = vadd.f32 %v1260_v48, %v1203_v47  ;;  %v1180_v63 = vadd.f32 %v1179_v61, %v4340_v13 }
  0xb5   : > { %v1237_v0 = vpop.f32.mrf.mxu1 }
  0xb6   : > { %v4377_v1 = vadd.f32 %v1237_v0, %v1180_v63 }
  0xb8   : > { %v1204_v16 = vpop.f32.mrf.mxu2 }
  0xb9   : > { %v1205_v33 = vadd.f32 %v1204_v16, %v4340_v13  ;;  %v1262_v34 = vpop.f32.mrf.mxu3  ;;  %v3004_v16 = vor.u32 %v3473_v6, %v3001_v7  ;;  %v420_v6 = vld [vmem:[%s3900_s15 + $0x280] sm:$0xff] }
  0xba   : > { %v1182_v42 = vpop.f32.mrf.mxu0 }
  0xbb   : > { %v4394_v43 = vadd.f32 %v1262_v34, %v1205_v33  ;;  %v1183_v44 = vadd.f32 %v1182_v42, %v4340_v13  ;;  %v3065_v33 = vld [vmem:[%s5472_s1 + $0x138] sm:$0xf0]  ;;  %v412_v42 = vld [vmem:[%s3900_s15 + $0x240] sm:$0xff]  ;;  %1636 = vmatpush.bf16.msra.mxu0 %v3004_v16 }
  0xbd   : > { %v1240_v46 = vpop.f32.mrf.mxu1  ;;  %1312 = vmatmul.bf16.gmra.mxu2 %v4388_v35  ;;  %1428 = vmatmul.bf16.gmra.mxu0 %v4390_v36  ;;  %v415_v36 = vld [vmem:[%s3900_s15 + $0x258] sm:$0xff] }
  0xbe   : > { %v4400_v47 = vadd.f32 %v1240_v46, %v1183_v44  ;;  %1370 = vmatmul.bf16.gmra.mxu3 %v4392_v37  ;;  %v2932_v44 = vor.u32 %v3455_v9, %v2929_v17  ;;  %v3068_v46 = vor.u32 %v3489_v23, %v3065_v33 }
  0xc0   : > { %1486 = vmatmul.bf16.gmra.mxu1 %v4397_v45  ;;  %v1207_v48 = vpop.f32.mrf.mxu2  ;;  %1579 = vmatpush.bf16.msra.mxu3 %v2932_v44  ;;  %v422_v45 = vld [vmem:[%s3900_s15 + $0x290] sm:$0xff] }
  0xc1   : > { %v1208_v61 = vadd.f32 %v1207_v48, %v4340_v13  ;;  %v1265_v63 = vpop.f32.mrf.mxu3  ;;  %v419_v48 = vld [vmem:[%s3900_s15 + $0x278] sm:$0xff]  ;;  %1694 = vmatpush.bf16.msra.mxu1 %v3068_v46  ;;  %v4447_v23 = vpack.c.bf16 %v422_v45, %v415_v36 }
  0xc2   : > { %v1184_v0 = vpop.f32.mrf.mxu0  ;;  %v4438_v22 = vpack.c.bf16 %v419_v48, %v412_v42  ;;  %v3471_v48 = vld [vmem:[%s5472_s1 + $0xa4] sm:$0xf] }
  0xc3   : > { %v4406_v2 = vadd.f32 %v1265_v63, %v1208_v61  ;;  %v1185_v5 = vadd.f32 %v1184_v0, %v4340_v13  ;;  %v414_v61 = vld [vmem:[%s3900_s15 + $0x250] sm:$0xff]  ;;  %v421_v63 = vld [vmem:[%s3900_s15 + $0x288] sm:$0xff]  ;;  %5535 = vst [vmem:[#allocation23_spill] sm:$0xff] %v4447_v23 }
  0xc4   : > { %v413_v0 = vld [vmem:[%s3900_s15 + $0x248] sm:$0xff] }
  0xc5   : > { %v1242_v11 = vpop.f32.mrf.mxu1  ;;  %v4442_v9 = vpack.c.bf16 %v420_v6, %v413_v0  ;;  %v433_v0 = vld [vmem:[%s3900_s15 + $0x2e8] sm:$0xff] }
  0xc6   : > { %v4427_v34 = vadd.f32 %v1242_v11, %v1185_v5  ;;  %v4440_v5 = vpack.c.bf16 %v421_v63, %v414_v61  ;;  %v426_v63 = vld [vmem:[%s3900_s15 + $0x2b0] sm:$0xff]  ;;  %v2993_v6 = vld [vmem:[%s5472_s1 + $0xa8] sm:$0xf0] }
  0xc7   : > { %5534 = vst [vmem:[#allocation22_spill] sm:$0xff] %v4442_v9  ;;  %v4488_v41 = vpack.c.bf16 %v433_v0, %v426_v63 }
  0xc8   : > { %v1209_v7 = vpop.f32.mrf.mxu2  ;;  %5533 = vst [vmem:[#allocation21_spill] sm:$0xff] %v4440_v5 }
  0xc9   : > { %v1210_v37 = vadd.f32 %v1209_v7, %v4340_v13  ;;  %v1267_v14 = vpop.f32.mrf.mxu3 }
  0xca   : > { %v1187_v11 = vpop.f32.mrf.mxu0 }
  0xcb   : > { %v4444_v17 = vadd.f32 %v1267_v14, %v1210_v37  ;;  %v1188_v16 = vadd.f32 %v1187_v11, %v4340_v13  ;;  %v2996_v11 = vor.u32 %v3471_v48, %v2993_v6  ;;  %v427_v48 = vld [vmem:[%s3900_s15 + $0x2b8] sm:$0xff] }
  0xcd   : > { %v1245_v33 = vpop.f32.mrf.mxu1  ;;  %1317 = vmatmul.bf16.gmra.mxu2 %v4438_v22  ;;  %1433 = vmatmul.bf16.gmra.mxu0 %v4440_v5 }
  0xce   : > { %v4450_v44 = vadd.f32 %v1245_v33, %v1188_v16  ;;  %1375 = vmatmul.bf16.gmra.mxu3 %v4442_v9  ;;  %v3453_v16 = vld [vmem:[%s5472_s1 + $0x14] sm:$0xf]  ;;  %v2921_v33 = vld [vmem:[%s5472_s1 + $0x18] sm:$0xf0]  ;;  %1637 = vmatpush.bf16.msra.mxu0 %v2996_v11  ;;  %v436_v9 = vld [vmem:[%s3900_s15 + $0x300] sm:$0xff] }
  0xd0   : > { %1491 = vmatmul.bf16.gmra.mxu1 %v4447_v23  ;;  %v1212_v42 = vpop.f32.mrf.mxu2  ;;  %v429_v23 = vld [vmem:[%s3900_s15 + $0x2c8] sm:$0xff] }
  0xd1   : > { %v1213_v14 = vadd.f32 %v1212_v42, %v4340_v13  ;;  %v1270_v37 = vpop.f32.mrf.mxu3  ;;  %v3487_v42 = vld [vmem:[%s5472_s1 + $0x124] sm:$0xf] }
  0xd2   : > { %v1189_v36 = vpop.f32.mrf.mxu0 }
  0xd3   : > { %v4456_v45 = vadd.f32 %v1270_v37, %v1213_v14  ;;  %v1190_v46 = vadd.f32 %v1189_v36, %v4340_v13  ;;  %v428_v14 = vld [vmem:[%s3900_s15 + $0x2c0] sm:$0xff]  ;;  %v435_v37 = vld [vmem:[%s3900_s15 + $0x2f8] sm:$0xff]  ;;  %v2924_v36 = vor.u32 %v3453_v16, %v2921_v33 }
  0xd4   : > { %v4490_v40 = vpack.c.bf16 %v435_v37, %v428_v14 }
  0xd5   : > { %v1247_v61 = vpop.f32.mrf.mxu1  ;;  %1580 = vmatpush.bf16.msra.mxu3 %v2924_v36 }
  0xd6   : > { %v4467_v7 = vadd.f32 %v1247_v61, %v1190_v46  ;;  %v3057_v46 = vld [vmem:[%s5472_s1 + $0x128] sm:$0xf0]  ;;  %v434_v61 = vld [vmem:[%s3900_s15 + $0x2f0] sm:$0xff]  ;;  %5536 = vst [vmem:[#allocation24_spill] sm:$0xff] %v4490_v40 }
  0xd7   : > { %v3060_v6 = vor.u32 %v3487_v42, %v3057_v46  ;;  %v4492_v16 = vpack.c.bf16 %v434_v61, %v427_v48  ;;  %v4497_v42 = vpack.c.bf16 %v436_v9, %v429_v23  ;;  %v440_v46 = vld [vmem:[%s3900_s15 + $0x320] sm:$0xff]  ;;  %v447_v48 = vld [vmem:[%s3900_s15 + $0x358] sm:$0xff]  ;;  %v442_v61 = vld [vmem:[%s3900_s15 + $0x330] sm:$0xff] }
  0xd8   : > { %v1214_v5 = vpop.f32.mrf.mxu2  ;;  %v4520_v21 = vpack.c.bf16 %v447_v48, %v440_v46  ;;  %v2985_v46 = vld [vmem:[%s5472_s1 + $0x98] sm:$0xf0] }
  0xd9   : > { %v1215_v15 = vadd.f32 %v1214_v5, %v4340_v13  ;;  %v1272_v39 = vpop.f32.mrf.mxu3  ;;  %1695 = vmatpush.bf16.msra.mxu1 %v3060_v6  ;;  %5537 = vst [vmem:[#allocation25_spill] sm:$0xff] %v4492_v16  ;;  %v449_v6 = vld [vmem:[%s3900_s15 + $0x368] sm:$0xff] }
  0xda   : > { %v1192_v33 = vpop.f32.mrf.mxu0  ;;  %5538 = vst [vmem:[#allocation26_spill] sm:$0xff] %v4497_v42 }
  0xdb   : > { %v4494_v19 = vadd.f32 %v1272_v39, %v1215_v15  ;;  %v1193_v11 = vadd.f32 %v1192_v33, %v4340_v13  ;;  %v441_v33 = vld [vmem:[%s3900_s15 + $0x328] sm:$0xff] }
  0xdd   : > { %v1250_v36 = vpop.f32.mrf.mxu1  ;;  %1322 = vmatmul.bf16.gmra.mxu2 %v4488_v41  ;;  %1438 = vmatmul.bf16.gmra.mxu0 %v4490_v40  ;;  %v443_v40 = vld [vmem:[%s3900_s15 + $0x338] sm:$0xff] }
  0xde   : > { %v4500_v5 = vadd.f32 %v1250_v36, %v1193_v11  ;;  %1380 = vmatmul.bf16.gmra.mxu3 %v4492_v16  ;;  %v448_v11 = vld [vmem:[%s3900_s15 + $0x360] sm:$0xff] }
  0xe0   : > { %1496 = vmatmul.bf16.gmra.mxu1 %v4497_v42  ;;  %v1217_v39 = vpop.f32.mrf.mxu2  ;;  %v450_v42 = vld [vmem:[%s3900_s15 + $0x370] sm:$0xff] }
  0xe1   : > { %v1218_v15 = vadd.f32 %v1217_v39, %v4340_v13  ;;  %v1275_v9 = vpop.f32.mrf.mxu3  ;;  %v4529_v20 = vpack.c.bf16 %v450_v42, %v443_v40  ;;  %v3451_v40 = vld [vmem:[%s5472_s1 + $0x4] sm:$0xf]  ;;  %v3485_v42 = vld [vmem:[%s5472_s1 + $0x114] sm:$0xf] }
  0xe2   : > { %v1194_v23 = vpop.f32.mrf.mxu0 }
  0xe3   : > { %v4506_v63 = vadd.f32 %v1275_v9, %v1218_v15  ;;  %v1195_v0 = vadd.f32 %v1194_v23, %v4340_v13  ;;  %v4522_v15 = vpack.c.bf16 %v449_v6, %v442_v61  ;;  %v4524_v9 = vpack.c.bf16 %v448_v11, %v441_v33  ;;  %5541 = vst [vmem:[#allocation29_spill] sm:$0xff] %v4529_v20  ;;  %v3049_v33 = vld [vmem:[%s5472_s1 + $0x118] sm:$0xf0] }
  0xe4   : > { %v2988_v61 = vor.u32 %v3469_v50, %v2985_v46  ;;  %v3052_v11 = vor.u32 %v3485_v42, %v3049_v33  ;;  %v456_v42 = vld [vmem:[%s3900_s15 + $0x3a0] sm:$0xff]  ;;  %v463_v33 = vld [vmem:[%s3900_s15 + $0x3d8] sm:$0xff] }
  0xe5   : > { %v1252_v14 = vpop.f32.mrf.mxu1  ;;  %5539 = vst [vmem:[#allocation27_spill] sm:$0xff] %v4522_v15 }
  0xe6   : > { %v4509_v37 = vadd.f32 %v1252_v14, %v1195_v0  ;;  %5540 = vst [vmem:[#allocation28_spill] sm:$0xff] %v4524_v9  ;;  %1638 = vmatpush.bf16.msra.mxu0 %v2988_v61  ;;  %1696 = vmatpush.bf16.msra.mxu1 %v3052_v11  ;;  %v4571_v11 = vpack.c.bf16 %v463_v33, %v456_v42 }
  0xe8   : > { %v1219_v36 = vpop.f32.mrf.mxu2  ;;  %5544 = vst [vmem:[#allocation32_spill] sm:$0xff] %v4571_v11 }
  0xe9   : > { %v1220_v39 = vadd.f32 %v1219_v36, %v4340_v13  ;;  %v1277_v16 = vpop.f32.mrf.mxu3 }
  0xea   : > { %v1197_v23 = vpop.f32.mrf.mxu0 }
  0xeb   : > { %v4526_v0 = vadd.f32 %v1277_v16, %v1220_v39  ;;  %v1198_v14 = vadd.f32 %v1197_v23, %v4340_v13  ;;  %v2913_v16 = vld [vmem:[%s5472_s1 + $0x8] sm:$0xf0] }
  0xec   : > { %v2916_v50 = vor.u32 %v3451_v40, %v2913_v16  ;;  %v454_v16 = vld [vmem:[%s3900_s15 + $0x390] sm:$0xff] }
  0xed   : > { %v1255_v48 = vpop.f32.mrf.mxu1  ;;  %1327 = vmatmul.bf16.gmra.mxu2 %v4520_v21  ;;  %1443 = vmatmul.bf16.gmra.mxu0 %v4522_v15  ;;  %v461_v15 = vld [vmem:[%s3900_s15 + $0x3c8] sm:$0xff] }
  0xee   : > { %v4538_v6 = vadd.f32 %v1255_v48, %v1198_v14  ;;  %1385 = vmatmul.bf16.gmra.mxu3 %v4524_v9  ;;  %v4569_v24 = vpack.c.bf16 %v461_v15, %v454_v16  ;;  %v3041_v16 = vld [vmem:[%s5472_s1 + $0x108] sm:$0xf0] }
  0xef   : > { %1581 = vmatpush.bf16.msra.mxu3 %v2916_v50  ;;  %v462_v50 = vld [vmem:[%s3900_s15 + $0x3d0] sm:$0xff] }
  0xf0   : > { %1501 = vmatmul.bf16.gmra.mxu1 %v4529_v20  ;;  %v1222_v36 = vpop.f32.mrf.mxu2  ;;  %v455_v20 = vld [vmem:[%s3900_s15 + $0x398] sm:$0xff]  ;;  %5543 = vst [vmem:[#allocation31_spill] sm:$0xff] %v4569_v24 }
  0xf1   : > { %v1223_v39 = vadd.f32 %v1222_v36, %v4340_v13  ;;  %v1280_v23 = vpop.f32.mrf.mxu3  ;;  %v464_v36 = vld [vmem:[%s3900_s15 + $0x3e0] sm:$0xff] }
  0xf2   : > { %v1199_v14 = vpop.f32.mrf.mxu0 }
  0xf3   : > { %v4556_v46 = vadd.f32 %v1280_v23, %v1223_v39  ;;  %v1200_v48 = vadd.f32 %v1199_v14, %v4340_v13  ;;  %v4573_v39 = vpack.c.bf16 %v462_v50, %v455_v20  ;;  %v4575_v23 = vpack.c.bf16 %v464_v36, %v457_v60  ;;  %v2977_v20 = vld [vmem:[%s5472_s1 + $0x88] sm:$0xf0]  ;;  %v3513_v60 = vld [vmem:[%s5472_s1 + $0x1f4] sm:$0xf] }
  0xf5   : > { %5542 = vst [vmem:[#allocation30_spill] sm:$0xff] %v4556_v46  ;;  %v1257_v61 = vpop.f32.mrf.mxu1 }
  0xf6   : > { %v4559_v40 = vadd.f32 %v1257_v61, %v1200_v48  ;;  %5545 = vst [vmem:[#allocation33_spill] sm:$0xff] %v4573_v39  ;;  %v3161_v48 = vld [vmem:[%s5472_s1 + $0x1f8] sm:$0xf0]  ;;  %v3483_v61 = vld [vmem:[%s5472_s1 + $0x104] sm:$0xf] }
  0xf7   : > { %5546 = vst [vmem:[#allocation34_spill] sm:$0xff] %v4575_v23  ;;  %v3164_v50 = vor.u32 %v3513_v60, %v3161_v48  ;;  %v3044_v36 = vor.u32 %v3483_v61, %v3041_v16  ;;  %v470_v48 = vld [vmem:[%s3900_s15 + $0x410] sm:$0xff]  ;;  %v469_v16 = vld [vmem:[%s3900_s15 + $0x408] sm:$0xff] }
  0xf8   : > { %v1224_v9 = vpop.f32.mrf.mxu2 }
  0xf9   : > { %v1282_v51 = vpop.f32.mrf.mxu3  ;;  %1748 = vmatpush.bf16.msrb.mxu2 %v3164_v50  ;;  %1697 = vmatpush.bf16.msra.mxu1 %v3044_v36  ;;  %v3153_v36 = vld [vmem:[%s5472_s1 + $0x1e8] sm:$0xf0] }
  0xfa   : > { %v1409_v13 = vpop.f32.mrf.mxu0  ;;  %v3467_v51 = vld [vmem:[%s5472_s1 + $0x84] sm:$0xf] }
  0xfb   : > { %v2980_v9 = vor.u32 %v3467_v51, %v2977_v20  ;;  %v3529_v51 = vld [vmem:[%s5472_s1 + $0x274] sm:$0xf]  ;;  %v3225_v20 = vld [vmem:[%s5472_s1 + $0x278] sm:$0xf0] }
  0xfd   : > { %v1467_v14 = vpop.f32.mrf.mxu1  ;;  %1332 = vmatmul.bf16.gmra.mxu2 %v4569_v24  ;;  %1448 = vmatmul.bf16.gmra.mxu0 %v4571_v11  ;;  %v471_v24 = vld [vmem:[%s3900_s15 + $0x418] sm:$0xff] }
  0xfe   : > { %1390 = vmatmul.bf16.gmra.mxu3 %v4573_v39  ;;  %1639 = vmatpush.bf16.msra.mxu0 %v2980_v9  ;;  %v4615_v9 = vpack.c.bf16 %v470_v48, %v470_v48  ;;  %v3527_v48 = vld [vmem:[%s5472_s1 + $0x264] sm:$0xf] }
 0x100   : > { %1506 = vmatmul.bf16.gmra.mxu1 %v4575_v23  ;;  %v1293_v15 = vpop.f32.mrf.mxu2  ;;  %v3228_v23 = vor.u32 %v3529_v51, %v3225_v20  ;;  %5547 = vst [vmem:[#allocation35_spill] sm:$0xff] %v4615_v9  ;;  %v3545_v51 = vld [vmem:[%s5472_s1 + $0x2f4] sm:$0xf] }
 0x101   : > { %v1294_v42 = vadd.f32 %v1293_v15, %v4350_v32  ;;  %v1351_v33 = vpop.f32.mrf.mxu3  ;;  %v468_v15 = vld [vmem:[%s3900_s15 + $0x400] sm:$0xff] }
 0x102   : > { %v1411_v11 = vpop.f32.mrf.mxu0  ;;  %1806 = vmatpush.bf16.msrb.mxu3 %v3228_v23  ;;  %v4613_v46 = vpack.c.bf16 %v468_v15, %v468_v15  ;;  %v4619_v23 = vpack.c.bf16 %v471_v24, %v471_v24 }
 0x103   : > { %v1352_v39 = vadd.f32 %v1351_v33, %v1294_v42  ;;  %v4617_v42 = vpack.c.bf16 %v469_v16, %v469_v16  ;;  %v3217_v16 = vld [vmem:[%s5472_s1 + $0x268] sm:$0xf0] }
 0x105   : > { %v1469_v32 = vpop.f32.mrf.mxu1  ;;  %v1410_v60 = vadd.f32 %v1409_v13, %v1352_v39 }
 0x107   : > { %v4608_v61 = vadd.f32 %v1467_v14, %v1410_v60 }
 0x108   : > { %v1295_v26 = vpop.f32.mrf.mxu2 }
 0x109   : > { %v1296_v56 = vadd.f32 %v1295_v26, %v4377_v1  ;;  %v1353_v58 = vpop.f32.mrf.mxu3 }
 0x10a   : > { %v1414_v33 = vpop.f32.mrf.mxu0 }
 0x10b   : > { %v1354_v50 = vadd.f32 %v1353_v58, %v1296_v56 }
 0x10d   : > { %v1472_v39 = vpop.f32.mrf.mxu1  ;;  %v1412_v13 = vadd.f32 %v1411_v11, %v1354_v50  ;;  %1337 = vmatmul.bf16.gmra.mxu2 %v4613_v46  ;;  %1453 = vmatmul.bf16.gmra.mxu0 %v4615_v9  ;;  %v3511_v11 = vld [vmem:[%s5472_s1 + $0x1e4] sm:$0xf] }
 0x10e   : > { %1395 = vmatmul.bf16.gmra.mxu3 %v4617_v42  ;;  %v3547_v50 = vld [vmem:[%s5472_s1 + $0x304] sm:$0xf] }
 0x10f   : > { %v4624_v26 = vadd.f32 %v1469_v32, %v1412_v13  ;;  %v3156_v32 = vor.u32 %v3511_v11, %v3153_v36  ;;  %v346_v13 = vld [vmem:[%s3900_s15 + $0x30] sm:$0xff] }
 0x110   : > { %1511 = vmatmul.bf16.gmra.mxu1 %v4619_v23  ;;  %v1298_v1 = vpop.f32.mrf.mxu2 }
 0x111   : > { %v1299_v14 = vadd.f32 %v1298_v1, %v4400_v47  ;;  %v1356_v56 = vpop.f32.mrf.mxu3  ;;  %v3289_v47 = vld [vmem:[%s5472_s1 + $0x2f8] sm:$0xf0]  ;;  %v353_v1 = vld [vmem:[%s3900_s15 + $0x68] sm:$0xff]  ;;  %1749 = vmatpush.bf16.msrb.mxu2 %v3156_v32 }
 0x112   : > { %v1416_v58 = vpop.f32.mrf.mxu0  ;;  %v3292_v15 = vor.u32 %v3545_v51, %v3289_v47  ;;  %v4657_v47 = vpack.c.bf16 %v353_v1, %v346_v13 }
 0x113   : > { %v1357_v24 = vadd.f32 %v1356_v56, %v1299_v14  ;;  %v3220_v14 = vor.u32 %v3527_v48, %v3217_v16 }
 0x114   : > { %1864 = vmatpush.bf16.msrb.mxu0 %v3292_v15 }
 0x115   : > { %v1474_v20 = vpop.f32.mrf.mxu1  ;;  %v1415_v60 = vadd.f32 %v1414_v33, %v1357_v24  ;;  %v3297_v33 = vld [vmem:[%s5472_s1 + $0x308] sm:$0xf0]  ;;  %1807 = vmatpush.bf16.msrb.mxu3 %v3220_v14 }
 0x116   : > { %v3300_v24 = vor.u32 %v3547_v50, %v3297_v33  ;;  %v367_v33 = vld [vmem:[%s3900_s15 + $0xd8] sm:$0xff] }
 0x117   : > { %v4654_v56 = vadd.f32 %v1472_v39, %v1415_v60 }
 0x118   : > { %v1300_v11 = vpop.f32.mrf.mxu2  ;;  %1929 = vmatpush.bf16.msrb.mxu1 %v3300_v24 }
 0x119   : > { %v1301_v36 = vadd.f32 %v1300_v11, %v4427_v34  ;;  %v1358_v51 = vpop.f32.mrf.mxu3  ;;  %v3525_v11 = vld [vmem:[%s5472_s1 + $0x254] sm:$0xf] }
 0x11a   : > { %v1419_v9 = vpop.f32.mrf.mxu0 }
 0x11b   : > { %v1359_v32 = vadd.f32 %v1358_v51, %v1301_v36  ;;  %v3209_v36 = vld [vmem:[%s5472_s1 + $0x258] sm:$0xf0] }
 0x11d   : > { %v1477_v48 = vpop.f32.mrf.mxu1  ;;  %v1417_v16 = vadd.f32 %v1416_v58, %v1359_v32  ;;  %3301 = vmatmul.msk.bf16.vlgmr.msra.gmra.mxu2 %vm1137_vm0, %v4657_v47  ;;  %1640 = vmatmul.bf16.vlgmr.msra.gmra.mxu0 %v3961_v10  ;;  %v360_v58 = vld [vmem:[%s3900_s15 + $0xa0] sm:$0xff]  ;;  %v3145_v10 = vld [vmem:[%s5472_s1 + $0x1d8] sm:$0xf0] }
 0x11e   : > { %1582 = vmatmul.bf16.vlgmr.msra.gmra.mxu3 %v3948_v4  ;;  %v3509_v4 = vld [vmem:[%s5472_s1 + $0x1d4] sm:$0xf] }
 0x11f   : > { %v4663_v39 = vadd.f32 %v1474_v20, %v1417_v16  ;;  %v3148_v20 = vor.u32 %v3509_v4, %v3145_v10 }
 0x120   : > { %1698 = vmatmul.bf16.vlgmr.msra.gmra.mxu1 %v4239_v49  ;;  %v1303_v34 = vpop.f32.mrf.mxu2  ;;  %v3543_v49 = vld [vmem:[%s5472_s1 + $0x2e4] sm:$0xf] }
 0x121   : > { %v1304_v60 = vadd.f32 %v1303_v34, %v4450_v44  ;;  %v1361_v15 = vpop.f32.mrf.mxu3  ;;  %v3212_v34 = vor.u32 %v3525_v11, %v3209_v36  ;;  %1750 = vmatpush.bf16.msrb.mxu2 %v3148_v20 }
 0x122   : > { %v1421_v50 = vpop.f32.mrf.mxu0 }
 0x123   : > { %v1362_v13 = vadd.f32 %v1361_v15, %v1304_v60  ;;  %1808 = vmatpush.bf16.msrb.mxu3 %v3212_v34 }
 0x125   : > { %v1479_v1 = vpop.f32.mrf.mxu1  ;;  %v1420_v14 = vadd.f32 %v1419_v9, %v1362_v13  ;;  %v3281_v9 = vld [vmem:[%s5472_s1 + $0x2e8] sm:$0xf0] }
 0x126   : > { %v3284_v16 = vor.u32 %v3543_v49, %v3281_v9  ;;  %v381_v9 = vld [vmem:[%s3900_s15 + $0x148] sm:$0xff] }
 0x127   : > { %v4669_v24 = vadd.f32 %v1477_v48, %v1420_v14  ;;  %v4690_v48 = vpack.c.bf16 %v367_v33, %v360_v58 }
 0x128   : > { %v1305_v44 = vpop.f32.mrf.mxu2  ;;  %1865 = vmatpush.bf16.msrb.mxu0 %v3284_v16  ;;  %v3541_v16 = vld [vmem:[%s5472_s1 + $0x2d4] sm:$0xf] }
 0x129   : > { %v1306_v51 = vadd.f32 %v1305_v44, %v4467_v7  ;;  %v1363_v32 = vpop.f32.mrf.mxu3 }
 0x12a   : > { %v1424_v60 = vpop.f32.mrf.mxu0 }
 0x12b   : > { %v1364_v15 = vadd.f32 %v1363_v32, %v1306_v51  ;;  %v3137_v32 = vld [vmem:[%s5472_s1 + $0x1c8] sm:$0xf0] }
 0x12d   : > { %v1482_v13 = vpop.f32.mrf.mxu1  ;;  %v1422_v14 = vadd.f32 %v1421_v50, %v1364_v15  ;;  %3302 = vmatmul.msk.bf16.gmra.mxu2 %vm1137_vm0, %v4690_v48  ;;  %1645 = vmatmul.bf16.gmra.mxu0 %v4041_v55  ;;  %v374_v50 = vld [vmem:[%s3900_s15 + $0x110] sm:$0xff] }
 0x12e   : > { %1587 = vmatmul.bf16.gmra.mxu3 %v4037_v53 }
 0x12f   : > { %v4696_v7 = vadd.f32 %v1479_v1, %v1422_v14  ;;  %v4705_v1 = vpack.c.bf16 %v381_v9, %v374_v50  ;;  %v3523_v14 = vld [vmem:[%s5472_s1 + $0x244] sm:$0xf] }
 0x130   : > { %1703 = vmatmul.bf16.gmra.mxu1 %v4277_v18  ;;  %v1308_v58 = vpop.f32.mrf.mxu2 }
 0x131   : > { %v1309_v33 = vadd.f32 %v1308_v58, %v4500_v5  ;;  %v1366_v4 = vpop.f32.mrf.mxu3  ;;  %v3507_v5 = vld [vmem:[%s5472_s1 + $0x1c4] sm:$0xf]  ;;  %v3201_v58 = vld [vmem:[%s5472_s1 + $0x248] sm:$0xf0] }
 0x132   : > { %v1426_v10 = vpop.f32.mrf.mxu0 }
 0x133   : > { %v1367_v49 = vadd.f32 %v1366_v4, %v1309_v33  ;;  %v3204_v33 = vor.u32 %v3523_v14, %v3201_v58 }
 0x135   : > { %v1484_v44 = vpop.f32.mrf.mxu1  ;;  %v1425_v20 = vadd.f32 %v1424_v60, %v1367_v49  ;;  %v3140_v60 = vor.u32 %v3507_v5, %v3137_v32  ;;  %1809 = vmatpush.bf16.msrb.mxu3 %v3204_v33 }
 0x137   : > { %v4702_v11 = vadd.f32 %v1482_v13, %v1425_v20  ;;  %1751 = vmatpush.bf16.msrb.mxu2 %v3140_v60 }
 0x138   : > { %v1310_v36 = vpop.f32.mrf.mxu2 }
 0x139   : > { %v1311_v55 = vadd.f32 %v1310_v36, %v4509_v37  ;;  %v1368_v53 = vpop.f32.mrf.mxu3  ;;  %v3273_v37 = vld [vmem:[%s5472_s1 + $0x2d8] sm:$0xf0] }
 0x13a   : > { %v1429_v51 = vpop.f32.mrf.mxu0  ;;  %v3276_v13 = vor.u32 %v3541_v16, %v3273_v37 }
 0x13b   : > { %v1369_v18 = vadd.f32 %v1368_v53, %v1311_v55  ;;  %v388_v55 = vld [vmem:[%s3900_s15 + $0x180] sm:$0xff]  ;;  %v395_v53 = vld [vmem:[%s3900_s15 + $0x1b8] sm:$0xff] }
 0x13c   : > { %1866 = vmatpush.bf16.msrb.mxu0 %v3276_v13  ;;  %v4738_v32 = vpack.c.bf16 %v395_v53, %v388_v55  ;;  %v3193_v13 = vld [vmem:[%s5472_s1 + $0x238] sm:$0xf0] }
 0x13d   : > { %v1487_v34 = vpop.f32.mrf.mxu1  ;;  %v1427_v15 = vadd.f32 %v1426_v10, %v1369_v18  ;;  %3303 = vmatmul.msk.bf16.gmra.mxu2 %vm1137_vm0, %v4705_v1  ;;  %1650 = vmatmul.bf16.gmra.mxu0 %v4109_v31 }
 0x13e   : > { %1592 = vmatmul.bf16.gmra.mxu3 %v4105_v29 }
 0x13f   : > { %v4729_v4 = vadd.f32 %v1484_v44, %v1427_v15 }
 0x140   : > { %1708 = vmatmul.bf16.gmra.mxu1 %v4297_v38  ;;  %v1313_v31 = vpop.f32.mrf.mxu2 }
 0x141   : > { %v1314_v10 = vadd.f32 %v1313_v31, %v4538_v6  ;;  %v1371_v49 = vpop.f32.mrf.mxu3 }
 0x142   : > { %v1431_v20 = vpop.f32.mrf.mxu0 }
 0x143   : > { %v1372_v50 = vadd.f32 %v1371_v49, %v1314_v10 }
 0x145   : > { %v1489_v9 = vpop.f32.mrf.mxu1  ;;  %v1430_v36 = vadd.f32 %v1429_v51, %v1372_v50  ;;  %v3129_v51 = vld [vmem:[%s5472_s1 + $0x1b8] sm:$0xf0] }
 0x147   : > { %v4735_v18 = vadd.f32 %v1487_v34, %v1430_v36  ;;  %v3539_v34 = vld [vmem:[%s5472_s1 + $0x2c4] sm:$0xf]  ;;  %v409_v36 = vld [vmem:[%s3900_s15 + $0x228] sm:$0xff] }
 0x148   : > { %v1315_v29 = vpop.f32.mrf.mxu2 }
 0x149   : > { %v1316_v44 = vadd.f32 %v1315_v29, %v4559_v40  ;;  %v1373_v5 = vpop.f32.mrf.mxu3  ;;  %v3505_v40 = vld [vmem:[%s5472_s1 + $0x1b4] sm:$0xf] }
 0x14a   : > { %v1434_v38 = vpop.f32.mrf.mxu0 }
 0x14b   : > { %v1374_v16 = vadd.f32 %v1373_v5, %v1316_v44 }
 0x14d   : > { %v1492_v60 = vpop.f32.mrf.mxu1  ;;  %v1432_v37 = vadd.f32 %v1431_v20, %v1374_v16  ;;  %3304 = vmatmul.msk.bf16.gmra.mxu2 %vm1137_vm0, %v4738_v32  ;;  %1655 = vmatmul.bf16.gmra.mxu0 %v4153_v59  ;;  %v3132_v59 = vor.u32 %v3505_v40, %v3129_v51 }
 0x14e   : > { %1597 = vmatmul.bf16.gmra.mxu3 %v4149_v57  ;;  %v3265_v57 = vld [vmem:[%s5472_s1 + $0x2c8] sm:$0xf0] }
 0x14f   : > { %v4744_v6 = vadd.f32 %v1489_v9, %v1432_v37  ;;  %v3268_v33 = vor.u32 %v3539_v34, %v3265_v57  ;;  %1752 = vmatpush.bf16.msrb.mxu2 %v3132_v59  ;;  %v402_v9 = vld [vmem:[%s3900_s15 + $0x1f0] sm:$0xff]  ;;  %v3503_v59 = vld [vmem:[%s5472_s1 + $0x1a4] sm:$0xf] }
 0x150   : > { %1713 = vmatmul.bf16.gmra.mxu1 %v4338_v12  ;;  %v1318_v15 = vpop.f32.mrf.mxu2  ;;  %v3521_v12 = vld [vmem:[%s5472_s1 + $0x234] sm:$0xf]  ;;  %v4771_v5 = vpack.c.bf16 %v409_v36, %v402_v9 }
 0x151   : > { %v1319_v14 = vadd.f32 %v1318_v15, %v4374_v62  ;;  %v1376_v58 = vpop.f32.mrf.mxu3  ;;  %v3196_v31 = vor.u32 %v3521_v12, %v3193_v13  ;;  %1867 = vmatpush.bf16.msrb.mxu0 %v3268_v33  ;;  %v416_v33 = vld [vmem:[%s3900_s15 + $0x260] sm:$0xff] }
 0x152   : > { %v1436_v10 = vpop.f32.mrf.mxu0 }
 0x153   : > { %v1377_v49 = vadd.f32 %v1376_v58, %v1319_v14  ;;  %1810 = vmatpush.bf16.msrb.mxu3 %v3196_v31  ;;  %v3519_v14 = vld [vmem:[%s5472_s1 + $0x224] sm:$0xf]  ;;  %v3185_v58 = vld [vmem:[%s5472_s1 + $0x228] sm:$0xf0]  ;;  %v423_v31 = vld [vmem:[%s3900_s15 + $0x298] sm:$0xff] }
 0x154   : > { %v4804_v36 = vpack.c.bf16 %v423_v31, %v416_v33 }
 0x155   : > { %v1494_v20 = vpop.f32.mrf.mxu1  ;;  %v1435_v50 = vadd.f32 %v1434_v38, %v1377_v49 }
 0x157   : > { %v4768_v55 = vadd.f32 %v1492_v60, %v1435_v50 }
 0x158   : > { %v1320_v53 = vpop.f32.mrf.mxu2 }
 0x159   : > { %v1321_v29 = vadd.f32 %v1320_v53, %v4394_v43  ;;  %v1378_v44 = vpop.f32.mrf.mxu3 }
 0x15a   : > { %v1439_v62 = vpop.f32.mrf.mxu0 }
 0x15b   : > { %v1379_v16 = vadd.f32 %v1378_v44, %v1321_v29 }
 0x15d   : > { %v1497_v37 = vpop.f32.mrf.mxu1  ;;  %v1437_v40 = vadd.f32 %v1436_v10, %v1379_v16  ;;  %3305 = vmatmul.msk.bf16.gmra.mxu2 %vm1137_vm0, %v4771_v5  ;;  %1660 = vmatmul.bf16.gmra.mxu0 %v4207_v27  ;;  %v3537_v27 = vld [vmem:[%s5472_s1 + $0x2b4] sm:$0xf]  ;;  %v3188_v10 = vor.u32 %v3519_v14, %v3185_v58 }
 0x15e   : > { %1602 = vmatmul.bf16.gmra.mxu3 %v4203_v25  ;;  %v3121_v25 = vld [vmem:[%s5472_s1 + $0x1a8] sm:$0xf0] }
 0x15f   : > { %v4777_v38 = vadd.f32 %v1494_v20, %v1437_v40  ;;  %v3124_v57 = vor.u32 %v3503_v59, %v3121_v25  ;;  %1811 = vmatpush.bf16.msrb.mxu3 %v3188_v10  ;;  %v437_v59 = vld [vmem:[%s3900_s15 + $0x308] sm:$0xff] }
 0x160   : > { %1718 = vmatmul.bf16.gmra.mxu1 %v4388_v35  ;;  %v1323_v43 = vpop.f32.mrf.mxu2 }
 0x161   : > { %v1324_v60 = vadd.f32 %v1323_v43, %v4406_v2  ;;  %v1381_v51 = vpop.f32.mrf.mxu3  ;;  %v3257_v2 = vld [vmem:[%s5472_s1 + $0x2b8] sm:$0xf0]  ;;  %1753 = vmatpush.bf16.msrb.mxu2 %v3124_v57  ;;  %v3517_v57 = vld [vmem:[%s5472_s1 + $0x214] sm:$0xf] }
 0x162   : > { %v1441_v34 = vpop.f32.mrf.mxu0  ;;  %v3260_v13 = vor.u32 %v3537_v27, %v3257_v2  ;;  %v3177_v2 = vld [vmem:[%s5472_s1 + $0x218] sm:$0xf0] }
 0x163   : > { %v1382_v15 = vadd.f32 %v1381_v51, %v1324_v60  ;;  %v3180_v33 = vor.u32 %v3517_v57, %v3177_v2 }
 0x164   : > { %1868 = vmatpush.bf16.msrb.mxu0 %v3260_v13 }
 0x165   : > { %v1499_v35 = vpop.f32.mrf.mxu1  ;;  %v1440_v12 = vadd.f32 %v1439_v62, %v1382_v15  ;;  %1812 = vmatpush.bf16.msrb.mxu3 %v3180_v33 }
 0x167   : > { %v4801_v49 = vadd.f32 %v1497_v37, %v1440_v12 }
 0x168   : > { %v1325_v20 = vpop.f32.mrf.mxu2 }
 0x169   : > { %v1326_v50 = vadd.f32 %v1325_v20, %v4444_v17  ;;  %v1383_v9 = vpop.f32.mrf.mxu3 }
 0x16a   : > { %v1444_v53 = vpop.f32.mrf.mxu0 }
 0x16b   : > { %v1384_v29 = vadd.f32 %v1383_v9, %v1326_v50 }
 0x16d   : > { %v1502_v44 = vpop.f32.mrf.mxu1  ;;  %v1442_v62 = vadd.f32 %v1441_v34, %v1384_v29  ;;  %3306 = vmatmul.msk.bf16.gmra.mxu2 %vm1137_vm0, %v4804_v36  ;;  %1665 = vmatmul.bf16.gmra.mxu0 %v3959_v8  ;;  %v430_v34 = vld [vmem:[%s3900_s15 + $0x2d0] sm:$0xff]  ;;  %v3113_v8 = vld [vmem:[%s5472_s1 + $0x198] sm:$0xf0] }
 0x16e   : > { %1607 = vmatmul.bf16.gmra.mxu3 %v3946_v3  ;;  %v3501_v3 = vld [vmem:[%s5472_s1 + $0x194] sm:$0xf]  ;;  %v4837_v14 = vpack.c.bf16 %v437_v59, %v430_v34 }
 0x16f   : > { %v4810_v16 = vadd.f32 %v1499_v35, %v1442_v62  ;;  %v3116_v27 = vor.u32 %v3501_v3, %v3113_v8  ;;  %v3249_v35 = vld [vmem:[%s5472_s1 + $0x2a8] sm:$0xf0]  ;;  %v3533_v8 = vld [vmem:[%s5472_s1 + $0x294] sm:$0xf] }
 0x170   : > { %1723 = vmatmul.bf16.gmra.mxu1 %v4438_v22  ;;  %v1328_v17 = vpop.f32.mrf.mxu2  ;;  %v3535_v22 = vld [vmem:[%s5472_s1 + $0x2a4] sm:$0xf] }
 0x171   : > { %v1329_v37 = vadd.f32 %v1328_v17, %v4456_v45  ;;  %v1386_v40 = vpop.f32.mrf.mxu3  ;;  %v3252_v58 = vor.u32 %v3535_v22, %v3249_v35  ;;  %1754 = vmatpush.bf16.msrb.mxu2 %v3116_v27  ;;  %v3169_v27 = vld [vmem:[%s5472_s1 + $0x208] sm:$0xf0] }
 0x172   : > { %v1446_v43 = vpop.f32.mrf.mxu0 }
 0x173   : > { %v1387_v60 = vadd.f32 %v1386_v40, %v1329_v37  ;;  %1869 = vmatpush.bf16.msrb.mxu0 %v3252_v58  ;;  %v444_v40 = vld [vmem:[%s3900_s15 + $0x340] sm:$0xff] }
 0x175   : > { %v1504_v51 = vpop.f32.mrf.mxu1  ;;  %v1445_v15 = vadd.f32 %v1444_v53, %v1387_v60 }
 0x177   : > { %v4816_v25 = vadd.f32 %v1502_v44, %v1445_v15 }
 0x178   : > { %v1330_v45 = vpop.f32.mrf.mxu2 }
 0x179   : > { %v1331_v12 = vadd.f32 %v1330_v45, %v4494_v19  ;;  %v1388_v13 = vpop.f32.mrf.mxu3  ;;  %v3241_v45 = vld [vmem:[%s5472_s1 + $0x298] sm:$0xf0] }
 0x17a   : > { %v1449_v31 = vpop.f32.mrf.mxu0 }
 0x17b   : > { %v1389_v10 = vadd.f32 %v1388_v13, %v1331_v12  ;;  %v5548_v12 = vld [vmem:[#allocation30_spill] sm:$0xff] }
 0x17d   : > { %v1507_v20 = vpop.f32.mrf.mxu1  ;;  %v1447_v50 = vadd.f32 %v1446_v43, %v1389_v10  ;;  %3307 = vmatmul.msk.bf16.gmra.mxu2 %vm1137_vm0, %v4837_v14  ;;  %1670 = vmatmul.bf16.gmra.mxu0 %v4039_v54  ;;  %v451_v43 = vld [vmem:[%s3900_s15 + $0x378] sm:$0xff] }
 0x17e   : > { %1612 = vmatmul.bf16.gmra.mxu3 %v4035_v52 }
 0x17f   : > { %v4843_v19 = vadd.f32 %v1504_v51, %v1447_v50  ;;  %v4852_v51 = vpack.c.bf16 %v451_v43, %v444_v40  ;;  %v458_v50 = vld [vmem:[%s3900_s15 + $0x3b0] sm:$0xff]  ;;  %v5550_v40 = vld [vmem:[#allocation2_spill] sm:$0xff] }
 0x180   : > { %1728 = vmatmul.bf16.gmra.mxu1 %v4488_v41  ;;  %v1333_v9 = vpop.f32.mrf.mxu2  ;;  %v3738_v43 = vld [vmem:[%s5473_s2] sm:$0x3] }
 0x181   : > { %v1334_v53 = vadd.f32 %v1333_v9, %v4506_v63  ;;  %v1391_v29 = vpop.f32.mrf.mxu3  ;;  %v3499_v63 = vld [vmem:[%s5472_s1 + $0x184] sm:$0xf]  ;;  %v465_v9 = vld [vmem:[%s3900_s15 + $0x3e8] sm:$0xff] }
 0x182   : > { %v1451_v44 = vpop.f32.mrf.mxu0 }
 0x183   : > { %v1392_v62 = vadd.f32 %v1391_v29, %v1334_v53 }
 0x185   : > { %v1509_v17 = vpop.f32.mrf.mxu1  ;;  %v1450_v37 = vadd.f32 %v1449_v31, %v1392_v62 }
 0x187   : > { %v4849_v60 = vadd.f32 %v1507_v20, %v1450_v37  ;;  %v5549_v37 = vld [vmem:[#allocation3_spill] sm:$0xff] }
 0x188   : > { %v1335_v15 = vpop.f32.mrf.mxu2 }
 0x189   : > { %v1336_v54 = vadd.f32 %v1335_v15, %v4526_v0  ;;  %v1393_v52 = vpop.f32.mrf.mxu3  ;;  %v3105_v0 = vld [vmem:[%s5472_s1 + $0x188] sm:$0xf0]  ;;  %v4893_v15 = vperm.slane %v3738_v43, 1 }
 0x18a   : > { %v1454_v34 = vpop.f32.mrf.mxu0  ;;  %v3108_v22 = vor.u32 %v3499_v63, %v3105_v0 }
 0x18b   : > { %v1394_v41 = vadd.f32 %v1393_v52, %v1336_v54  ;;  %v3531_v54 = vld [vmem:[%s5472_s1 + $0x284] sm:$0xf]  ;;  %v3233_v52 = vld [vmem:[%s5472_s1 + $0x288] sm:$0xf0] }
 0x18c   : > { %1755 = vmatpush.bf16.msrb.mxu2 %v3108_v22 }
 0x18d   : > { %v1512_v59 = vpop.f32.mrf.mxu1  ;;  %v1452_v3 = vadd.f32 %v1451_v44, %v1394_v41  ;;  %3308 = vmatmul.msk.bf16.gmra.mxu2 %vm1137_vm0, %v4852_v51  ;;  %1675 = vmatmul.bf16.gmra.mxu0 %v4107_v30  ;;  %v3515_v30 = vld [vmem:[%s5472_s1 + $0x204] sm:$0xf]  ;;  %v5551_v41 = vld [vmem:[#allocation31_spill] sm:$0xff] }
 0x18e   : > { %1617 = vmatmul.bf16.gmra.mxu3 %v4103_v28  ;;  %v3244_v28 = vor.u32 %v3533_v8, %v3241_v45  ;;  %v3172_v57 = vor.u32 %v3515_v30, %v3169_v27 }
 0x18f   : > { %v4876_v35 = vadd.f32 %v1509_v17, %v1452_v3  ;;  %v3564_v3 = vld [vmem:[%s5474_s3 + $0x78] sm:$0xff] }
 0x190   : > { %1733 = vmatmul.bf16.gmra.mxu1 %v4520_v21  ;;  %v1338_v2 = vpop.f32.mrf.mxu2  ;;  %1870 = vmatpush.bf16.msrb.mxu0 %v3244_v28  ;;  %v4884_v21 = vpack.c.bf16 %v465_v9, %v458_v50 }
 0x191   : > { %v1339_v13 = vadd.f32 %v1338_v2, %v5548_v12  ;;  %v1396_v58 = vpop.f32.mrf.mxu3  ;;  %1813 = vmatpush.bf16.msrb.mxu3 %v3172_v57  ;;  %v472_v57 = vld [vmem:[%s3900_s15 + $0x420] sm:$0xff] }
 0x192   : > { %v1456_v33 = vpop.f32.mrf.mxu0 }
 0x193   : > { %v1397_v31 = vadd.f32 %v1396_v58, %v1339_v13  ;;  %v4914_v58 = vpack.c.bf16 %v472_v57, %v472_v57  ;;  %v5555_v57 = vld [vmem:[#allocation8_spill] sm:$0xff] }
 0x195   : > { %v1514_v10 = vpop.f32.mrf.mxu1  ;;  %v1455_v20 = vadd.f32 %v1454_v34, %v1397_v31  ;;  %v3556_v34 = vld [vmem:[%s5474_s3 + $0x38] sm:$0xff]  ;;  %2228 = vmatpush.bf16.msra.mxu3 %v3564_v3 }
 0x196   : > { %2170 = vmatpush.bf16.msra.mxu2 %v3556_v34 }
 0x197   : > { %v4882_v53 = vadd.f32 %v1512_v59, %v1455_v20  ;;  %v3236_v59 = vor.u32 %v3531_v54, %v3233_v52  ;;  %v3555_v54 = vld [vmem:[%s5474_s3 + $0x30] sm:$0xff] }
 0x198   : > { %v1340_v29 = vpop.f32.mrf.mxu2 }
 0x199   : > { %v1398_v44 = vpop.f32.mrf.mxu3  ;;  %1871 = vmatpush.bf16.msrb.mxu0 %v3236_v59  ;;  %v5552_v29 = vld [vmem:[#allocation5_spill] sm:$0xff] }
 0x19a   : > { %v1641_v62 = vpop.f32.mrf.mxu0  ;;  %2171 = vmatpush.bf16.msra.mxu2 %v3555_v54 }
 0x19d   : > { %v1699_v17 = vpop.f32.mrf.mxu1  ;;  %3309 = vmatmul.msk.bf16.gmra.mxu2 %vm1137_vm0, %v4884_v21  ;;  %1680 = vmatmul.bf16.gmra.mxu0 %v5549_v37 }
 0x19e   : > { %1622 = vmatmul.bf16.gmra.mxu3 %v5550_v40 }
 0x1a0   : > { %1738 = vmatmul.bf16.gmra.mxu1 %v5551_v41  ;;  %v1525_v63 = vpop.f32.mrf.mxu2  ;;  %v3563_v41 = vld [vmem:[%s5474_s3 + $0x70] sm:$0xff] }
 0x1a1   : > { %v1526_v0 = vadd.f32 %v1525_v63, %v4608_v61  ;;  %v1583_v8 = vpop.f32.mrf.mxu3  ;;  %2229 = vmatpush.bf16.msra.mxu3 %v3563_v41  ;;  %v5557_v41 = vld [vmem:[#allocation10_spill] sm:$0xff] }
 0x1a2   : > { %v1584_v22 = vadd.f32 %v1583_v8, %v4893_v15  ;;  %v1643_v45 = vpop.f32.mrf.mxu0 }
 0x1a3   : > { %v1980_v31 = vmax.f32 %v1526_v0, 0.0 }
 0x1a4   : > { %v1642_v30 = vadd.f32 %v1641_v62, %v1584_v22 }
 0x1a5   : > { %v1701_v27 = vpop.f32.mrf.mxu1 }
 0x1a6   : > { %v4910_v28 = vadd.f32 %v1699_v17, %v1642_v30 }
 0x1a8   : > { %v1527_v2 = vpop.f32.mrf.mxu2 }
 0x1a9   : > { %v1528_v12 = vadd.f32 %v1527_v2, %v4624_v26  ;;  %v1585_v13 = vpop.f32.mrf.mxu3  ;;  %v5553_v26 = vld [vmem:[#allocation4_spill] sm:$0xff] }
 0x1aa   : > { %v1586_v33 = vadd.f32 %v1585_v13, %v4893_v15  ;;  %v1646_v61 = vpop.f32.mrf.mxu0  ;;  %v5556_v13 = vld [vmem:[#allocation6_spill] sm:$0xff] }
 0x1ab   : > { %v1982_v10 = vmax.f32 %v1528_v12, 0.0 }
 0x1ac   : > { %v1644_v20 = vadd.f32 %v1643_v45, %v1586_v33 }
 0x1ad   : > { %v1704_v50 = vpop.f32.mrf.mxu1  ;;  %v4917_v9 = vpack.c.bf16 %v1982_v10, %v1980_v31  ;;  %3310 = vmatmul.msk.bf16.gmra.mxu2 %vm1137_vm0, %v4914_v58  ;;  %1685 = vmatmul.bf16.gmra.mxu0 %v5552_v29 }
 0x1ae   : > { %v4922_v44 = vadd.f32 %v1701_v27, %v1644_v20  ;;  %1627 = vmatmul.bf16.gmra.mxu3 %v5553_v26  ;;  %v5554_v27 = vld [vmem:[#allocation7_spill] sm:$0xff] }
 0x1af   : > { %v3554_v26 = vld [vmem:[%s5474_s3 + $0x28] sm:$0xff] }
 0x1b0   : > { %1743 = vmatmul.bf16.gmra.mxu1 %v4613_v46  ;;  %v1530_v62 = vpop.f32.mrf.mxu2  ;;  %2172 = vmatpush.bf16.msra.mxu2 %v3554_v26  ;;  %v3561_v26 = vld [vmem:[%s5474_s3 + $0x60] sm:$0xff] }
 0x1b1   : > { %v1531_v17 = vadd.f32 %v1530_v62, %v4654_v56  ;;  %v1588_v37 = vpop.f32.mrf.mxu3  ;;  %v3562_v62 = vld [vmem:[%s5474_s3 + $0x68] sm:$0xff] }
 0x1b2   : > { %v1589_v40 = vadd.f32 %v1588_v37, %v4893_v15  ;;  %v1648_v43 = vpop.f32.mrf.mxu0  ;;  %2230 = vmatpush.bf16.msra.mxu3 %v3562_v62  ;;  %v5560_v62 = vld [vmem:[#allocation13_spill] sm:$0xff] }
 0x1b3   : > { %v1984_v8 = vmax.f32 %v1531_v17, 0.0 }
 0x1b4   : > { %v1647_v52 = vadd.f32 %v1646_v61, %v1589_v40 }
 0x1b5   : > { %v1706_v34 = vpop.f32.mrf.mxu1 }
 0x1b6   : > { %v4934_v59 = vadd.f32 %v1704_v50, %v1647_v52  ;;  %2231 = vmatpush.bf16.msra.mxu3 %v3561_v26 }
 0x1b8   : > { %v1532_v46 = vpop.f32.mrf.mxu2 }
 0x1b9   : > { %v1533_v56 = vadd.f32 %v1532_v46, %v4663_v39  ;;  %v1590_v3 = vpop.f32.mrf.mxu3  ;;  %v5558_v46 = vld [vmem:[#allocation11_spill] sm:$0xff] }
 0x1ba   : > { %v1591_v63 = vadd.f32 %v1590_v3, %v4893_v15  ;;  %v1651_v0 = vpop.f32.mrf.mxu0 }
 0x1bb   : > { %v1986_v22 = vmax.f32 %v1533_v56, 0.0 }
 0x1bc   : > { %v1649_v45 = vadd.f32 %v1648_v43, %v1591_v63  ;;  %v5559_v63 = vld [vmem:[#allocation9_spill] sm:$0xff] }
 0x1bd   : > { %v1709_v30 = vpop.f32.mrf.mxu1  ;;  %1756 = vmatmul.bf16.vlgmr.msrb.gmra.mxu2 %v5554_v27  ;;  %1872 = vmatmul.bf16.vlgmr.msrb.gmra.mxu0 %v5555_v57  ;;  %v4940_v2 = vpack.c.bf16 %v1986_v22, %v1984_v8 }
 0x1be   : > { %v4942_v12 = vadd.f32 %v1706_v34, %v1649_v45  ;;  %1814 = vmatmul.bf16.vlgmr.msrb.gmra.mxu3 %v5556_v13 }
 0x1c0   : > { %3311 = vmatmul.msk.bf16.vlgmr.msrb.gmra.mxu1 %vm1137_vm0, %v4657_v47  ;;  %v1535_v39 = vpop.f32.mrf.mxu2 }
 0x1c1   : > { %v1536_v33 = vadd.f32 %v1535_v39, %v4669_v24  ;;  %v1593_v61 = vpop.f32.mrf.mxu3 }
 0x1c2   : > { %v1594_v31 = vadd.f32 %v1593_v61, %v4893_v15  ;;  %v1653_v10 = vpop.f32.mrf.mxu0 }
 0x1c3   : > { %v1988_v43 = vmax.f32 %v1536_v33, 0.0 }
 0x1c4   : > { %v1652_v20 = vadd.f32 %v1651_v0, %v1594_v31 }
 0x1c5   : > { %v1711_v50 = vpop.f32.mrf.mxu1 }
 0x1c6   : > { %v4949_v29 = vadd.f32 %v1709_v30, %v1652_v20 }
 0x1c8   : > { %v1537_v47 = vpop.f32.mrf.mxu2 }
 0x1c9   : > { %v1538_v24 = vadd.f32 %v1537_v47, %v4696_v7  ;;  %v1595_v17 = vpop.f32.mrf.mxu3  ;;  %v5561_v47 = vld [vmem:[#allocation14_spill] sm:$0xff] }
 0x1ca   : > { %v1596_v37 = vadd.f32 %v1595_v17, %v4893_v15  ;;  %v1656_v40 = vpop.f32.mrf.mxu0  ;;  %v5562_v17 = vld [vmem:[#allocation12_spill] sm:$0xff] }
 0x1cb   : > { %v1990_v54 = vmax.f32 %v1538_v24, 0.0 }
 0x1cc   : > { %v1654_v52 = vadd.f32 %v1653_v10, %v1596_v37 }
 0x1cd   : > { %v1714_v34 = vpop.f32.mrf.mxu1  ;;  %1761 = vmatmul.bf16.gmra.mxu2 %v5557_v41  ;;  %1877 = vmatmul.bf16.gmra.mxu0 %v5558_v46  ;;  %v4961_v56 = vpack.c.bf16 %v1990_v54, %v1988_v43 }
 0x1ce   : > { %v4963_v3 = vadd.f32 %v1711_v50, %v1654_v52  ;;  %1819 = vmatmul.bf16.gmra.mxu3 %v5559_v63 }
 0x1d0   : > { %3312 = vmatmul.msk.bf16.gmra.mxu1 %vm1137_vm0, %v4690_v48  ;;  %v1540_v7 = vpop.f32.mrf.mxu2 }
 0x1d1   : > { %v1541_v0 = vadd.f32 %v1540_v7, %v4702_v11  ;;  %v1598_v8 = vpop.f32.mrf.mxu3  ;;  %v3553_v11 = vld [vmem:[%s5474_s3 + $0x20] sm:$0xff] }
 0x1d2   : > { %v1599_v22 = vadd.f32 %v1598_v8, %v4893_v15  ;;  %v1658_v45 = vpop.f32.mrf.mxu0  ;;  %2173 = vmatpush.bf16.msra.mxu2 %v3553_v11 }
 0x1d3   : > { %v1992_v10 = vmax.f32 %v1541_v0, 0.0 }
 0x1d4   : > { %v1657_v30 = vadd.f32 %v1656_v40, %v1599_v22 }
 0x1d5   : > { %v1716_v27 = vpop.f32.mrf.mxu1 }
 0x1d6   : > { %v4970_v57 = vadd.f32 %v1714_v34, %v1657_v30 }
 0x1d8   : > { %v1542_v13 = vpop.f32.mrf.mxu2 }
 0x1d9   : > { %v1543_v39 = vadd.f32 %v1542_v13, %v4729_v4  ;;  %v1600_v33 = vpop.f32.mrf.mxu3  ;;  %v5564_v13 = vld [vmem:[#allocation17_spill] sm:$0xff] }
 0x1da   : > { %v1601_v61 = vadd.f32 %v1600_v33, %v4893_v15  ;;  %v1661_v31 = vpop.f32.mrf.mxu0 }
 0x1db   : > { %v1994_v48 = vmax.f32 %v1543_v39, 0.0 }
 0x1dc   : > { %v1659_v20 = vadd.f32 %v1658_v45, %v1601_v61  ;;  %v5565_v61 = vld [vmem:[#allocation15_spill] sm:$0xff] }
 0x1dd   : > { %v1719_v50 = vpop.f32.mrf.mxu1  ;;  %1766 = vmatmul.bf16.gmra.mxu2 %v5560_v62  ;;  %1882 = vmatmul.bf16.gmra.mxu0 %v5561_v47  ;;  %v4982_v4 = vpack.c.bf16 %v1994_v48, %v1992_v10 }
 0x1de   : > { %v4984_v24 = vadd.f32 %v1716_v27, %v1659_v20  ;;  %1824 = vmatmul.bf16.gmra.mxu3 %v5562_v17 }
 0x1e0   : > { %3313 = vmatmul.msk.bf16.gmra.mxu1 %vm1137_vm0, %v4705_v1  ;;  %v1545_v37 = vpop.f32.mrf.mxu2 }
 0x1e1   : > { %v1546_v40 = vadd.f32 %v1545_v37, %v4735_v18  ;;  %v1603_v43 = vpop.f32.mrf.mxu3  ;;  %v5563_v18 = vld [vmem:[#allocation16_spill] sm:$0xff] }
 0x1e2   : > { %v1604_v54 = vadd.f32 %v1603_v43, %v4893_v15  ;;  %v1663_v52 = vpop.f32.mrf.mxu0 }
 0x1e3   : > { %v1996_v1 = vmax.f32 %v1546_v40, 0.0 }
 0x1e4   : > { %v1662_v34 = vadd.f32 %v1661_v31, %v1604_v54  ;;  %v3560_v31 = vld [vmem:[%s5474_s3 + $0x58] sm:$0xff] }
 0x1e5   : > { %v1721_v41 = vpop.f32.mrf.mxu1  ;;  %2232 = vmatpush.bf16.msra.mxu3 %v3560_v31 }
 0x1e6   : > { %v4991_v46 = vadd.f32 %v1719_v50, %v1662_v34 }
 0x1e8   : > { %v1547_v63 = vpop.f32.mrf.mxu2 }
 0x1e9   : > { %v1548_v7 = vadd.f32 %v1547_v63, %v4744_v6  ;;  %v1605_v0 = vpop.f32.mrf.mxu3  ;;  %v3552_v6 = vld [vmem:[%s5474_s3 + $0x18] sm:$0xff]  ;;  %v5567_v63 = vld [vmem:[#allocation20_spill] sm:$0xff] }
 0x1ea   : > { %v1606_v8 = vadd.f32 %v1605_v0, %v4893_v15  ;;  %v1666_v22 = vpop.f32.mrf.mxu0  ;;  %2174 = vmatpush.bf16.msra.mxu2 %v3552_v6 }
 0x1eb   : > { %v1998_v45 = vmax.f32 %v1548_v7, 0.0 }
 0x1ec   : > { %v1664_v30 = vadd.f32 %v1663_v52, %v1606_v8  ;;  %v5568_v8 = vld [vmem:[#allocation18_spill] sm:$0xff] }
 0x1ed   : > { %v1724_v27 = vpop.f32.mrf.mxu1  ;;  %1771 = vmatmul.bf16.gmra.mxu2 %v5563_v18  ;;  %1887 = vmatmul.bf16.gmra.mxu0 %v5564_v13  ;;  %v4997_v39 = vpack.c.bf16 %v1998_v45, %v1996_v1 }
 0x1ee   : > { %v4999_v33 = vadd.f32 %v1721_v41, %v1664_v30  ;;  %1829 = vmatmul.bf16.gmra.mxu3 %v5565_v61  ;;  %v3559_v61 = vld [vmem:[%s5474_s3 + $0x50] sm:$0xff] }
 0x1ef   : > { %2233 = vmatpush.bf16.msra.mxu3 %v3559_v61  ;;  %v5572_v61 = vld [vmem:[#allocation25_spill] sm:$0xff] }
 0x1f0   : > { %3314 = vmatmul.msk.bf16.gmra.mxu1 %vm1137_vm0, %v4738_v32  ;;  %v1550_v10 = vpop.f32.mrf.mxu2 }
 0x1f1   : > { %v1551_v48 = vadd.f32 %v1550_v10, %v4768_v55  ;;  %v1608_v11 = vpop.f32.mrf.mxu3  ;;  %v5566_v55 = vld [vmem:[#allocation19_spill] sm:$0xff] }
 0x1f2   : > { %v1609_v20 = vadd.f32 %v1608_v11, %v4893_v15  ;;  %v1668_v50 = vpop.f32.mrf.mxu0 }
 0x1f3   : > { %v2000_v54 = vmax.f32 %v1551_v48, 0.0 }
 0x1f4   : > { %v1667_v26 = vadd.f32 %v1666_v22, %v1609_v20 }
 0x1f5   : > { %v1726_v62 = vpop.f32.mrf.mxu1 }
 0x1f6   : > { %v5012_v47 = vadd.f32 %v1724_v27, %v1667_v26  ;;  %v3551_v27 = vld [vmem:[%s5474_s3 + $0x10] sm:$0xff] }
 0x1f7   : > { %2175 = vmatpush.bf16.msra.mxu2 %v3551_v27 }
 0x1f8   : > { %v1552_v17 = vpop.f32.mrf.mxu2 }
 0x1f9   : > { %v1553_v37 = vadd.f32 %v1552_v17, %v4777_v38  ;;  %v1610_v40 = vpop.f32.mrf.mxu3  ;;  %v5570_v17 = vld [vmem:[#allocation23_spill] sm:$0xff] }
 0x1fa   : > { %v1611_v43 = vadd.f32 %v1610_v40, %v4893_v15  ;;  %v1671_v32 = vpop.f32.mrf.mxu0 }
 0x1fb   : > { %v2002_v52 = vmax.f32 %v1553_v37, 0.0 }
 0x1fc   : > { %v1669_v34 = vadd.f32 %v1668_v50, %v1611_v43  ;;  %v5571_v43 = vld [vmem:[#allocation21_spill] sm:$0xff] }
 0x1fd   : > { %v1729_v41 = vpop.f32.mrf.mxu1  ;;  %1776 = vmatmul.bf16.gmra.mxu2 %v5566_v55  ;;  %1892 = vmatmul.bf16.gmra.mxu0 %v5567_v63  ;;  %v5018_v7 = vpack.c.bf16 %v2002_v52, %v2000_v54  ;;  %v3550_v63 = vld [vmem:[%s5474_s3 + $0x8] sm:$0xff] }
 0x1fe   : > { %v5020_v0 = vadd.f32 %v1726_v62, %v1669_v34  ;;  %1834 = vmatmul.bf16.gmra.mxu3 %v5568_v8  ;;  %v5569_v62 = vld [vmem:[#allocation22_spill] sm:$0xff]  ;;  %2176 = vmatpush.bf16.msra.mxu2 %v3550_v63  ;;  %v5576_v63 = vld [vmem:[#allocation29_spill] sm:$0xff] }
 0x200   : > { %3315 = vmatmul.msk.bf16.gmra.mxu1 %vm1137_vm0, %v4771_v5  ;;  %v1555_v38 = vpop.f32.mrf.mxu2 }
 0x201   : > { %v1556_v22 = vadd.f32 %v1555_v38, %v4801_v49  ;;  %v1613_v1 = vpop.f32.mrf.mxu3  ;;  %v3558_v38 = vld [vmem:[%s5474_s3 + $0x48] sm:$0xff] }
 0x202   : > { %v1614_v45 = vadd.f32 %v1613_v1, %v4893_v15  ;;  %v1673_v30 = vpop.f32.mrf.mxu0  ;;  %2234 = vmatpush.bf16.msra.mxu3 %v3558_v38 }
 0x203   : > { %v2004_v11 = vmax.f32 %v1556_v22, 0.0 }
 0x204   : > { %v1672_v18 = vadd.f32 %v1671_v32, %v1614_v45 }
 0x205   : > { %v1731_v13 = vpop.f32.mrf.mxu1 }
 0x206   : > { %v5033_v6 = vadd.f32 %v1729_v41, %v1672_v18 }
 0x208   : > { %v1557_v5 = vpop.f32.mrf.mxu2 }
 0x209   : > { %v1558_v49 = vadd.f32 %v1557_v5, %v4810_v16  ;;  %v1615_v31 = vpop.f32.mrf.mxu3  ;;  %v5573_v5 = vld [vmem:[#allocation26_spill] sm:$0xff] }
 0x20a   : > { %v1616_v10 = vadd.f32 %v1615_v31, %v4893_v15  ;;  %v1676_v48 = vpop.f32.mrf.mxu0 }
 0x20b   : > { %v2006_v20 = vmax.f32 %v1558_v49, 0.0 }
 0x20c   : > { %v1674_v50 = vadd.f32 %v1673_v30, %v1616_v10  ;;  %v5574_v10 = vld [vmem:[#allocation24_spill] sm:$0xff] }
 0x20d   : > { %v1734_v26 = vpop.f32.mrf.mxu1  ;;  %1781 = vmatmul.bf16.gmra.mxu2 %v5569_v62  ;;  %1897 = vmatmul.bf16.gmra.mxu0 %v5570_v17  ;;  %v5039_v37 = vpack.c.bf16 %v2006_v20, %v2004_v11 }
 0x20e   : > { %v5041_v40 = vadd.f32 %v1731_v13, %v1674_v50  ;;  %1839 = vmatmul.bf16.gmra.mxu3 %v5571_v43 }
 0x210   : > { %3316 = vmatmul.msk.bf16.gmra.mxu1 %vm1137_vm0, %v4804_v36  ;;  %v1560_v16 = vpop.f32.mrf.mxu2 }
 0x211   : > { %v1561_v32 = vadd.f32 %v1560_v16, %v4816_v25  ;;  %v1618_v54 = vpop.f32.mrf.mxu3 }
 0x212   : > { %v1619_v52 = vadd.f32 %v1618_v54, %v4893_v15  ;;  %v1678_v34 = vpop.f32.mrf.mxu0 }
 0x213   : > { %v2008_v30 = vmax.f32 %v1561_v32, 0.0 }
 0x214   : > { %v1677_v41 = vadd.f32 %v1676_v48, %v1619_v52 }
 0x215   : > { %v1736_v55 = vpop.f32.mrf.mxu1 }
 0x216   : > { %v5051_v8 = vadd.f32 %v1734_v26, %v1677_v41 }
 0x218   : > { %v1562_v36 = vpop.f32.mrf.mxu2 }
 0x219   : > { %v1563_v25 = vadd.f32 %v1562_v36, %v4843_v19  ;;  %v1620_v22 = vpop.f32.mrf.mxu3 }
 0x21a   : > { %v1621_v1 = vadd.f32 %v1620_v22, %v4893_v15  ;;  %v1681_v45 = vpop.f32.mrf.mxu0 }
 0x21b   : > { %v2010_v27 = vmax.f32 %v1563_v25, 0.0 }
 0x21c   : > { %v1679_v18 = vadd.f32 %v1678_v34, %v1621_v1  ;;  %v3557_v34 = vld [vmem:[%s5474_s3 + $0x40] sm:$0xff] }
 0x21d   : > { %v1739_v13 = vpop.f32.mrf.mxu1  ;;  %1786 = vmatmul.bf16.gmra.mxu2 %v5572_v61  ;;  %1902 = vmatmul.bf16.gmra.mxu0 %v5573_v5  ;;  %v5060_v49 = vpack.c.bf16 %v2010_v27, %v2008_v30  ;;  %v3572_v30 = vld [vmem:[%s5476_s5 + $0x38] sm:$0xff] }
 0x21e   : > { %v5062_v31 = vadd.f32 %v1736_v55, %v1679_v18  ;;  %1844 = vmatmul.bf16.gmra.mxu3 %v5574_v10  ;;  %v5575_v55 = vld [vmem:[#allocation28_spill] sm:$0xff]  ;;  %2383 = vmatpush.bf16.msra.mxu0 %v3572_v30 }
 0x21f   : > { %2235 = vmatpush.bf16.msra.mxu3 %v3557_v34 }
 0x220   : > { %3317 = vmatmul.msk.bf16.gmra.mxu1 %vm1137_vm0, %v4837_v14  ;;  %v1565_v19 = vpop.f32.mrf.mxu2 }
 0x221   : > { %v1566_v48 = vadd.f32 %v1565_v19, %v4849_v60  ;;  %v1623_v11 = vpop.f32.mrf.mxu3  ;;  %v3549_v60 = vld [vmem:[%s5474_s3] sm:$0xff]  ;;  %v5578_v19 = vld [vmem:[#allocation33_spill] sm:$0xff] }
 0x222   : > { %v1624_v20 = vadd.f32 %v1623_v11, %v4893_v15  ;;  %v5069_v50 = vpop.f32.mrf.mxu0  ;;  %2177 = vmatpush.bf16.msra.mxu2 %v3549_v60 }
 0x223   : > { %v2012_v14 = vmax.f32 %v1566_v48, 0.0  ;;  %v5580_v48 = vld [vmem:[#allocation32_spill] sm:$0xff] }
 0x224   : > { %v1682_v26 = vadd.f32 %v1681_v45, %v1624_v20 }
 0x225   : > { %v5071_v62 = vpop.f32.mrf.mxu1 }
 0x226   : > { %v5073_v17 = vadd.f32 %v1739_v13, %v1682_v26 }
 0x228   : > { %v1567_v43 = vpop.f32.mrf.mxu2 }
 0x229   : > { %v1568_v16 = vadd.f32 %v1567_v43, %v4876_v35  ;;  %v5076_v32 = vpop.f32.mrf.mxu3  ;;  %v5577_v35 = vld [vmem:[#allocation27_spill] sm:$0xff] }
 0x22a   : > { %v1686_v54 = vpop.f32.mrf.mxu0 }
 0x22b   : > { %v2014_v52 = vmax.f32 %v1568_v16, 0.0 }
 0x22d   : > { %v1744_v41 = vpop.f32.mrf.mxu1  ;;  %1791 = vmatmul.bf16.gmra.mxu2 %v5575_v55  ;;  %1907 = vmatmul.bf16.gmra.mxu0 %v5576_v63  ;;  %v5086_v38 = vpack.c.bf16 %v2014_v52, %v2012_v14  ;;  %v3571_v14 = vld [vmem:[%s5476_s5 + $0x30] sm:$0xff] }
 0x22e   : > { %1849 = vmatmul.bf16.gmra.mxu3 %v5577_v35  ;;  %2384 = vmatpush.bf16.msra.mxu0 %v3571_v14 }
 0x230   : > { %3318 = vmatmul.msk.bf16.gmra.mxu1 %vm1137_vm0, %v4852_v51  ;;  %v1570_v36 = vpop.f32.mrf.mxu2 }
 0x231   : > { %v5092_v25 = vadd.f32 %v1570_v36, %v4882_v53  ;;  %v1628_v22 = vpop.f32.mrf.mxu3  ;;  %v5579_v53 = vld [vmem:[#allocation34_spill] sm:$0xff] }
 0x232   : > { %v1629_v1 = vadd.f32 %v1628_v22, %v4893_v15  ;;  %v1688_v45 = vpop.f32.mrf.mxu0 }
 0x234   : > { %v1687_v27 = vadd.f32 %v1686_v54, %v1629_v1 }
 0x235   : > { %v1746_v18 = vpop.f32.mrf.mxu1 }
 0x236   : > { %v5098_v13 = vadd.f32 %v1744_v41, %v1687_v27 }
 0x238   : > { %v1572_v61 = vpop.f32.mrf.mxu2 }
 0x239   : > { %v1630_v51 = vpop.f32.mrf.mxu3 }
 0x23a   : > { %v1873_v5 = vpop.f32.mrf.mxu0 }
 0x23d   : > { %v1931_v10 = vpop.f32.mrf.mxu1  ;;  %1796 = vmatmul.bf16.gmra.mxu2 %v5578_v19  ;;  %1912 = vmatmul.bf16.gmra.mxu0 %v5579_v53 }
 0x23e   : > { %1854 = vmatmul.bf16.gmra.mxu3 %v5580_v48 }
 0x240   : > { %3319 = vmatmul.msk.bf16.gmra.mxu1 %vm1137_vm0, %v4884_v21  ;;  %v1757_v11 = vpop.f32.mrf.mxu2 }
 0x241   : > { %v1758_v20 = vadd.f32 %v1757_v11, %v4910_v28  ;;  %v1815_v26 = vpop.f32.mrf.mxu3  ;;  %v5581_v28 = vld [vmem:[#allocation35_spill] sm:$0xff] }
 0x242   : > { %v1875_v43 = vpop.f32.mrf.mxu0 }
 0x243   : > { %v1816_v54 = vadd.f32 %v1815_v26, %v1758_v20 }
 0x245   : > { %v1933_v16 = vpop.f32.mrf.mxu1  ;;  %v1874_v60 = vadd.f32 %v1873_v5, %v1816_v54 }
 0x247   : > { %v1932_v35 = vadd.f32 %v1931_v10, %v1874_v60 }
 0x248   : > { %v1759_v52 = vpop.f32.mrf.mxu2 }
 0x249   : > { %v1760_v34 = vadd.f32 %v1759_v52, %v4922_v44  ;;  %v1817_v41 = vpop.f32.mrf.mxu3  ;;  %v1981_v45 = vmax.f32 %v1932_v35, 0.0 }
 0x24a   : > { %v1878_v55 = vpop.f32.mrf.mxu0 }
 0x24b   : > { %v1818_v63 = vadd.f32 %v1817_v41, %v1760_v34 }
 0x24d   : > { %v1936_v21 = vpop.f32.mrf.mxu1  ;;  %v1876_v36 = vadd.f32 %v1875_v43, %v1818_v63  ;;  %1801 = vmatmul.bf16.gmra.mxu2 %v4617_v42  ;;  %1917 = vmatmul.bf16.gmra.mxu0 %v4619_v23 }
 0x24e   : > { %1859 = vmatmul.bf16.gmra.mxu3 %v5581_v28 }
 0x24f   : > { %v1934_v22 = vadd.f32 %v1933_v16, %v1876_v36 }
 0x250   : > { %3320 = vmatmul.msk.bf16.gmra.mxu1 %vm1137_vm0, %v4914_v58  ;;  %v1762_v1 = vpop.f32.mrf.mxu2  ;;  %v3570_v58 = vld [vmem:[%s5476_s5 + $0x28] sm:$0xff] }
 0x251   : > { %v1983_v30 = vmax.f32 %v1934_v22, 0.0  ;;  %v1763_v44 = vadd.f32 %v1762_v1, %v4934_v59  ;;  %v1820_v27 = vpop.f32.mrf.mxu3  ;;  %2385 = vmatpush.bf16.msra.mxu0 %v3570_v58 }
 0x252   : > { %v1880_v18 = vpop.f32.mrf.mxu0 }
 0x253   : > { %v2019_v61 = vpack.c.bf16 %v1983_v30, %v1981_v45  ;;  %v1821_v5 = vadd.f32 %v1820_v27, %v1763_v44 }
 0x255   : > { %v1938_v51 = vpop.f32.mrf.mxu1  ;;  %v1879_v42 = vadd.f32 %v1878_v55, %v1821_v5 }
 0x257   : > { %v1937_v20 = vadd.f32 %v1936_v21, %v1879_v42 }
 0x258   : > { %v1764_v10 = vpop.f32.mrf.mxu2 }
 0x259   : > { %v1765_v23 = vadd.f32 %v1764_v10, %v4942_v12  ;;  %v1822_v19 = vpop.f32.mrf.mxu3  ;;  %v1985_v16 = vmax.f32 %v1937_v20, 0.0 }
 0x25a   : > { %v1883_v53 = vpop.f32.mrf.mxu0 }
 0x25b   : > { %v1823_v48 = vadd.f32 %v1822_v19, %v1765_v23 }
 0x25d   : > { %v1941_v11 = vpop.f32.mrf.mxu1  ;;  %v1881_v26 = vadd.f32 %v1880_v18, %v1823_v48  ;;  %2178 = vmatmul.bf16.vlgmr.msra.gmra.mxu2 %v4917_v9 }
 0x25e   : > { %2236 = vmatmul.bf16.vlgmr.msra.gmra.mxu3 %v2019_v61 }
 0x25f   : > { %v1939_v59 = vadd.f32 %v1938_v51, %v1881_v26 }
 0x260   : > { %v1767_v43 = vpop.f32.mrf.mxu2 }
 0x261   : > { %v1987_v54 = vmax.f32 %v1939_v59, 0.0  ;;  %v1768_v12 = vadd.f32 %v1767_v43, %v4949_v29  ;;  %v1825_v14 = vpop.f32.mrf.mxu3  ;;  %v3569_v29 = vld [vmem:[%s5476_s5 + $0x20] sm:$0xff] }
 0x262   : > { %v1885_v52 = vpop.f32.mrf.mxu0  ;;  %2386 = vmatpush.bf16.msra.mxu0 %v3569_v29 }
 0x263   : > { %v2021_v60 = vpack.c.bf16 %v1987_v54, %v1985_v16  ;;  %v1826_v41 = vadd.f32 %v1825_v14, %v1768_v12 }
 0x265   : > { %v1943_v34 = vpop.f32.mrf.mxu1  ;;  %v1884_v63 = vadd.f32 %v1883_v53, %v1826_v41 }
 0x267   : > { %v1942_v22 = vadd.f32 %v1941_v11, %v1884_v63 }
 0x268   : > { %v1769_v55 = vpop.f32.mrf.mxu2 }
 0x269   : > { %v1770_v21 = vadd.f32 %v1769_v55, %v4963_v3  ;;  %v1827_v35 = vpop.f32.mrf.mxu3  ;;  %v1989_v44 = vmax.f32 %v1942_v22, 0.0 }
 0x26a   : > { %v1888_v36 = vpop.f32.mrf.mxu0 }
 0x26b   : > { %v1828_v9 = vadd.f32 %v1827_v35, %v1770_v21 }
 0x26d   : > { %v1946_v28 = vpop.f32.mrf.mxu1  ;;  %v1886_v1 = vadd.f32 %v1885_v52, %v1828_v9  ;;  %2183 = vmatmul.bf16.gmra.mxu2 %v4940_v2 }
 0x26e   : > { %2241 = vmatmul.bf16.gmra.mxu3 %v2021_v60 }
 0x26f   : > { %v1944_v45 = vadd.f32 %v1943_v34, %v1886_v1 }
 0x270   : > { %v1772_v30 = vpop.f32.mrf.mxu2 }
 0x271   : > { %v1991_v27 = vmax.f32 %v1944_v45, 0.0  ;;  %v1773_v3 = vadd.f32 %v1772_v30, %v4970_v57  ;;  %v1830_v18 = vpop.f32.mrf.mxu3 }
 0x272   : > { %v1890_v61 = vpop.f32.mrf.mxu0 }
 0x273   : > { %v2023_v51 = vpack.c.bf16 %v1991_v27, %v1989_v44  ;;  %v1831_v10 = vadd.f32 %v1830_v18, %v1773_v3  ;;  %v3567_v3 = vld [vmem:[%s5476_s5 + $0x10] sm:$0xff] }
 0x275   : > { %v1948_v5 = vpop.f32.mrf.mxu1  ;;  %v1889_v23 = vadd.f32 %v1888_v36, %v1831_v10 }
 0x277   : > { %v1947_v11 = vadd.f32 %v1946_v28, %v1889_v23 }
 0x278   : > { %v1774_v42 = vpop.f32.mrf.mxu2 }
 0x279   : > { %v1775_v2 = vadd.f32 %v1774_v42, %v4984_v24  ;;  %v1832_v19 = vpop.f32.mrf.mxu3  ;;  %v1993_v59 = vmax.f32 %v1947_v11, 0.0  ;;  %v3568_v24 = vld [vmem:[%s5476_s5 + $0x18] sm:$0xff] }
 0x27a   : > { %v1893_v53 = vpop.f32.mrf.mxu0  ;;  %2387 = vmatpush.bf16.msra.mxu0 %v3568_v24 }
 0x27b   : > { %v1833_v48 = vadd.f32 %v1832_v19, %v1775_v2 }
 0x27d   : > { %v1951_v58 = vpop.f32.mrf.mxu1  ;;  %v1891_v20 = vadd.f32 %v1890_v61, %v1833_v48  ;;  %2188 = vmatmul.bf16.gmra.mxu2 %v4961_v56 }
 0x27e   : > { %2246 = vmatmul.bf16.gmra.mxu3 %v2023_v51  ;;  %2388 = vmatpush.bf16.msra.mxu0 %v3567_v3 }
 0x27f   : > { %v1949_v26 = vadd.f32 %v1948_v5, %v1891_v20 }
 0x280   : > { %v1777_v57 = vpop.f32.mrf.mxu2 }
 0x281   : > { %v1995_v43 = vmax.f32 %v1949_v26, 0.0  ;;  %v1778_v16 = vadd.f32 %v1777_v57, %v4991_v46  ;;  %v1835_v54 = vpop.f32.mrf.mxu3 }
 0x282   : > { %v1895_v12 = vpop.f32.mrf.mxu0 }
 0x283   : > { %v2025_v14 = vpack.c.bf16 %v1995_v43, %v1993_v59  ;;  %v1836_v60 = vadd.f32 %v1835_v54, %v1778_v16 }
 0x285   : > { %v1953_v52 = vpop.f32.mrf.mxu1  ;;  %v1894_v41 = vadd.f32 %v1893_v53, %v1836_v60 }
 0x287   : > { %v1952_v36 = vadd.f32 %v1951_v58, %v1894_v41 }
 0x288   : > { %v1779_v34 = vpop.f32.mrf.mxu2 }
 0x289   : > { %v1780_v56 = vadd.f32 %v1779_v34, %v4999_v33  ;;  %v1837_v55 = vpop.f32.mrf.mxu3  ;;  %v1997_v22 = vmax.f32 %v1952_v36, 0.0 }
 0x28a   : > { %v1898_v63 = vpop.f32.mrf.mxu0 }
 0x28b   : > { %v1838_v21 = vadd.f32 %v1837_v55, %v1780_v56 }
 0x28d   : > { %v1956_v35 = vpop.f32.mrf.mxu1  ;;  %v1896_v46 = vadd.f32 %v1895_v12, %v1838_v21  ;;  %2193 = vmatmul.bf16.gmra.mxu2 %v4982_v4 }
 0x28e   : > { %2251 = vmatmul.bf16.gmra.mxu3 %v2025_v14 }
 0x28f   : > { %v1954_v9 = vadd.f32 %v1953_v52, %v1896_v46 }
 0x290   : > { %v1782_v28 = vpop.f32.mrf.mxu2 }
 0x291   : > { %v1999_v1 = vmax.f32 %v1954_v9, 0.0  ;;  %v1783_v29 = vadd.f32 %v1782_v28, %v5012_v47  ;;  %v1840_v45 = vpop.f32.mrf.mxu3 }
 0x292   : > { %v1900_v30 = vpop.f32.mrf.mxu0 }
 0x293   : > { %v2027_v44 = vpack.c.bf16 %v1999_v1, %v1997_v22  ;;  %v1841_v33 = vadd.f32 %v1840_v45, %v1783_v29 }
 0x295   : > { %v1958_v27 = vpop.f32.mrf.mxu1  ;;  %v1899_v61 = vadd.f32 %v1898_v63, %v1841_v33 }
 0x297   : > { %v1957_v23 = vadd.f32 %v1956_v35, %v1899_v61 }
 0x298   : > { %v1784_v18 = vpop.f32.mrf.mxu2 }
 0x299   : > { %v1785_v4 = vadd.f32 %v1784_v18, %v5020_v0  ;;  %v1842_v51 = vpop.f32.mrf.mxu3  ;;  %v2001_v53 = vmax.f32 %v1957_v23, 0.0 }
 0x29a   : > { %v1903_v5 = vpop.f32.mrf.mxu0 }
 0x29b   : > { %v1843_v10 = vadd.f32 %v1842_v51, %v1785_v4 }
 0x29d   : > { %v1961_v42 = vpop.f32.mrf.mxu1  ;;  %v1901_v47 = vadd.f32 %v1900_v30, %v1843_v10  ;;  %2198 = vmatmul.bf16.gmra.mxu2 %v4997_v39  ;;  %v3566_v39 = vld [vmem:[%s5476_s5 + $0x8] sm:$0xff] }
 0x29e   : > { %2256 = vmatmul.bf16.gmra.mxu3 %v2027_v44  ;;  %2389 = vmatpush.bf16.msra.mxu0 %v3566_v39  ;;  %v3580_v44 = vld [vmem:[%s5478_s7 + $0x38] sm:$0xff] }
 0x29f   : > { %v1959_v2 = vadd.f32 %v1958_v27, %v1901_v47  ;;  %2538 = vmatpush.bf16.msra.mxu1 %v3580_v44 }
 0x2a0   : > { %v1787_v19 = vpop.f32.mrf.mxu2 }
 0x2a1   : > { %v2003_v48 = vmax.f32 %v1959_v2, 0.0  ;;  %v1788_v58 = vadd.f32 %v1787_v19, %v5033_v6  ;;  %v1845_v11 = vpop.f32.mrf.mxu3 }
 0x2a2   : > { %v1905_v20 = vpop.f32.mrf.mxu0 }
 0x2a3   : > { %v2029_v26 = vpack.c.bf16 %v2003_v48, %v2001_v53  ;;  %v1846_v0 = vadd.f32 %v1845_v11, %v1788_v58 }
 0x2a5   : > { %v1963_v57 = vpop.f32.mrf.mxu1  ;;  %v1904_v43 = vadd.f32 %v1903_v5, %v1846_v0 }
 0x2a7   : > { %v1962_v52 = vadd.f32 %v1961_v42, %v1904_v43  ;;  %v3579_v43 = vld [vmem:[%s5478_s7 + $0x30] sm:$0xff] }
 0x2a8   : > { %v1789_v59 = vpop.f32.mrf.mxu2  ;;  %2539 = vmatpush.bf16.msra.mxu1 %v3579_v43 }
 0x2a9   : > { %v1790_v16 = vadd.f32 %v1789_v59, %v5041_v40  ;;  %v1847_v54 = vpop.f32.mrf.mxu3  ;;  %v2005_v41 = vmax.f32 %v1962_v52, 0.0 }
 0x2aa   : > { %v1908_v12 = vpop.f32.mrf.mxu0 }
 0x2ab   : > { %v1848_v14 = vadd.f32 %v1847_v54, %v1790_v16 }
 0x2ad   : > { %v1966_v24 = vpop.f32.mrf.mxu1  ;;  %v1906_v60 = vadd.f32 %v1905_v20, %v1848_v14  ;;  %2203 = vmatmul.bf16.gmra.mxu2 %v5018_v7 }
 0x2ae   : > { %2261 = vmatmul.bf16.gmra.mxu3 %v2029_v26 }
 0x2af   : > { %v1964_v6 = vadd.f32 %v1963_v57, %v1906_v60 }
 0x2b0   : > { %v1792_v34 = vpop.f32.mrf.mxu2 }
 0x2b1   : > { %v2007_v56 = vmax.f32 %v1964_v6, 0.0  ;;  %v1793_v40 = vadd.f32 %v1792_v34, %v5051_v8  ;;  %v1850_v55 = vpop.f32.mrf.mxu3  ;;  %v3565_v8 = vld [vmem:[%s5476_s5] sm:$0xff]  ;;  %v2016_v34 = vmax.f32 %v5092_v25, 0.0 }
 0x2b2   : > { %v1910_v63 = vpop.f32.mrf.mxu0  ;;  %2390 = vmatpush.bf16.msra.mxu0 %v3565_v8 }
 0x2b3   : > { %v2031_v21 = vpack.c.bf16 %v2007_v56, %v2005_v41  ;;  %v1851_v36 = vadd.f32 %v1850_v55, %v1793_v40 }
 0x2b5   : > { %v1968_v35 = vpop.f32.mrf.mxu1  ;;  %v1909_v9 = vadd.f32 %v1908_v12, %v1851_v36 }
 0x2b7   : > { %v1967_v45 = vadd.f32 %v1966_v24, %v1909_v9  ;;  %v5171_v24 = vld [vmem:[%s5475_s4] ss:$0 sm:$0xff] }
 0x2b8   : > { %v1794_v46 = vpop.f32.mrf.mxu2 }
 0x2b9   : > { %v1795_v28 = vadd.f32 %v1794_v46, %v5062_v31  ;;  %v1852_v22 = vpop.f32.mrf.mxu3  ;;  %v1626_v31 = vadd.f32 %v5076_v32, %v4893_v15  ;;  %v2009_v3 = vmax.f32 %v1967_v45, 0.0 }
 0x2ba   : > { %v1913_v1 = vpop.f32.mrf.mxu0 }
 0x2bb   : > { %v1853_v7 = vadd.f32 %v1852_v22, %v1795_v28  ;;  %v1684_v51 = vadd.f32 %v5069_v50, %v1626_v31 }
 0x2bd   : > { %v1971_v29 = vpop.f32.mrf.mxu1  ;;  %v1911_v30 = vadd.f32 %v1910_v63, %v1853_v7  ;;  %2208 = vmatmul.bf16.gmra.mxu2 %v5039_v37  ;;  %v1742_v23 = vadd.f32 %v5071_v62, %v1684_v51  ;;  %v2036_v63 = vpack.c.bf16 %v2016_v34, %v2016_v34 }
 0x2be   : > { %2266 = vmatmul.bf16.gmra.mxu3 %v2031_v21 }
 0x2bf   : > { %v1969_v27 = vadd.f32 %v1968_v35, %v1911_v30 }
 0x2c0   : > { %v1797_v33 = vpop.f32.mrf.mxu2 }
 0x2c1   : > { %v2011_v18 = vmax.f32 %v1969_v27, 0.0  ;;  %v1798_v37 = vadd.f32 %v1797_v33, %v5073_v17  ;;  %v1855_v61 = vpop.f32.mrf.mxu3  ;;  %v3577_v27 = vld [vmem:[%s5478_s7 + $0x20] sm:$0xff] }
 0x2c2   : > { %v1915_v4 = vpop.f32.mrf.mxu0 }
 0x2c3   : > { %v2033_v5 = vpack.c.bf16 %v2011_v18, %v2009_v3  ;;  %v1856_v42 = vadd.f32 %v1855_v61, %v1798_v37 }
 0x2c5   : > { %v1973_v10 = vpop.f32.mrf.mxu1  ;;  %v1914_v2 = vadd.f32 %v1913_v1, %v1856_v42 }
 0x2c7   : > { %v1972_v58 = vadd.f32 %v1971_v29, %v1914_v2 }
 0x2c8   : > { %v1799_v47 = vpop.f32.mrf.mxu2 }
 0x2c9   : > { %v1800_v15 = vadd.f32 %v1799_v47, %v1742_v23  ;;  %v1857_v32 = vpop.f32.mrf.mxu3  ;;  %v2013_v50 = vmax.f32 %v1972_v58, 0.0  ;;  %v3576_v47 = vld [vmem:[%s5478_s7 + $0x18] sm:$0xff] }
 0x2ca   : > { %v1918_v19 = vpop.f32.mrf.mxu0 }
 0x2cb   : > { %v1858_v53 = vadd.f32 %v1857_v32, %v1800_v15 }
 0x2cd   : > { %v1976_v48 = vpop.f32.mrf.mxu1  ;;  %v1916_v11 = vadd.f32 %v1915_v4, %v1858_v53  ;;  %2213 = vmatmul.bf16.gmra.mxu2 %v5060_v49 }
 0x2ce   : > { %2271 = vmatmul.bf16.gmra.mxu3 %v2033_v5 }
 0x2cf   : > { %v1974_v17 = vadd.f32 %v1973_v10, %v1916_v11 }
 0x2d0   : > { %v1802_v20 = vpop.f32.mrf.mxu2 }
 0x2d1   : > { %v2015_v26 = vmax.f32 %v1974_v17, 0.0  ;;  %v1860_v57 = vpop.f32.mrf.mxu3  ;;  %v1803_v16 = vadd.f32 %v1802_v20, %v5098_v13  ;;  %v3578_v13 = vld [vmem:[%s5478_s7 + $0x28] sm:$0xff] }
 0x2d2   : > { %v1920_v0 = vpop.f32.mrf.mxu0  ;;  %2540 = vmatpush.bf16.msra.mxu1 %v3578_v13  ;;  %v3574_v13 = vld [vmem:[%s5478_s7 + $0x8] sm:$0xff] }
 0x2d3   : > { %v2035_v59 = vpack.c.bf16 %v2015_v26, %v2013_v50  ;;  %v1861_v14 = vadd.f32 %v1860_v57, %v1803_v16 }
 0x2d5   : > { %v1978_v62 = vpop.f32.mrf.mxu1  ;;  %v1919_v49 = vadd.f32 %v1918_v19, %v1861_v14 }
 0x2d6   : > { %2541 = vmatpush.bf16.msra.mxu1 %v3577_v27 }
 0x2d7   : > { %v1977_v60 = vadd.f32 %v1976_v48, %v1919_v49 }
 0x2d8   : > { %v1804_v54 = vpop.f32.mrf.mxu2 }
 0x2d9   : > { %v1862_v12 = vpop.f32.mrf.mxu3 }
 0x2da   : > { %2542 = vmatpush.bf16.msra.mxu1 %v3576_v47 }
 0x2dd   : > { %2218 = vmatmul.bf16.gmra.mxu2 %v5086_v38  ;;  %v2017_v38 = vmax.f32 %v1977_v60, 0.0 }
 0x2de   : > { %2276 = vmatmul.bf16.gmra.mxu3 %v2035_v59  ;;  %v3575_v59 = vld [vmem:[%s5478_s7 + $0x10] sm:$0xff] }
 0x2df   : > { %v2037_v35 = vpack.c.bf16 %v2017_v38, %v2017_v38  ;;  %2543 = vmatpush.bf16.msra.mxu1 %v3575_v59 }
 0x2e0   : > { %v2179_v39 = vpop.f32.mrf.mxu2 }
 0x2e1   : > { %v2237_v52 = vpop.f32.mrf.mxu3  ;;  %v2180_v6 = vadd.f32 %v5171_v24, %v2179_v39 }
 0x2e3   : > { %v2238_v56 = vadd.f32 %v2237_v52, %v2180_v6  ;;  %2544 = vmatpush.bf16.msra.mxu1 %v3574_v13 }
 0x2e5   : > { %v2286_v36 = vmax.f32 %v2238_v56, 0.0 }
 0x2e8   : > { %v2181_v41 = vpop.f32.mrf.mxu2 }
 0x2e9   : > { %v2182_v40 = vadd.f32 %v5171_v24, %v2181_v41  ;;  %v2239_v55 = vpop.f32.mrf.mxu3 }
 0x2eb   : > { %v2240_v21 = vadd.f32 %v2239_v55, %v2182_v40 }
 0x2ed   : > { %v2287_v46 = vmax.f32 %v2240_v21, 0.0  ;;  %2223 = vmatmul.bf16.gmra.mxu2 %v2036_v63 }
 0x2ee   : > { %2281 = vmatmul.bf16.gmra.mxu3 %v2037_v35 }
 0x2ef   : > { %v2305_v9 = vpack.c.bf16 %v2287_v46, %v2286_v36 }
 0x2f0   : > { %v2184_v28 = vpop.f32.mrf.mxu2 }
 0x2f1   : > { %v2242_v22 = vpop.f32.mrf.mxu3  ;;  %2391 = vmatmul.bf16.vlgmr.msra.gmra.mxu0 %v2305_v9  ;;  %v2185_v25 = vadd.f32 %v5171_v24, %v2184_v28 }
 0x2f3   : > { %v2243_v7 = vadd.f32 %v2242_v22, %v2185_v25 }
 0x2f5   : > { %v2288_v8 = vmax.f32 %v2243_v7, 0.0 }
 0x2f8   : > { %v2186_v1 = vpop.f32.mrf.mxu2 }
 0x2f9   : > { %v2187_v29 = vadd.f32 %v5171_v24, %v2186_v1  ;;  %v2244_v45 = vpop.f32.mrf.mxu3 }
 0x2fb   : > { %v2245_v30 = vadd.f32 %v2244_v45, %v2187_v29 }
 0x2fd   : > { %v2289_v44 = vmax.f32 %v2245_v30, 0.0  ;;  %v3573_v30 = vld [vmem:[%s5478_s7] sm:$0xff] }
 0x2fe   : > { %2545 = vmatpush.bf16.msra.mxu1 %v3573_v30 }
 0x2ff   : > { %v2306_v31 = vpack.c.bf16 %v2289_v44, %v2288_v8 }
 0x300   : > { %v2189_v33 = vpop.f32.mrf.mxu2 }
 0x301   : > { %v2247_v3 = vpop.f32.mrf.mxu3  ;;  %2396 = vmatmul.bf16.gmra.mxu0 %v2306_v31  ;;  %v2190_v18 = vadd.f32 %v5171_v24, %v2189_v33 }
 0x303   : > { %v2248_v61 = vadd.f32 %v2247_v3, %v2190_v18 }
 0x305   : > { %v2290_v10 = vmax.f32 %v2248_v61, 0.0 }
 0x308   : > { %v2191_v37 = vpop.f32.mrf.mxu2 }
 0x309   : > { %v2192_v4 = vadd.f32 %v5171_v24, %v2191_v37  ;;  %v2249_v51 = vpop.f32.mrf.mxu3 }
 0x30b   : > { %v2250_v5 = vadd.f32 %v2249_v51, %v2192_v4 }
 0x30d   : > { %v2291_v42 = vmax.f32 %v2250_v5, 0.0 }
 0x30f   : > { %v2307_v23 = vpack.c.bf16 %v2291_v42, %v2290_v10 }
 0x310   : > { %v2194_v2 = vpop.f32.mrf.mxu2 }
 0x311   : > { %v2252_v15 = vpop.f32.mrf.mxu3  ;;  %2401 = vmatmul.bf16.gmra.mxu0 %v2307_v23  ;;  %v2195_v32 = vadd.f32 %v5171_v24, %v2194_v2 }
 0x313   : > { %v2253_v53 = vadd.f32 %v2252_v15, %v2195_v32 }
 0x315   : > { %v2292_v17 = vmax.f32 %v2253_v53, 0.0 }
 0x318   : > { %v2196_v19 = vpop.f32.mrf.mxu2 }
 0x319   : > { %v2197_v48 = vadd.f32 %v5171_v24, %v2196_v19  ;;  %v2254_v58 = vpop.f32.mrf.mxu3 }
 0x31b   : > { %v2255_v11 = vadd.f32 %v2254_v58, %v2197_v48 }
 0x31d   : > { %v2293_v20 = vmax.f32 %v2255_v11, 0.0 }
 0x31f   : > { %v2308_v50 = vpack.c.bf16 %v2293_v20, %v2292_v17  ;;  %v5213_v17 = vld [vmem:[%s5477_s6] ss:$0 sm:$0xff] }
 0x320   : > { %v2199_v26 = vpop.f32.mrf.mxu2 }
 0x321   : > { %v2257_v57 = vpop.f32.mrf.mxu3  ;;  %2406 = vmatmul.bf16.gmra.mxu0 %v2308_v50  ;;  %v2200_v0 = vadd.f32 %v5171_v24, %v2199_v26 }
 0x323   : > { %v2258_v43 = vadd.f32 %v2257_v57, %v2200_v0 }
 0x325   : > { %v2294_v14 = vmax.f32 %v2258_v43, 0.0 }
 0x328   : > { %v2201_v62 = vpop.f32.mrf.mxu2 }
 0x329   : > { %v2202_v16 = vadd.f32 %v5171_v24, %v2201_v62  ;;  %v2259_v54 = vpop.f32.mrf.mxu3 }
 0x32b   : > { %v2260_v12 = vadd.f32 %v2259_v54, %v2202_v16 }
 0x32d   : > { %v2295_v49 = vmax.f32 %v2260_v12, 0.0 }
 0x32f   : > { %v2309_v39 = vpack.c.bf16 %v2295_v49, %v2294_v14 }
 0x330   : > { %v2204_v52 = vpop.f32.mrf.mxu2 }
 0x331   : > { %v2262_v60 = vpop.f32.mrf.mxu3  ;;  %2411 = vmatmul.bf16.gmra.mxu0 %v2309_v39  ;;  %v2205_v6 = vadd.f32 %v5171_v24, %v2204_v52 }
 0x333   : > { %v2263_v38 = vadd.f32 %v2262_v60, %v2205_v6 }
 0x335   : > { %v2296_v55 = vmax.f32 %v2263_v38, 0.0 }
 0x338   : > { %v2206_v34 = vpop.f32.mrf.mxu2 }
 0x339   : > { %v2207_v41 = vadd.f32 %v5171_v24, %v2206_v34  ;;  %v2264_v56 = vpop.f32.mrf.mxu3 }
 0x33b   : > { %v2265_v40 = vadd.f32 %v2264_v56, %v2207_v41 }
 0x33d   : > { %v2297_v63 = vmax.f32 %v2265_v40, 0.0 }
 0x33f   : > { %v2310_v21 = vpack.c.bf16 %v2297_v63, %v2296_v55 }
 0x340   : > { %v2209_v35 = vpop.f32.mrf.mxu2 }
 0x341   : > { %v2267_v36 = vpop.f32.mrf.mxu3  ;;  %2416 = vmatmul.bf16.gmra.mxu0 %v2310_v21  ;;  %v2210_v46 = vadd.f32 %v5171_v24, %v2209_v35 }
 0x343   : > { %v2268_v28 = vadd.f32 %v2267_v36, %v2210_v46 }
 0x345   : > { %v2298_v7 = vmax.f32 %v2268_v28, 0.0 }
 0x348   : > { %v2211_v9 = vpop.f32.mrf.mxu2 }
 0x349   : > { %v2212_v22 = vadd.f32 %v5171_v24, %v2211_v9  ;;  %v2269_v25 = vpop.f32.mrf.mxu3 }
 0x34b   : > { %v2270_v1 = vadd.f32 %v2269_v25, %v2212_v22 }
 0x34d   : > { %v2299_v29 = vmax.f32 %v2270_v1, 0.0 }
 0x34f   : > { %v2311_v45 = vpack.c.bf16 %v2299_v29, %v2298_v7 }
 0x350   : > { %v2214_v8 = vpop.f32.mrf.mxu2 }
 0x351   : > { %v2272_v44 = vpop.f32.mrf.mxu3  ;;  %2421 = vmatmul.bf16.gmra.mxu0 %v2311_v45  ;;  %v2215_v31 = vadd.f32 %v5171_v24, %v2214_v8 }
 0x353   : > { %v2273_v33 = vadd.f32 %v2272_v44, %v2215_v31 }
 0x355   : > { %v2300_v61 = vmax.f32 %v2273_v33, 0.0 }
 0x358   : > { %v2216_v27 = vpop.f32.mrf.mxu2 }
 0x359   : > { %v2217_v3 = vadd.f32 %v5171_v24, %v2216_v27  ;;  %v2274_v18 = vpop.f32.mrf.mxu3 }
 0x35b   : > { %v2275_v37 = vadd.f32 %v2274_v18, %v2217_v3 }
 0x35d   : > { %v2301_v4 = vmax.f32 %v2275_v37, 0.0 }
 0x35f   : > { %v2312_v51 = vpack.c.bf16 %v2301_v4, %v2300_v61 }
 0x360   : > { %v2219_v5 = vpop.f32.mrf.mxu2 }
 0x361   : > { %v2277_v10 = vpop.f32.mrf.mxu3  ;;  %2426 = vmatmul.bf16.gmra.mxu0 %v2312_v51  ;;  %v2220_v42 = vadd.f32 %v5171_v24, %v2219_v5 }
 0x363   : > { %v2278_v47 = vadd.f32 %v2277_v10, %v2220_v42 }
 0x365   : > { %v2302_v19 = vmax.f32 %v2278_v47, 0.0 }
 0x368   : > { %v2221_v23 = vpop.f32.mrf.mxu2 }
 0x369   : > { %v2222_v2 = vadd.f32 %v5171_v24, %v2221_v23  ;;  %v2279_v15 = vpop.f32.mrf.mxu3 }
 0x36b   : > { %v2280_v32 = vadd.f32 %v2279_v15, %v2222_v2 }
 0x36d   : > { %v2303_v53 = vmax.f32 %v2280_v32, 0.0 }
 0x36e   : > { %v2392_v48 = vpop.f32.mrf.mxu0 }
 0x36f   : > { %v2313_v58 = vpack.c.bf16 %v2303_v53, %v2302_v19  ;;  %v2393_v26 = vadd.f32 %v5213_v17, %v2392_v48 }
 0x370   : > { %v2224_v11 = vpop.f32.mrf.mxu2 }
 0x371   : > { %v2282_v20 = vpop.f32.mrf.mxu3  ;;  %2431 = vmatmul.bf16.gmra.mxu0 %v2313_v58  ;;  %v2225_v50 = vadd.f32 %v5171_v24, %v2224_v11  ;;  %v2441_v43 = vmax.f32 %v2393_v26, 0.0 }
 0x373   : > { %v2283_v0 = vadd.f32 %v2282_v20, %v2225_v50  ;;  %v2596_v20 = vlaneseq }
 0x375   : > { %v2304_v12 = vmax.f32 %v2283_v0, 0.0 }
 0x376   : > { %v2394_v57 = vpop.f32.mrf.mxu0 }
 0x377   : > { %v2395_v59 = vadd.f32 %v5213_v17, %v2394_v57  ;;  %v2314_v39 = vpack.c.bf16 %v2304_v12, %v2304_v12  ;;  %v5233_v57 = vand.u32 127, %v2596_v20 }
 0x378   : > { %v2226_v62 = vpop.f32.mrf.mxu2 }
 0x379   : > { %v2442_v16 = vmax.f32 %v2395_v59, 0.0  ;;  %v2284_v54 = vpop.f32.mrf.mxu3  ;;  %v5239_v59 = vld [vmem:[%s5479_s8] ss:$0 sm:$0xff]  ;;  %vm2598_vm1 = vcmp.lt.s32.totalorder %v5233_v57, 10 }
 0x37b   : > { %v2460_v14 = vpack.c.bf16 %v2442_v16, %v2441_v43 }
 0x37d   : > { %2546 = vmatmul.bf16.vlgmr.msra.gmra.mxu1 %v2460_v14 }
 0x37e   : > { %v2397_v49 = vpop.f32.mrf.mxu0 }
 0x37f   : > { %v2398_v52 = vadd.f32 %v5213_v17, %v2397_v49 }
 0x381   : > { %2436 = vmatmul.bf16.gmra.mxu0 %v2314_v39  ;;  %v2443_v6 = vmax.f32 %v2398_v52, 0.0 }
 0x386   : > { %v2399_v60 = vpop.f32.mrf.mxu0 }
 0x387   : > { %v2400_v24 = vadd.f32 %v5213_v17, %v2399_v60 }
 0x389   : > { %v2444_v13 = vmax.f32 %v2400_v24, 0.0 }
 0x38b   : > { %v2461_v34 = vpack.c.bf16 %v2444_v13, %v2443_v6 }
 0x38d   : > { %2551 = vmatmul.bf16.gmra.mxu1 %v2461_v34 }
 0x38e   : > { %v2402_v38 = vpop.f32.mrf.mxu0 }
 0x38f   : > { %v2403_v41 = vadd.f32 %v5213_v17, %v2402_v38 }
 0x391   : > { %v2445_v55 = vmax.f32 %v2403_v41, 0.0 }
 0x396   : > { %v2404_v56 = vpop.f32.mrf.mxu0 }
 0x397   : > { %v2405_v40 = vadd.f32 %v5213_v17, %v2404_v56 }
 0x399   : > { %v2446_v63 = vmax.f32 %v2405_v40, 0.0 }
 0x39b   : > { %v2462_v21 = vpack.c.bf16 %v2446_v63, %v2445_v55 }
 0x39d   : > { %2556 = vmatmul.bf16.gmra.mxu1 %v2462_v21 }
 0x39e   : > { %v2407_v35 = vpop.f32.mrf.mxu0 }
 0x39f   : > { %v2408_v36 = vadd.f32 %v5213_v17, %v2407_v35 }
 0x3a1   : > { %v2447_v28 = vmax.f32 %v2408_v36, 0.0 }
 0x3a6   : > { %v2409_v46 = vpop.f32.mrf.mxu0 }
 0x3a7   : > { %v2410_v9 = vadd.f32 %v5213_v17, %v2409_v46 }
 0x3a9   : > { %v2448_v22 = vmax.f32 %v2410_v9, 0.0 }
 0x3ab   : > { %v2463_v25 = vpack.c.bf16 %v2448_v22, %v2447_v28 }
 0x3ad   : > { %2561 = vmatmul.bf16.gmra.mxu1 %v2463_v25 }
 0x3ae   : > { %v2412_v1 = vpop.f32.mrf.mxu0 }
 0x3af   : > { %v2413_v7 = vadd.f32 %v5213_v17, %v2412_v1 }
 0x3b1   : > { %v2449_v30 = vmax.f32 %v2413_v7, 0.0 }
 0x3b6   : > { %v2414_v29 = vpop.f32.mrf.mxu0 }
 0x3b7   : > { %v2415_v45 = vadd.f32 %v5213_v17, %v2414_v29 }
 0x3b9   : > { %v2450_v8 = vmax.f32 %v2415_v45, 0.0 }
 0x3bb   : > { %v2464_v44 = vpack.c.bf16 %v2450_v8, %v2449_v30 }
 0x3bd   : > { %2566 = vmatmul.bf16.gmra.mxu1 %v2464_v44 }
 0x3be   : > { %v2417_v31 = vpop.f32.mrf.mxu0 }
 0x3bf   : > { %v2418_v27 = vadd.f32 %v5213_v17, %v2417_v31 }
 0x3c1   : > { %v2451_v18 = vmax.f32 %v2418_v27, 0.0 }
 0x3c6   : > { %v2419_v33 = vpop.f32.mrf.mxu0 }
 0x3c7   : > { %v2420_v3 = vadd.f32 %v5213_v17, %v2419_v33 }
 0x3c9   : > { %v2452_v37 = vmax.f32 %v2420_v3, 0.0 }
 0x3cb   : > { %v2465_v61 = vpack.c.bf16 %v2452_v37, %v2451_v18 }
 0x3cd   : > { %2571 = vmatmul.bf16.gmra.mxu1 %v2465_v61 }
 0x3ce   : > { %v2422_v4 = vpop.f32.mrf.mxu0 }
 0x3cf   : > { %v2423_v51 = vadd.f32 %v5213_v17, %v2422_v4 }
 0x3d1   : > { %v2453_v42 = vmax.f32 %v2423_v51, 0.0 }
 0x3d6   : > { %v2424_v5 = vpop.f32.mrf.mxu0 }
 0x3d7   : > { %v2425_v10 = vadd.f32 %v5213_v17, %v2424_v5 }
 0x3d9   : > { %v2454_v23 = vmax.f32 %v2425_v10, 0.0 }
 0x3db   : > { %v2466_v47 = vpack.c.bf16 %v2454_v23, %v2453_v42 }
 0x3dd   : > { %2576 = vmatmul.bf16.gmra.mxu1 %v2466_v47 }
 0x3de   : > { %v2427_v2 = vpop.f32.mrf.mxu0 }
 0x3df   : > { %v2428_v15 = vadd.f32 %v5213_v17, %v2427_v2 }
 0x3e1   : > { %v2455_v53 = vmax.f32 %v2428_v15, 0.0 }
 0x3e6   : > { %v2429_v32 = vpop.f32.mrf.mxu0 }
 0x3e7   : > { %v2430_v19 = vadd.f32 %v5213_v17, %v2429_v32 }
 0x3e9   : > { %v2456_v48 = vmax.f32 %v2430_v19, 0.0 }
 0x3eb   : > { %v2467_v58 = vpack.c.bf16 %v2456_v48, %v2455_v53 }
 0x3ed   : > { %2581 = vmatmul.bf16.gmra.mxu1 %v2467_v58 }
 0x3ee   : > { %v2432_v11 = vpop.f32.mrf.mxu0 }
 0x3ef   : > { %v2433_v50 = vadd.f32 %v5213_v17, %v2432_v11 }
 0x3f1   : > { %v2457_v62 = vmax.f32 %v2433_v50, 0.0 }
 0x3f6   : > { %v2434_v26 = vpop.f32.mrf.mxu0 }
 0x3f7   : > { %v2435_v0 = vadd.f32 %v5213_v17, %v2434_v26 }
 0x3f9   : > { %v2458_v43 = vmax.f32 %v2435_v0, 0.0 }
 0x3fa   : > { %v2547_v16 = vpop.f32.mrf.mxu1 }
 0x3fb   : > { %v2468_v54 = vpack.c.bf16 %v2458_v43, %v2457_v62  ;;  %v2548_v12 = vadd.f32 %v5239_v59, %v2547_v16 }
 0x3fd   : > { %2586 = vmatmul.bf16.gmra.mxu1 %v2468_v54  ;;  %v5245_v14 = vsel %vm2598_vm1, %v2548_v12, -1e+30 }
 0x3fe   : > { %v2437_v49 = vpop.f32.mrf.mxu0  ;;  %2618 = vmax.xlane.f32.xlu0 %v5245_v14 }
 0x3ff   : > { %v2438_v52 = vadd.f32 %v5213_v17, %v2437_v49 }
 0x401   : > { %v2459_v13 = vmax.f32 %v2438_v52, 0.0 }
 0x402   : > { %v2549_v39 = vpop.f32.mrf.mxu1 }
 0x403   : > { %v2550_v60 = vadd.f32 %v5239_v59, %v2549_v39  ;;  %v2469_v38 = vpack.c.bf16 %v2459_v13, %v2459_v13 }
 0x405   : > { %v5252_v24 = vsel %vm2598_vm1, %v2550_v60, -1e+30 }
 0x406   : > { %v2439_v6 = vpop.f32.mrf.mxu0  ;;  %2620 = vmax.xlane.f32.xlu0 %v5252_v24 }
 0x40a   : > { %v2552_v34 = vpop.f32.mrf.mxu1 }
 0x40b   : > { %v2553_v41 = vadd.f32 %v5239_v59, %v2552_v34 }
 0x40d   : > { %2591 = vmatmul.bf16.gmra.mxu1 %v2469_v38  ;;  %v5258_v56 = vsel %vm2598_vm1, %v2553_v41, -1e+30 }
 0x40e   : > { %2622 = vmax.xlane.f32.xlu1 %v5258_v56 }
 0x412   : > { %v2554_v17 = vpop.f32.mrf.mxu1 }
 0x413   : > { %v2555_v40 = vadd.f32 %v5239_v59, %v2554_v17 }
 0x415   : > { %v5264_v55 = vsel %vm2598_vm1, %v2555_v40, -1e+30 }
 0x416   : > { %2624 = vmax.xlane.f32.xlu1 %v5264_v55 }
 0x41a   : > { %v2557_v63 = vpop.f32.mrf.mxu1 }
 0x41b   : > { %v2558_v21 = vadd.f32 %v5239_v59, %v2557_v63 }
 0x41d   : > { %v5270_v35 = vsel %vm2598_vm1, %v2558_v21, -1e+30 }
 0x41e   : > { %2626 = vmax.xlane.f32.xlu2 %v5270_v35 }
 0x422   : > { %v2559_v36 = vpop.f32.mrf.mxu1 }
 0x423   : > { %v2560_v46 = vadd.f32 %v5239_v59, %v2559_v36 }
 0x425   : > { %v5276_v9 = vsel %vm2598_vm1, %v2560_v46, -1e+30 }
 0x426   : > { %2628 = vmax.xlane.f32.xlu2 %v5276_v9 }
 0x42a   : > { %v2562_v28 = vpop.f32.mrf.mxu1 }
 0x42b   : > { %v2563_v22 = vadd.f32 %v5239_v59, %v2562_v28 }
 0x42d   : > { %v5282_v25 = vsel %vm2598_vm1, %v2563_v22, -1e+30 }
 0x42e   : > { %2630 = vmax.xlane.f32.xlu0 %v5282_v25 }
 0x432   : > { %v2564_v1 = vpop.f32.mrf.mxu1 }
 0x433   : > { %v2565_v7 = vadd.f32 %v5239_v59, %v2564_v1 }
 0x435   : > { %v5288_v29 = vsel %vm2598_vm1, %v2565_v7, -1e+30 }
 0x436   : > { %2632 = vmax.xlane.f32.xlu1 %v5288_v29 }
 0x43a   : > { %v2567_v45 = vpop.f32.mrf.mxu1 }
 0x43b   : > { %v2568_v30 = vadd.f32 %v5239_v59, %v2567_v45 }
 0x43d   : > { %v5294_v8 = vsel %vm2598_vm1, %v2568_v30, -1e+30 }
 0x43e   : > { %2634 = vmax.xlane.f32.xlu2 %v5294_v8 }
 0x442   : > { %v2569_v44 = vpop.f32.mrf.mxu1 }
 0x443   : > { %v2570_v31 = vadd.f32 %v5239_v59, %v2569_v44 }
 0x445   : > { %v5300_v27 = vsel %vm2598_vm1, %v2570_v31, -1e+30 }
 0x446   : > { %2636 = vmax.xlane.f32.xlu0 %v5300_v27 }
 0x44a   : > { %v2572_v33 = vpop.f32.mrf.mxu1 }
 0x44b   : > { %v2573_v3 = vadd.f32 %v5239_v59, %v2572_v33 }
 0x44d   : > { %v5306_v18 = vsel %vm2598_vm1, %v2573_v3, -1e+30 }
 0x44e   : > { %2638 = vmax.xlane.f32.xlu1 %v5306_v18 }
 0x452   : > { %v2574_v37 = vpop.f32.mrf.mxu1 }
 0x453   : > { %v2575_v61 = vadd.f32 %v5239_v59, %v2574_v37 }
 0x455   : > { %v5312_v4 = vsel %vm2598_vm1, %v2575_v61, -1e+30 }
 0x456   : > { %2640 = vmax.xlane.f32.xlu2 %v5312_v4 }
 0x45a   : > { %v2577_v51 = vpop.f32.mrf.mxu1 }
 0x45b   : > { %v2578_v5 = vadd.f32 %v5239_v59, %v2577_v51 }
 0x45d   : > { %v5318_v10 = vsel %vm2598_vm1, %v2578_v5, -1e+30 }
 0x45e   : > { %2642 = vmax.xlane.f32.xlu0 %v5318_v10 }
 0x462   : > { %v2579_v42 = vpop.f32.mrf.mxu1 }
 0x463   : > { %v2580_v23 = vadd.f32 %v5239_v59, %v2579_v42 }
 0x465   : > { %v5324_v47 = vsel %vm2598_vm1, %v2580_v23, -1e+30 }
 0x466   : > { %2644 = vmax.xlane.f32.xlu1 %v5324_v47 }
 0x46a   : > { %v2582_v2 = vpop.f32.mrf.mxu1 }
 0x46b   : > { %v2583_v15 = vadd.f32 %v5239_v59, %v2582_v2 }
 0x46d   : > { %v5330_v32 = vsel %vm2598_vm1, %v2583_v15, -1e+30 }
 0x46e   : > { %2646 = vmax.xlane.f32.xlu2 %v5330_v32 }
 0x471   : > { %v2619_v19 = vpop.xlane.xlu0 %2618 }
 0x472   : > { %v2584_v53 = vpop.f32.mrf.mxu1  ;;  %v5340_v11 = vsub.f32 %v5245_v14, %v2619_v19 }
 0x473   : > { %v2585_v48 = vadd.f32 %v5239_v59, %v2584_v53 }
 0x474   : > { %v2675_v50 = vmul.f32 1.442695, %v5340_v11 }
 0x475   : > { %v5336_v58 = vsel %vm2598_vm1, %v2585_v48, -1e+30 }
 0x476   : > { %2648 = vmax.xlane.f32.xlu0 %v5336_v58  ;;  %3662 = vpow2.f32 %v2675_v50 }
 0x479   : > { %v2621_v0 = vpop.xlane.xlu0 %2620 }
 0x47a   : > { %v2587_v20 = vpop.f32.mrf.mxu1  ;;  %v5350_v43 = vsub.f32 %v5252_v24, %v2621_v0 }
 0x47b   : > { %v2588_v26 = vadd.f32 %v5239_v59, %v2587_v20 }
 0x47c   : > { %v2677_v12 = vmul.f32 1.442695, %v5350_v43  ;;  %v3663_v49 = vpop.eup %3662 }
 0x47d   : > { %v5346_v62 = vsel %vm2598_vm1, %v2588_v26, -1e+30 }
 0x47e   : > { %2650 = vmax.xlane.f32.xlu1 %v5346_v62  ;;  %3664 = vpow2.f32 %v2677_v12 }
 0x481   : > { %v2623_v16 = vpop.xlane.xlu1 %2622 }
 0x482   : > { %v2589_v54 = vpop.f32.mrf.mxu1  ;;  %v5360_v52 = vsub.f32 %v5258_v56, %v2623_v16 }
 0x483   : > { %v2590_v14 = vadd.f32 %v5239_v59, %v2589_v54 }
 0x484   : > { %v2679_v13 = vmul.f32 1.442695, %v5360_v52  ;;  %v3665_v41 = vpop.eup %3664 }
 0x485   : > { %v5356_v39 = vsel %vm2598_vm1, %v2590_v14, -1e+30 }
 0x486   : > { %2652 = vmax.xlane.f32.xlu2 %v5356_v39  ;;  %2713 = vadd.xlane.f32.xlu1 %v3663_v49 }
 0x489   : > { %v2625_v60 = vpop.xlane.xlu1 %2624 }
 0x48a   : > { %v5363_v24 = vsub.f32 %v5264_v55, %v2625_v60  ;;  %v2592_v6 = vpop.f32.mrf.mxu1 }
 0x48b   : > { %v2593_v34 = vadd.f32 %v5239_v59, %v2592_v6 }
 0x48c   : > { %v2681_v38 = vmul.f32 1.442695, %v5363_v24 }
 0x48d   : > { %v5370_v17 = vsel %vm2598_vm1, %v2593_v34, -1e+30 }
 0x48e   : > { %3666 = vpow2.f32 %v2681_v38  ;;  %2654 = vmax.xlane.f32.xlu0 %v5370_v17  ;;  %2715 = vadd.xlane.f32.xlu2 %v3665_v41 }
 0x48f   : > { %3668 = vpow2.f32 %v2679_v13 }
 0x491   : > { %v2627_v56 = vpop.xlane.xlu2 %2626 }
 0x492   : > { %v5374_v40 = vsub.f32 %v5270_v35, %v2627_v56  ;;  %v2594_v55 = vpop.f32.mrf.mxu1 }
 0x494   : > { %v3667_v63 = vpop.eup %3666  ;;  %v2683_v59 = vmul.f32 1.442695, %v5374_v40 }
 0x495   : > { %v3669_v21 = vpop.eup %3668  ;;  %2719 = vadd.xlane.f32.xlu1 %v3667_v63 }
 0x496   : > { %3670 = vpow2.f32 %v2683_v59  ;;  %2717 = vadd.xlane.f32.xlu0 %v3669_v21 }
 0x499   : > { %v2629_v57 = vpop.xlane.xlu2 %2628 }
 0x49a   : > { %v5378_v36 = vsub.f32 %v5276_v9, %v2629_v57 }
 0x49c   : > { %v3671_v46 = vpop.eup %3670  ;;  %v2685_v28 = vmul.f32 1.442695, %v5378_v36 }
 0x49d   : > { %2721 = vadd.xlane.f32.xlu2 %v3671_v46 }
 0x49e   : > { %3672 = vpow2.f32 %v2685_v28 }
 0x4a1   : > { %v2631_v22 = vpop.xlane.xlu0 %2630 }
 0x4a2   : > { %v5382_v35 = vsub.f32 %v5282_v25, %v2631_v22 }
 0x4a4   : > { %v3673_v1 = vpop.eup %3672  ;;  %v2687_v7 = vmul.f32 1.442695, %v5382_v35 }
 0x4a5   : > { %2723 = vadd.xlane.f32.xlu0 %v3673_v1 }
 0x4a6   : > { %3674 = vpow2.f32 %v2687_v7 }
 0x4a9   : > { %v2633_v45 = vpop.xlane.xlu1 %2632 }
 0x4aa   : > { %v5386_v30 = vsub.f32 %v5288_v29, %v2633_v45 }
 0x4ac   : > { %v3675_v9 = vpop.eup %3674  ;;  %v2689_v44 = vmul.f32 1.442695, %v5386_v30 }
 0x4ad   : > { %2725 = vadd.xlane.f32.xlu1 %v3675_v9 }
 0x4ae   : > { %3676 = vpow2.f32 %v2689_v44 }
 0x4b1   : > { %v2635_v31 = vpop.xlane.xlu2 %2634 }
 0x4b2   : > { %v5390_v33 = vsub.f32 %v5294_v8, %v2635_v31 }
 0x4b4   : > { %v3677_v25 = vpop.eup %3676  ;;  %v2691_v3 = vmul.f32 1.442695, %v5390_v33 }
 0x4b5   : > { %2727 = vadd.xlane.f32.xlu2 %v3677_v25 }
 0x4b6   : > { %3678 = vpow2.f32 %v2691_v3 }
 0x4b9   : > { %v2637_v37 = vpop.xlane.xlu0 %2636 }
 0x4ba   : > { %v5394_v61 = vsub.f32 %v5300_v27, %v2637_v37 }
 0x4bc   : > { %v3679_v29 = vpop.eup %3678  ;;  %v2693_v51 = vmul.f32 1.442695, %v5394_v61 }
 0x4bd   : > { %2729 = vadd.xlane.f32.xlu0 %v3679_v29 }
 0x4be   : > { %3680 = vpow2.f32 %v2693_v51 }
 0x4c1   : > { %v2639_v5 = vpop.xlane.xlu1 %2638 }
 0x4c2   : > { %v5398_v42 = vsub.f32 %v5306_v18, %v2639_v5 }
 0x4c4   : > { %v3681_v8 = vpop.eup %3680  ;;  %v2695_v23 = vmul.f32 1.442695, %v5398_v42 }
 0x4c5   : > { %2731 = vadd.xlane.f32.xlu1 %v3681_v8 }
 0x4c6   : > { %3682 = vpow2.f32 %v2695_v23 }
 0x4c9   : > { %v2641_v2 = vpop.xlane.xlu2 %2640 }
 0x4ca   : > { %v5402_v15 = vsub.f32 %v5312_v4, %v2641_v2 }
 0x4cc   : > { %v3683_v27 = vpop.eup %3682  ;;  %v2697_v19 = vmul.f32 1.442695, %v5402_v15 }
 0x4cd   : > { %2733 = vadd.xlane.f32.xlu2 %v3683_v27 }
 0x4ce   : > { %3684 = vpow2.f32 %v2697_v19 }
 0x4d1   : > { %v2643_v53 = vpop.xlane.xlu0 %2642 }
 0x4d2   : > { %v5406_v48 = vsub.f32 %v5318_v10, %v2643_v53 }
 0x4d4   : > { %v3685_v18 = vpop.eup %3684  ;;  %v2699_v20 = vmul.f32 1.442695, %v5406_v48 }
 0x4d5   : > { %2735 = vadd.xlane.f32.xlu0 %v3685_v18 }
 0x4d6   : > { %3686 = vpow2.f32 %v2699_v20 }
 0x4d9   : > { %v2645_v50 = vpop.xlane.xlu1 %2644 }
 0x4da   : > { %v5410_v26 = vsub.f32 %v5324_v47, %v2645_v50 }
 0x4dc   : > { %v3687_v4 = vpop.eup %3686  ;;  %v2701_v0 = vmul.f32 1.442695, %v5410_v26 }
 0x4dd   : > { %2737 = vadd.xlane.f32.xlu1 %v3687_v4 }
 0x4de   : > { %3688 = vpow2.f32 %v2701_v0 }
 0x4e1   : > { %v2647_v16 = vpop.xlane.xlu2 %2646 }
 0x4e2   : > { %v5414_v54 = vsub.f32 %v5330_v32, %v2647_v16 }
 0x4e4   : > { %v3689_v10 = vpop.eup %3688  ;;  %v2703_v12 = vmul.f32 1.442695, %v5414_v54 }
 0x4e5   : > { %2739 = vadd.xlane.f32.xlu2 %v3689_v10 }
 0x4e6   : > { %3690 = vpow2.f32 %v2703_v12 }
 0x4e9   : > { %v2649_v14 = vpop.xlane.xlu0 %2648 }
 0x4ea   : > { %v5418_v49 = vsub.f32 %v5336_v58, %v2649_v14 }
 0x4ec   : > { %v3691_v47 = vpop.eup %3690  ;;  %v2705_v60 = vmul.f32 1.442695, %v5418_v49 }
 0x4ed   : > { %2741 = vadd.xlane.f32.xlu0 %v3691_v47 }
 0x4ee   : > { %3692 = vpow2.f32 %v2705_v60 }
 0x4f1   : > { %v2651_v6 = vpop.xlane.xlu1 %2650 }
 0x4f2   : > { %v5422_v13 = vsub.f32 %v5346_v62, %v2651_v6 }
 0x4f4   : > { %v3693_v32 = vpop.eup %3692  ;;  %v2707_v34 = vmul.f32 1.442695, %v5422_v13 }
 0x4f5   : > { %2743 = vadd.xlane.f32.xlu1 %v3693_v32 }
 0x4f6   : > { %3694 = vpow2.f32 %v2707_v34 }
 0x4f9   : > { %v2653_v38 = vpop.xlane.xlu2 %2652  ;;  %v2714_v58 = vpop.xlane.xlu1 %2713 }
 0x4fa   : > { %v5426_v41 = vsub.f32 %v5356_v39, %v2653_v38  ;;  %3696 = vlog2.f32 %v2714_v58 }
 0x4fc   : > { %v3695_v56 = vpop.eup %3694  ;;  %v2709_v55 = vmul.f32 1.442695, %v5426_v41 }
 0x4fd   : > { %2745 = vadd.xlane.f32.xlu2 %v3695_v56 }
 0x4fe   : > { %3698 = vpow2.f32 %v2709_v55 }
 0x500   : > { %v3697_v21 = vpop.eup %3696 }
 0x501   : > { %v2716_v63 = vpop.xlane.xlu2 %2715  ;;  %v2655_v62 = vpop.xlane.xlu0 %2654  ;;  %v2752_v39 = vmul.f32 0.6931472, %v3697_v21 }
 0x502   : > { %3700 = vlog2.f32 %v2716_v63  ;;  %v5430_v59 = vsub.f32 %v5370_v17, %v2655_v62 }
 0x503   : > { %v2789_v45 = vsub.f32 %v5340_v11, %v2752_v39 }
 0x504   : > { %v3699_v57 = vpop.eup %3698  ;;  %v2711_v46 = vmul.f32 1.442695, %v5430_v59 }
 0x505   : > { %2747 = vadd.xlane.f32.xlu0 %v3699_v57 }
 0x506   : > { %3702 = vpow2.f32 %v2711_v46 }
 0x508   : > { %v3701_v28 = vpop.eup %3700  ;;  %v2720_v22 = vpop.xlane.xlu1 %2719 }
 0x509   : > { %v2754_v1 = vmul.f32 0.6931472, %v3701_v28  ;;  %3704 = vlog2.f32 %v2720_v22  ;;  %v2718_v7 = vpop.xlane.xlu0 %2717 }
 0x50a   : > { %3706 = vlog2.f32 %v2718_v7 }
 0x50b   : > { %v2790_v9 = vsub.f32 %v5350_v43, %v2754_v1 }
 0x50c   : > { %v3703_v17 = vpop.eup %3702 }
 0x50d   : > { %v3584_v44 = vpack.c.bf16 %v2790_v9, %v2789_v45  ;;  %2749 = vadd.xlane.f32.xlu1 %v3703_v17 }
 0x50f   : > { %v3705_v31 = vpop.eup %3704  ;;  %3585 = vst [vmem:[%s5439_s28] sm:$0xff] %v3584_v44  }
 0x510   : > { %v3707_v25 = vpop.eup %3706  ;;  %v2758_v3 = vmul.f32 0.6931472, %v3705_v31  ;;  %v2722_v11 = vpop.xlane.xlu2 %2721 }
 0x511   : > { %v2756_v37 = vmul.f32 0.6931472, %v3707_v25  ;;  %3708 = vlog2.f32 %v2722_v11 }
 0x512   : > { %v2792_v29 = vsub.f32 %v5363_v24, %v2758_v3 }
 0x513   : > { %v2791_v43 = vsub.f32 %v5360_v52, %v2756_v37 }
 0x515   : > { %v3589_v51 = vpack.c.bf16 %v2792_v29, %v2791_v43 }
 0x517   : > { %3626 = vst [vmem:[%s5439_s28 + $0x8] sm:$0xff] %v3589_v51   ;;  %v3709_v8 = vpop.eup %3708 }
 0x518   : > { %v2724_v5 = vpop.xlane.xlu0 %2723  ;;  %v2760_v23 = vmul.f32 0.6931472, %v3709_v8 }
 0x519   : > { %3710 = vlog2.f32 %v2724_v5 }
 0x51a   : > { %v2793_v19 = vsub.f32 %v5374_v40, %v2760_v23 }
 0x51f   : > { %v3711_v2 = vpop.eup %3710 }
 0x520   : > { %v2762_v27 = vmul.f32 0.6931472, %v3711_v2  ;;  %v2726_v18 = vpop.xlane.xlu1 %2725 }
 0x521   : > { %3712 = vlog2.f32 %v2726_v18 }
 0x522   : > { %v2794_v53 = vsub.f32 %v5378_v36, %v2762_v27 }
 0x524   : > { %v3594_v24 = vpack.c.bf16 %v2794_v53, %v2793_v19 }
 0x526   : > { %3627 = vst [vmem:[%s5439_s28 + $0x10] sm:$0xff] %v3594_v24  }
 0x527   : > { %v3713_v52 = vpop.eup %3712 }
 0x528   : > { %v2728_v20 = vpop.xlane.xlu2 %2727  ;;  %v2764_v50 = vmul.f32 0.6931472, %v3713_v52 }
 0x529   : > { %3714 = vlog2.f32 %v2728_v20 }
 0x52a   : > { %v2795_v16 = vsub.f32 %v5382_v35, %v2764_v50 }
 0x52f   : > { %v3715_v4 = vpop.eup %3714 }
 0x530   : > { %v2766_v0 = vmul.f32 0.6931472, %v3715_v4  ;;  %v2730_v12 = vpop.xlane.xlu0 %2729 }
 0x531   : > { %3716 = vlog2.f32 %v2730_v12 }
 0x532   : > { %v2796_v10 = vsub.f32 %v5386_v30, %v2766_v0 }
 0x534   : > { %v3599_v40 = vpack.c.bf16 %v2796_v10, %v2795_v16 }
 0x536   : > { %3628 = vst [vmem:[%s5439_s28 + $0x18] sm:$0xff] %v3599_v40  }
 0x537   : > { %v3717_v14 = vpop.eup %3716 }
 0x538   : > { %v2732_v36 = vpop.xlane.xlu1 %2731  ;;  %v2768_v47 = vmul.f32 0.6931472, %v3717_v14 }
 0x539   : > { %3718 = vlog2.f32 %v2732_v36 }
 0x53a   : > { %v2797_v32 = vsub.f32 %v5390_v33, %v2768_v47 }
 0x53f   : > { %v3719_v60 = vpop.eup %3718 }
 0x540   : > { %v2770_v6 = vmul.f32 0.6931472, %v3719_v60  ;;  %v2734_v38 = vpop.xlane.xlu2 %2733 }
 0x541   : > { %3720 = vlog2.f32 %v2734_v38 }
 0x542   : > { %v2798_v34 = vsub.f32 %v5394_v61, %v2770_v6 }
 0x544   : > { %v3604_v35 = vpack.c.bf16 %v2798_v34, %v2797_v32 }
 0x546   : > { %3629 = vst [vmem:[%s5439_s28 + $0x20] sm:$0xff] %v3604_v35  }
 0x547   : > { %v3721_v58 = vpop.eup %3720 }
 0x548   : > { %v2736_v30 = vpop.xlane.xlu0 %2735  ;;  %v2772_v56 = vmul.f32 0.6931472, %v3721_v58 }
 0x549   : > { %3722 = vlog2.f32 %v2736_v30 }
 0x54a   : > { %v2799_v62 = vsub.f32 %v5398_v42, %v2772_v56 }
 0x54f   : > { %v3723_v55 = vpop.eup %3722 }
 0x550   : > { %v2774_v63 = vmul.f32 0.6931472, %v3723_v55  ;;  %v2738_v57 = vpop.xlane.xlu1 %2737 }
 0x551   : > { %3724 = vlog2.f32 %v2738_v57 }
 0x552   : > { %v2800_v21 = vsub.f32 %v5402_v15, %v2774_v63 }
 0x554   : > { %v3609_v33 = vpack.c.bf16 %v2800_v21, %v2799_v62 }
 0x556   : > { %3630 = vst [vmem:[%s5439_s28 + $0x28] sm:$0xff] %v3609_v33  }
 0x557   : > { %v3725_v46 = vpop.eup %3724 }
 0x558   : > { %v2740_v61 = vpop.xlane.xlu2 %2739  ;;  %v2776_v39 = vmul.f32 0.6931472, %v3725_v46 }
 0x559   : > { %3726 = vlog2.f32 %v2740_v61 }
 0x55a   : > { %v2801_v1 = vsub.f32 %v5406_v48, %v2776_v39 }
 0x55f   : > { %v3727_v28 = vpop.eup %3726 }
 0x560   : > { %v2778_v22 = vmul.f32 0.6931472, %v3727_v28  ;;  %v2742_v45 = vpop.xlane.xlu0 %2741 }
 0x561   : > { %3728 = vlog2.f32 %v2742_v45 }
 0x562   : > { %v2802_v7 = vsub.f32 %v5410_v26, %v2778_v22 }
 0x564   : > { %v3614_v42 = vpack.c.bf16 %v2802_v7, %v2801_v1 }
 0x566   : > { %3631 = vst [vmem:[%s5439_s28 + $0x30] sm:$0xff] %v3614_v42  }
 0x567   : > { %v3729_v9 = vpop.eup %3728 }
 0x568   : > { %v2744_v15 = vpop.xlane.xlu1 %2743  ;;  %v2780_v17 = vmul.f32 0.6931472, %v3729_v9 }
 0x569   : > { %3730 = vlog2.f32 %v2744_v15 }
 0x56a   : > { %v2803_v25 = vsub.f32 %v5414_v54, %v2780_v17 }
 0x56f   : > { %v3731_v44 = vpop.eup %3730 }
 0x570   : > { %v2782_v31 = vmul.f32 0.6931472, %v3731_v44  ;;  %v2746_v37 = vpop.xlane.xlu2 %2745 }
 0x571   : > { %3732 = vlog2.f32 %v2746_v37 }
 0x572   : > { %v2804_v3 = vsub.f32 %v5418_v49, %v2782_v31 }
 0x574   : > { %v3619_v48 = vpack.c.bf16 %v2804_v3, %v2803_v25 }
 0x576   : > { %3632 = vst [vmem:[%s5439_s28 + $0x38] sm:$0xff] %v3619_v48  }
 0x577   : > { %v3733_v29 = vpop.eup %3732 }
 0x578   : > { %v2748_v26 = vpop.xlane.xlu0 %2747  ;;  %v2784_v11 = vmul.f32 0.6931472, %v3733_v29 }
 0x579   : > { %3734 = vlog2.f32 %v2748_v26 }
 0x57a   : > { %v2805_v8 = vsub.f32 %v5422_v13, %v2784_v11 }
 0x57f   : > { %v3735_v43 = vpop.eup %3734 }
 0x580   : > { %v2786_v51 = vmul.f32 0.6931472, %v3735_v43  ;;  %v2750_v5 = vpop.xlane.xlu1 %2749 }
 0x581   : > { %3736 = vlog2.f32 %v2750_v5 }
 0x582   : > { %v2806_v54 = vsub.f32 %v5426_v41, %v2786_v51 }
 0x584   : > { %v3624_v23 = vpack.c.bf16 %v2806_v54, %v2805_v8 }
 0x586   : > { %3633 = vst [vmem:[%s5439_s28 + $0x40] sm:$0xff] %v3624_v23  }
 0x587   : > { %v3737_v49 = vpop.eup %3736 }
 0x588   : > { %v2788_v2 = vmul.f32 0.6931472, %v3737_v49 }
 0x58a   : > { %v2807_v27 = vsub.f32 %v5430_v59, %v2788_v2 }
 0x58c   : > { %v2826_v19 = vpack.c.bf16 %v2807_v27, %v2807_v27 }
 0x58e   : > { %2845 = vst [vmem:[%s5439_s28 + $0x48] sm:$0xf] %v2826_v19 }
 0x58f PF: > { %s19_s30 = sadd.s32 1, %s3745_s30  }
 0x590   : > { %p16_p4 = scmp.ge.s32.totalorder %s19_s30, 4  }
 0x592   :  { %18 = sbr.rel (!%p16_p4) target bundleno = 1 (0x1), region = 86 }

</bundles_post_ra>
